<compile_context>
chip_gen: v5e
topology: v5e:2x2
jax: 0.10.0
libtpu: 0.0.40
codegen_flags: <defaults>
</compile_context>

<pallas_src>
import functools

import jax
import jax.numpy as jnp
from jax.experimental import pallas as pl
from jax.experimental.pallas import tpu as pltpu


def conditional_net_kernel(
    xc_ref,                      # [tile_b, DF+DC] bf16   (x | cond)
    wf_ref, bf_ref,              # fused first matmul: [(DF+DC), 4H] bf16, [1, 4H] f32
    w2_ref, b2_ref,              # [H, H] bf16, [1, H] f32
    w3_ref, b3_ref,              # [H, H] bf16, [1, H] f32
    wo_ref, bo_ref,              # [H, DO] bf16, [1, DO] f32
    out_ref,                     # [tile_b, DO]
    *,
    dim_feature,
):
    H = w2_ref.shape[0]

    xc = xc_ref[...]  # bf16
    # ReLU only the cond lanes (lane >= dim_feature); x lanes pass through untouched.
    lane = jax.lax.broadcasted_iota(jnp.int32, xc.shape, 1)
    xc_act = jnp.where(lane >= dim_feature, jnp.maximum(xc, 0), xc)

    # One fused K=(DF+DC) matmul producing [h1_pre | gate1 | gate2 | gate3].
    # wf is block-diagonal: [:DF, :H] = W1, [DF:, H:] = [Wc1|Wc2|Wc3];
    # bf already has cond_bias (=1.0) folded into the gate biases.
    hg = (
        jnp.dot(xc_act, wf_ref[...], preferred_element_type=jnp.float32)
        + bf_ref[...]
    )  # f32 [tile_b, 4H]

    # Block 1: Linear (fused above) -> dropout(eval)=identity -> modulate -> ReLU.
    h = jnp.maximum(hg[:, 0 * H:1 * H] * hg[:, 1 * H:2 * H], 0.0)

    # Block 2.
    h = (
        jnp.dot(h.astype(jnp.bfloat16), w2_ref[...],
                preferred_element_type=jnp.float32)
        + b2_ref[...]
    )
    h = jnp.maximum(h * hg[:, 2 * H:3 * H], 0.0)

    # Block 3.
    h = (
        jnp.dot(h.astype(jnp.bfloat16), w3_ref[...],
                preferred_element_type=jnp.float32)
        + b3_ref[...]
    )
    h = jnp.maximum(h * hg[:, 3 * H:4 * H], 0.0)

    # Output projection.
    out = (
        jnp.dot(h.astype(jnp.bfloat16), wo_ref[...],
                preferred_element_type=jnp.float32)
        + bo_ref[...]
    )
    out_ref[...] = out.astype(out_ref.dtype)


def _pick_tile_b(B):
    """Largest of (512, 256, 128) that keeps grid >= 2 (v7x 2-TC); full batch if tiny."""
    for t in (512, 256, 128):
        if B > t:
            return t
    return B


def _vmem_limit_bytes(params, tile_b, d_in, d_out, out_itemsize):
    weight_bytes = sum(int(v.size) * v.dtype.itemsize for v in params.values())
    act_bytes = tile_b * d_in * 2 + tile_b * d_out * out_itemsize
    # Default pipeline double-buffers every operand (incl. constant-index weights).
    needed = 2 * weight_bytes + 2 * act_bytes + (4 << 20)
    try:
        cap = int(pltpu.get_tpu_info().vmem_capacity_bytes * 0.85)
    except Exception:
        cap = 54 * (1 << 20)  # conservative: under v7x's 64 MiB physical VMEM
    return int(max(min(needed, cap), 16 << 20))


def conditional_net(x, cond, params, *, tile_b=None, out_dtype=jnp.float32):
    """x: [B, dim_feature] f32, cond: [B, dim_cond] f32 -> [B, dim_out] out_dtype."""
    B, dim_feature = x.shape
    dim_cond = cond.shape[1]
    dim_out = params["wo"].shape[1]
    d_in = dim_feature + dim_cond

    if tile_b is None:
        tile_b = _pick_tile_b(B)
    grid = (pl.cdiv(B, tile_b),)  # ragged last tile handled by masked edge blocks

    # Single merged, bf16 activation stream: one input DMA per step, half the bytes.
    xc = jnp.concatenate([x, cond], axis=1).astype(jnp.bfloat16)

    def row_spec(d):
        # Batch-tiled tensors: new block every grid step -> pipelined HBM DMA.
        return pl.BlockSpec((tile_b, d), lambda i: (i, 0))

    def const_spec(arr):
        # Weights/biases: constant block index -> DMA'd once, VMEM-resident across steps.
        return pl.BlockSpec(arr.shape, lambda i: (0, 0))

    operands = (
        xc,
        params["wf"], params["bf"],
        params["w2"], params["b2"],
        params["w3"], params["b3"],
        params["wo"], params["bo"],
    )
    in_specs = [row_spec(d_in)] + [const_spec(op) for op in operands[1:]]

    out = pl.pallas_call(
        functools.partial(conditional_net_kernel, dim_feature=dim_feature),
        out_shape=jax.ShapeDtypeStruct((B, dim_out), out_dtype),
        grid=grid,
        in_specs=in_specs,
        out_specs=row_spec(dim_out),
        compiler_params=pltpu.CompilerParams(
            # batch axis is independent -> shards across v7x's 2 TCs; no-op on v5e/v6e
            dimension_semantics=("parallel",),
            vmem_limit_bytes=_vmem_limit_bytes(
                params, tile_b, d_in, dim_out, jnp.dtype(out_dtype).itemsize),
        ),
    )(*operands)
    return out


def init_params(key, dim_feature, dim_cond, dim_hidden, dim_out, n_blocks=3):
    """Deterministic synthetic f32 parameters (PyTorch-Linear-like uniform init).

    Weights stored as [in, out]; biases as [1, out]."""
    params = {}
    keys = jax.random.split(key, 4 * n_blocks + 2)
    ki = iter(range(len(keys)))

    def linear(k_w, k_b, d_in, d_out):
        bound = 1.0 / jnp.sqrt(d_in)
        w = jax.random.uniform(k_w, (d_in, d_out), jnp.float32, -bound, bound)
        b = jax.random.uniform(k_b, (1, d_out), jnp.float32, -bound, bound)
        return w, b

    dims_in = [dim_feature] + [dim_hidden] * (n_blocks - 1)
    for i in range(n_blocks):
        w, b = linear(keys[next(ki)], keys[next(ki)], dims_in[i], dim_hidden)
        wc, bc = linear(keys[next(ki)], keys[next(ki)], dim_cond, dim_hidden)
        params[f"w{i+1}"], params[f"b{i+1}"] = w, b
        params[f"wc{i+1}"], params[f"bc{i+1}"] = wc, bc

    wo, bo = linear(keys[next(ki)], keys[next(ki)], dim_hidden, dim_out)
    params["wo"], params["bo"] = wo, bo
    return params


def prepare_params(raw, n_blocks=3, cond_bias=1.0):
    """Kernel-side parameter prep.

    Builds the block-diagonal fused first matmul:
        wf[:DF, :H]  = W1            (first-block Linear)
        wf[DF:, H:]  = [Wc1|Wc2|Wc3] (all cond Linears)
        bf           = [b1 | bc1+cb | bc2+cb | bc3+cb]   (cond_bias folded in)
    Weights bf16; biases stay f32 (added post f32-accumulation)."""
    assert n_blocks == 3, "kernel is specialized to the module default n_blocks=3"
    DF, H = raw["w1"].shape
    DC = raw["wc1"].shape[0]

    wc_all = jnp.concatenate([raw[f"wc{i}"] for i in range(1, n_blocks + 1)], axis=1)
    wf = jnp.zeros((DF + DC, (n_blocks + 1) * H), jnp.float32)
    wf = wf.at[:DF, :H].set(raw["w1"])
    wf = wf.at[DF:, H:].set(wc_all)
    bf = jnp.concatenate(
        [raw["b1"]] + [raw[f"bc{i}"] + cond_bias for i in range(1, n_blocks + 1)],
        axis=1,
    )

    p = {"wf": wf.astype(jnp.bfloat16), "bf": bf}
    for i in range(2, n_blocks + 1):
        p[f"w{i}"] = raw[f"w{i}"].astype(jnp.bfloat16)
        p[f"b{i}"] = raw[f"b{i}"]
    p["wo"] = raw["wo"].astype(jnp.bfloat16)
    p["bo"] = raw["bo"]
    return p


def reference_forward(x, cond, raw, n_blocks=3, cond_bias=1.0):
    """Pure-JAX reference mirroring the kernel's precision choices
    (bf16 activations/weights at the MXU boundary, f32 accumulation)."""
    xb = x.astype(jnp.bfloat16).astype(jnp.float32)
    cb = cond.astype(jnp.bfloat16).astype(jnp.float32)

    def mm(a, w):
        return jnp.dot(a.astype(jnp.bfloat16), w.astype(jnp.bfloat16),
                       preferred_element_type=jnp.float32)

    c_relu = jnp.maximum(cb, 0.0)
    h = xb
    for i in range(n_blocks):
        lin = mm(h, raw[f"w{i+1}"]) + raw[f"b{i+1}"]
        g = mm(c_relu, raw[f"wc{i+1}"]) + raw[f"bc{i+1}"]
        h = jnp.maximum(lin * (cond_bias + g), 0.0)
    return mm(h, raw["wo"]) + raw["bo"]


if __name__ == "__main__":
    # Small shapes consistent with the module's defaults (hidden/out scaled down,
    # kept multiples of 128 so stores stay lane-dense).  B=384 is deliberately not a
    # multiple of the chosen 256-row tile to exercise the pad-free ragged last tile.
    B = 384
    dim_feature = 32
    dim_cond_embed = 32
    dim_hidden = 256
    dim_out = 256
    n_blocks = 3

    key = jax.random.PRNGKey(0)
    kx, kc, kp = jax.random.split(key, 3)
    x = jax.random.normal(kx, (B, dim_feature), jnp.float32)
    cond = jax.random.normal(kc, (B, dim_cond_embed), jnp.float32)

    raw = init_params(kp, dim_feature, dim_cond_embed, dim_hidden, dim_out, n_blocks)
    params = prepare_params(raw, n_blocks)

    out = conditional_net(x, cond, params)          # adaptive tile_b (=256, grid=2)
    out = jax.block_until_ready(out)

    ref = reference_forward(x, cond, raw, n_blocks)
    assert out.shape == (B, dim_out)
    max_err = jnp.max(jnp.abs(out - ref))
    assert jnp.allclose(out, ref, atol=5e-3, rtol=5e-3), (
        f"mismatch vs pure-JAX reference (max abs err {max_err})"
    )

    print("KERNEL_OK")
</pallas_src>

<mosaic_0001>
module attributes {stable_mosaic.version = 11 : i64} {
  func.func @conditional_net_kernel(%arg0: i32, %arg1: memref<256x64xbf16, #tpu.memory_space<vmem>>, %arg2: memref<64x1024xbf16, #tpu.memory_space<vmem>>, %arg3: memref<1x1024xf32, #tpu.memory_space<vmem>>, %arg4: memref<256x256xbf16, #tpu.memory_space<vmem>>, %arg5: memref<1x256xf32, #tpu.memory_space<vmem>>, %arg6: memref<256x256xbf16, #tpu.memory_space<vmem>>, %arg7: memref<1x256xf32, #tpu.memory_space<vmem>>, %arg8: memref<256x256xbf16, #tpu.memory_space<vmem>>, %arg9: memref<1x256xf32, #tpu.memory_space<vmem>>, %arg10: memref<256x256xf32, #tpu.memory_space<vmem>>) attributes {dimension_semantics = [#tpu.dimension_semantics<parallel>], iteration_bounds = array<i64: 2>, scalar_prefetch = 0 : i64, scratch_operands = 0 : i64, tpu.core_type = #tpu.core_type<tc>, window_params = [{transform_indices = @transform_0, window_bounds = array<i64: 256, 64>}, {pipeline_mode = #tpu.pipeline_mode<synchronous>, transform_indices = @transform_1, window_bounds = array<i64: 64, 1024>}, {pipeline_mode = #tpu.pipeline_mode<synchronous>, transform_indices = @transform_2, window_bounds = array<i64: 1, 1024>}, {pipeline_mode = #tpu.pipeline_mode<synchronous>, transform_indices = @transform_3, window_bounds = array<i64: 256, 256>}, {pipeline_mode = #tpu.pipeline_mode<synchronous>, transform_indices = @transform_4, window_bounds = array<i64: 1, 256>}, {pipeline_mode = #tpu.pipeline_mode<synchronous>, transform_indices = @transform_5, window_bounds = array<i64: 256, 256>}, {pipeline_mode = #tpu.pipeline_mode<synchronous>, transform_indices = @transform_6, window_bounds = array<i64: 1, 256>}, {pipeline_mode = #tpu.pipeline_mode<synchronous>, transform_indices = @transform_7, window_bounds = array<i64: 256, 256>}, {pipeline_mode = #tpu.pipeline_mode<synchronous>, transform_indices = @transform_8, window_bounds = array<i64: 1, 256>}, {transform_indices = @transform_9, window_bounds = array<i64: 256, 256>}]} {
    %c0 = arith.constant 0 : index
    %c0_0 = arith.constant 0 : index
    %0 = vector.load %arg1[%c0, %c0_0] : memref<256x64xbf16, #tpu.memory_space<vmem>>, vector<256x64xbf16>
    %1 = tpu.iota {dimensions = array<i32: 1>} : vector<256x64xi32>
    %c32_i32 = arith.constant 32 : i32
    %2 = vector.broadcast %c32_i32 : i32 to vector<256x64xi32>
    %3 = arith.cmpi sge, %1, %2 : vector<256x64xi32>
    %cst = arith.constant 0.000000e+00 : bf16
    %4 = vector.broadcast %cst : bf16 to vector<256x64xbf16>
    %5 = arith.maximumf %0, %4 : vector<256x64xbf16>
    %6 = arith.select %3, %5, %0 : vector<256x64xi1>, vector<256x64xbf16>
    %c0_1 = arith.constant 0 : index
    %c0_2 = arith.constant 0 : index
    %7 = vector.load %arg2[%c0_1, %c0_2] : memref<64x1024xbf16, #tpu.memory_space<vmem>>, vector<64x1024xbf16>
    %cst_3 = arith.constant dense<0.000000e+00> : vector<256x1024xf32>
    %8 = tpu.matmul %6, %7, %cst_3 {dimension_numbers = #tpu.dot_dimension_numbers<[1], [0], [0], [1], [0, 0, 1, 1], [], []>} : vector<256x64xbf16>, vector<64x1024xbf16>, vector<256x1024xf32> -> vector<256x1024xf32>
    %c0_4 = arith.constant 0 : index
    %c0_5 = arith.constant 0 : index
    %9 = vector.load %arg3[%c0_4, %c0_5] : memref<1x1024xf32, #tpu.memory_space<vmem>>, vector<1x1024xf32>
    %10 = vector.broadcast %9 : vector<1x1024xf32> to vector<256x1024xf32>
    %11 = arith.addf %8, %10 : vector<256x1024xf32>
    %12 = vector.extract_strided_slice %11 {offsets = [0, 0], sizes = [256, 256], strides = [1, 1]} : vector<256x1024xf32> to vector<256x256xf32>
    %13 = vector.extract_strided_slice %11 {offsets = [0, 256], sizes = [256, 256], strides = [1, 1]} : vector<256x1024xf32> to vector<256x256xf32>
    %14 = arith.mulf %12, %13 : vector<256x256xf32>
    %cst_6 = arith.constant 0.000000e+00 : f32
    %15 = vector.broadcast %cst_6 : f32 to vector<256x256xf32>
    %16 = arith.maximumf %14, %15 : vector<256x256xf32>
    %17 = arith.truncf %16 : vector<256x256xf32> to vector<256x256xbf16>
    %c0_7 = arith.constant 0 : index
    %c0_8 = arith.constant 0 : index
    %18 = vector.load %arg4[%c0_7, %c0_8] : memref<256x256xbf16, #tpu.memory_space<vmem>>, vector<256x256xbf16>
    %cst_9 = arith.constant dense<0.000000e+00> : vector<256x256xf32>
    %19 = tpu.matmul %17, %18, %cst_9 {dimension_numbers = #tpu.dot_dimension_numbers<[1], [0], [0], [1], [0, 0, 1, 1], [], []>} : vector<256x256xbf16>, vector<256x256xbf16>, vector<256x256xf32> -> vector<256x256xf32>
    %c0_10 = arith.constant 0 : index
    %c0_11 = arith.constant 0 : index
    %20 = vector.load %arg5[%c0_10, %c0_11] : memref<1x256xf32, #tpu.memory_space<vmem>>, vector<1x256xf32>
    %21 = vector.broadcast %20 : vector<1x256xf32> to vector<256x256xf32>
    %22 = arith.addf %19, %21 : vector<256x256xf32>
    %23 = vector.extract_strided_slice %11 {offsets = [0, 512], sizes = [256, 256], strides = [1, 1]} : vector<256x1024xf32> to vector<256x256xf32>
    %24 = arith.mulf %22, %23 : vector<256x256xf32>
    %cst_12 = arith.constant 0.000000e+00 : f32
    %25 = vector.broadcast %cst_12 : f32 to vector<256x256xf32>
    %26 = arith.maximumf %24, %25 : vector<256x256xf32>
    %27 = arith.truncf %26 : vector<256x256xf32> to vector<256x256xbf16>
    %c0_13 = arith.constant 0 : index
    %c0_14 = arith.constant 0 : index
    %28 = vector.load %arg6[%c0_13, %c0_14] : memref<256x256xbf16, #tpu.memory_space<vmem>>, vector<256x256xbf16>
    %cst_15 = arith.constant dense<0.000000e+00> : vector<256x256xf32>
    %29 = tpu.matmul %27, %28, %cst_15 {dimension_numbers = #tpu.dot_dimension_numbers<[1], [0], [0], [1], [0, 0, 1, 1], [], []>} : vector<256x256xbf16>, vector<256x256xbf16>, vector<256x256xf32> -> vector<256x256xf32>
    %c0_16 = arith.constant 0 : index
    %c0_17 = arith.constant 0 : index
    %30 = vector.load %arg7[%c0_16, %c0_17] : memref<1x256xf32, #tpu.memory_space<vmem>>, vector<1x256xf32>
    %31 = vector.broadcast %30 : vector<1x256xf32> to vector<256x256xf32>
    %32 = arith.addf %29, %31 : vector<256x256xf32>
    %33 = vector.extract_strided_slice %11 {offsets = [0, 768], sizes = [256, 256], strides = [1, 1]} : vector<256x1024xf32> to vector<256x256xf32>
    %34 = arith.mulf %32, %33 : vector<256x256xf32>
    %cst_18 = arith.constant 0.000000e+00 : f32
    %35 = vector.broadcast %cst_18 : f32 to vector<256x256xf32>
    %36 = arith.maximumf %34, %35 : vector<256x256xf32>
    %37 = arith.truncf %36 : vector<256x256xf32> to vector<256x256xbf16>
    %c0_19 = arith.constant 0 : index
    %c0_20 = arith.constant 0 : index
    %38 = vector.load %arg8[%c0_19, %c0_20] : memref<256x256xbf16, #tpu.memory_space<vmem>>, vector<256x256xbf16>
    %cst_21 = arith.constant dense<0.000000e+00> : vector<256x256xf32>
    %39 = tpu.matmul %37, %38, %cst_21 {dimension_numbers = #tpu.dot_dimension_numbers<[1], [0], [0], [1], [0, 0, 1, 1], [], []>} : vector<256x256xbf16>, vector<256x256xbf16>, vector<256x256xf32> -> vector<256x256xf32>
    %c0_22 = arith.constant 0 : index
    %c0_23 = arith.constant 0 : index
    %40 = vector.load %arg9[%c0_22, %c0_23] : memref<1x256xf32, #tpu.memory_space<vmem>>, vector<1x256xf32>
    %41 = vector.broadcast %40 : vector<1x256xf32> to vector<256x256xf32>
    %42 = arith.addf %39, %41 : vector<256x256xf32>
    %c0_24 = arith.constant 0 : index
    %c0_25 = arith.constant 0 : index
    %43 = vector.load %arg10[%c0_24, %c0_25] : memref<256x256xf32, #tpu.memory_space<vmem>>, vector<256x256xf32>
    tpu.vector_store %arg10[%c0_24, %c0_25], %42 {strides = array<i32>} : memref<256x256xf32, #tpu.memory_space<vmem>>, vector<256x256xf32>,
    return
  }
  func.func @transform_0(%arg0: i32) -> (i32, i32) {
    %c0_i32 = arith.constant 0 : i32
    %c0_i32_0 = arith.constant 0 : i32
    return %arg0, %c0_i32 : i32, i32
  }
  func.func @transform_1(%arg0: i32) -> (i32, i32) {
    %c0_i32 = arith.constant 0 : i32
    %c0_i32_0 = arith.constant 0 : i32
    %c0_i32_1 = arith.constant 0 : i32
    return %c0_i32, %c0_i32_0 : i32, i32
  }
  func.func @transform_2(%arg0: i32) -> (i32, i32) {
    %c0_i32 = arith.constant 0 : i32
    %c0_i32_0 = arith.constant 0 : i32
    %c0_i32_1 = arith.constant 0 : i32
    return %c0_i32, %c0_i32_0 : i32, i32
  }
  func.func @transform_3(%arg0: i32) -> (i32, i32) {
    %c0_i32 = arith.constant 0 : i32
    %c0_i32_0 = arith.constant 0 : i32
    %c0_i32_1 = arith.constant 0 : i32
    return %c0_i32, %c0_i32_0 : i32, i32
  }
  func.func @transform_4(%arg0: i32) -> (i32, i32) {
    %c0_i32 = arith.constant 0 : i32
    %c0_i32_0 = arith.constant 0 : i32
    %c0_i32_1 = arith.constant 0 : i32
    return %c0_i32, %c0_i32_0 : i32, i32
  }
  func.func @transform_5(%arg0: i32) -> (i32, i32) {
    %c0_i32 = arith.constant 0 : i32
    %c0_i32_0 = arith.constant 0 : i32
    %c0_i32_1 = arith.constant 0 : i32
    return %c0_i32, %c0_i32_0 : i32, i32
  }
  func.func @transform_6(%arg0: i32) -> (i32, i32) {
    %c0_i32 = arith.constant 0 : i32
    %c0_i32_0 = arith.constant 0 : i32
    %c0_i32_1 = arith.constant 0 : i32
    return %c0_i32, %c0_i32_0 : i32, i32
  }
  func.func @transform_7(%arg0: i32) -> (i32, i32) {
    %c0_i32 = arith.constant 0 : i32
    %c0_i32_0 = arith.constant 0 : i32
    %c0_i32_1 = arith.constant 0 : i32
    return %c0_i32, %c0_i32_0 : i32, i32
  }
  func.func @transform_8(%arg0: i32) -> (i32, i32) {
    %c0_i32 = arith.constant 0 : i32
    %c0_i32_0 = arith.constant 0 : i32
    %c0_i32_1 = arith.constant 0 : i32
    return %c0_i32, %c0_i32_0 : i32, i32
  }
  func.func @transform_9(%arg0: i32) -> (i32, i32) {
    %c0_i32 = arith.constant 0 : i32
    %c0_i32_0 = arith.constant 0 : i32
    return %arg0, %c0_i32 : i32, i32
  }
}

</mosaic_0001>

<bundles_post_ra>
// kernel: tpu_custom_call.1
= control target key start
LH: loop header
LB: loop body
LE: loop exit
PB: predicated region body
PF: predicated region fallthrough
CT: control target
= control target key end

     0   :  { %s7131_s0 = inlined_call_operand.vmem [shape: bf16[384,64], index: 0, kind: input, shape index: {}]   ;;  %s7132_s1 = inlined_call_operand.vmem [shape: bf16[64,1024], index: 1, kind: input, shape index: {}]   ;;  %s7133_s2 = inlined_call_operand.vmem [shape: f32[1,1024], index: 2, kind: input, shape index: {}]   ;;  %s7134_s3 = inlined_call_operand.hbm [shape: bf16[256,256], index: 3, kind: input, shape index: {}]   ;;  %s7135_s4 = inlined_call_operand.vmem [shape: f32[1,256], index: 4, kind: input, shape index: {}]   ;;  %s7136_s5 = inlined_call_operand.hbm [shape: bf16[256,256], index: 5, kind: input, shape index: {}]   ;;  %s7137_s6 = inlined_call_operand.vmem [shape: f32[1,256], index: 6, kind: input, shape index: {}]   ;;  %s7138_s7 = inlined_call_operand.hbm [shape: bf16[256,256], index: 7, kind: input, shape index: {}]   ;;  %s7139_s8 = inlined_call_operand.vmem [shape: f32[1,256], index: 8, kind: input, shape index: {}]   ;;  %s7140_s9 = inlined_call_operand.hbm [shape: f32[384,256], index: 9, kind: output, shape index: {}]  }
   0x1   :  { %7147 = sst [smem:[#allocation116_spill]] %s7134_s3 }
   0x2   :  { %7148 = sst [smem:[#allocation117_spill]] %s7136_s5 }
   0x3   :  { %14 = vsyncpa [#allocation3], 0 }
   0x4   :  { %15 = vsyncpa [#allocation6], 0 }
   0x5   :  { %16 = vsyncpa [#allocation4], 0 }
   0x6   :  { %18 = vsyncpa [#allocation4 + $0x1], 0  ;;  %s5050_s30 = smov 0   ;;  %s5052_s10 = smov 0  }
   0x7   :  { %s5054_s11 = smov 0   ;;  %s5056_s12 = smov 0  }
   0x8 LB: > { %s5071_s13 = sadd.s32 4294967295, %s4990_s12   ;;  %s3949_s14 = sadd.s32 4294967294, %s4990_s12   ;;  %s4990_s12 = sphi %s5056_s12, %s7369_s12   ;;  %s4986_s11 = sphi %s5054_s11, %s7368_s11   ;;  %s4982_s10 = sphi %s5052_s10, %s7367_s10   ;;  %s4978_s30 = sphi %s5050_s30, %s7366_s30  }
   0x9   : > { %s5075_s15 = sadd.s32 1, %s4990_s12   ;;  %s225_s16 = sadd.s32 1, %s4986_s11 }
   0xa   : > { %s222_s17 = ssub.s32 %s4990_s12, %s5075_s15  ;;  %p235_p0 = scmp.ne.s32.totalorder %s4986_s11, %s4982_s10 }
   0xb   : > { %p223_p1 = scmp.eq.s32.totalorder %s222_s17, 0  ;;  %p236_p2 = scmp.eq.s32.totalorder %s5071_s13, 1 }
   0xc   : > { %p241_p3 = scmp.ne.s32.totalorder %s4982_s10, %s4978_s30  ;;  %p242_p4 = scmp.eq.s32.totalorder %s3949_s14, 1 }
   0xd   : > { %s5086_s18 = scalar_select %p223_p1, %s4986_s11, %s225_s16  }
   0xe   : > { %p5088_p5 = por %p236_p2, %p235_p0  ;;  %p5092_p6 = por %p242_p4, %p241_p3 }
   0xf   : > { %7149 = sst [smem:[#allocation12_spill]] %s5086_s18  ;;  %p3950_p7 = scmp.ge.s32.totalorder %s4990_s12, 1 }
  0x10   : > { %p249_p8 = scmp.lt.s32.totalorder %s4990_s12, 3  ;;  %p4771_p9 = scmp.eq.s32.totalorder %s5071_s13, 0 }
  0x11   : > { %s7153_s5 = sld [smem:[#allocation117_spill]]  ;;  %s4992_s29 = smov [#allocation5]  }
  0x12   : > { %p5099_p10 = pnand %p3950_p7, %p249_p8  ;;  %s7154_s3 = sld [smem:[#allocation116_spill]] }
  0x13   : > { %s285_s14 = sshll.u32 %s4992_s29, 4  ;;  %s4993_s16 = smov 128   ;;  %s286_s14 = int_to_ptr.vmem [resolvable:$true] %s285_s14 }
  0x14   : > { %p4757_p11 = pneg %p5099_p10  ;;  %s4994_s17 = smov 8  }
  0x15   : > { %s4995_s22 = smov [#allocation2]  }
  0x16   : > { %p5113_p12 = pnand %p4771_p9, %p4757_p11  ;;  %s268_s23 = sshll.u32 %s4995_s22, 4  ;;  %s269_s23 = int_to_ptr.vmem [resolvable:$true] %s268_s23 }
  0x17   : > { %s283_s24 = sshll.u32 %s7153_s5, 4  ;;  %s4996_s5 = smov [#allocation7]   ;;  %s284_s24 = int_to_ptr.hbm [resolvable:$true] %s283_s24 }
  0x18   : > { %s266_s27 = sshll.u32 %s7154_s3, 4  ;;  %s300_s3 = sshll.u32 %s7138_s7, 4  ;;  %s267_s27 = int_to_ptr.hbm [resolvable:$true] %s266_s27  ;;  %s301_s3 = int_to_ptr.hbm [resolvable:$true] %s300_s3 }
  0x19   : > { %4763 = dma.hbm_to_vmem [thread:$0]  (!%p5113_p12), %s284_s24, 4096, %s286_s14, [#allocation6], %s4993_s16, %s4993_s16, %s4994_s17  }
  0x1a   : > { %4760 = dma.hbm_to_vmem [thread:$0]  (!%p5113_p12), %s267_s27, 4096, %s269_s23, [#allocation3], %s4993_s16, %s4993_s16, %s4994_s17  }
  0x1b   : > { %s302_s18 = sshll.u32 %s4996_s5, 4  ;;  %338 = sbr.rel (%p5099_p10) target bundleno = 1500 (0x5dc), region = 56  ;;  %s303_s18 = int_to_ptr.vmem [resolvable:$true] %s302_s18 }
  0x1c   : > { %4766 = dma.hbm_to_vmem [thread:$0]  (!%p5113_p12), %s301_s3, 4096, %s303_s18, [#allocation6], %s4993_s16, %s4993_s16, %s4994_s17  }
  0x20   : > { %4965 = dma.done.wait (%p4771_p9), [#allocation3], 4096  }
  0x21   : > { %4967 = vsyncadd (%p4771_p9), [#allocation3], 4294963200 }
  0x22   : > { %4969 = dma.done.wait (%p4771_p9), [#allocation6], 8192  }
  0x23   : > { %4971 = vsyncadd (%p4771_p9), [#allocation6], 4294959104  ;;  %s5137_s5 = sshll.u32 %s5071_s13, 5  ;;  %v442_v0 = vlaneseq  ;;  %v4060_v2 = vld [vmem:[%s7132_s1 + $0xc0] sm:$0xf]  ;;  %vm864_vm2 = vcmask 523264  }
  0x24   : > { %p394_p13 = scmp.lt.s32.totalorder %s5137_s5, 47  ;;  %v4641_v3 = vld [vmem:[%s7132_s1 + $0xdc] sm:$0xf0]  ;;  %v4637_v4 = vld [vmem:[%s7132_s1 + $0xc4] sm:$0xf]  ;;  %s386_s28 = sand.u32 1, %s4982_s10  }
  0x25   : > { %v5144_v1 = vand.u32 127, %v442_v0  ;;  %v4061_v5 = vor.u32 %v4641_v3, %v4060_v2  ;;  %v4062_v6 = vld [vmem:[%s7132_s1 + $0xe0] sm:$0xf0]  ;;  %v4068_v7 = vld [vmem:[%s7132_s1 + $0xc8] sm:$0xf]  ;;  %s3959_s29 = sshll.u32 %s386_s28, 9 }
  0x26   : > { %s5141_s3 = scalar_select %p394_p13, %s5137_s5, 47  ;;  %v4642_v8 = vld [vmem:[%s7132_s1 + $0xe4] sm:$0xf0]  ;;  %v4065_v9 = vor.u32 %v4637_v4, %v4062_v6  ;;  %v4638_v11 = vld [vmem:[%s7132_s1 + $0xcc] sm:$0xf] }
  0x27   : > { %v4069_v10 = vor.u32 %v4642_v8, %v4068_v7  ;;  %v4070_v12 = vld [vmem:[%s7132_s1 + $0xe8] sm:$0xf0]  ;;  %v4028_v13 = vld [vmem:[%s7132_s1 + $0x80] sm:$0xf]  ;;  %917 = vmatpush.bf16.msra.mxu0 %v4061_v5  ;;  %v4629_v16 = vld [vmem:[%s7132_s1 + $0x84] sm:$0xf] }
  0x28   : > { %s3961_s18 = sshll.u32 %s5141_s3, 2  ;;  %v4073_v14 = vor.u32 %v4638_v11, %v4070_v12  ;;  %v4633_v15 = vld [vmem:[%s7132_s1 + $0x9c] sm:$0xf0]  ;;  %v4030_v17 = vld [vmem:[%s7132_s1 + $0xa0] sm:$0xf0]  ;;  %vm444_vm0 = vcmp.ge.s32.totalorder %v5144_v1, 32  ;;  %1006 = vmatpush.bf16.msra.mxu1 %v4065_v9 }
  0x29   : > { %1095 = vmatpush.bf16.msra.mxu2 %v4069_v10  ;;  %v4029_v18 = vor.u32 %v4633_v15, %v4028_v13  ;;  %v4033_v19 = vor.u32 %v4629_v16, %v4030_v17  ;;  %v4036_v20 = vld [vmem:[%s7132_s1 + $0x88] sm:$0xf]  ;;  %v4630_v22 = vld [vmem:[%s7132_s1 + $0x8c] sm:$0xf]  ;;  %v3996_v25 = vld [vmem:[%s7132_s1 + $0x40] sm:$0xf]  ;;  %s5224_s27 = scalar_lea.vmem %s7131_s0, %s3961_s18 }
  0x2a   : > { %v4634_v21 = vld [vmem:[%s7132_s1 + $0xa4] sm:$0xf0]  ;;  %1184 = vmatpush.bf16.msra.mxu3 %v4073_v14  ;;  %v4038_v24 = vld [vmem:[%s7132_s1 + $0xa8] sm:$0xf0]  ;;  %v4625_v26 = vld [vmem:[%s7132_s1 + $0x5c] sm:$0xf0] }
  0x2b   : > { %v4037_v23 = vor.u32 %v4634_v21, %v4036_v20  ;;  %v4041_v27 = vor.u32 %v4630_v22, %v4038_v24  ;;  %v4621_v28 = vld [vmem:[%s7132_s1 + $0x44] sm:$0xf]  ;;  %v4004_v30 = vld [vmem:[%s7132_s1 + $0x48] sm:$0xf]  ;;  %918 = vmatpush.bf16.msra.mxu0 %v4029_v18  ;;  %v3997_v31 = vor.u32 %v4625_v26, %v3996_v25  ;;  %v4622_v33 = vld [vmem:[%s7132_s1 + $0x4c] sm:$0xf] }
  0x2c   : > { %v3998_v29 = vld [vmem:[%s7132_s1 + $0x60] sm:$0xf0]  ;;  %v4626_v32 = vld [vmem:[%s7132_s1 + $0x64] sm:$0xf0]  ;;  %v4006_v34 = vld [vmem:[%s7132_s1 + $0x68] sm:$0xf0]  ;;  %1007 = vmatpush.bf16.msra.mxu1 %v4033_v19 }
  0x2d   : > { %1096 = vmatpush.bf16.msra.mxu2 %v4037_v23  ;;  %v4001_v35 = vor.u32 %v4621_v28, %v3998_v29  ;;  %v4005_v36 = vor.u32 %v4626_v32, %v4004_v30  ;;  %v3964_v37 = vld [vmem:[%s7132_s1] sm:$0xf]  ;;  %v4613_v39 = vld [vmem:[%s7132_s1 + $0x4] sm:$0xf]  ;;  %v4009_v40 = vor.u32 %v4622_v33, %v4006_v34  ;;  %v3972_v42 = vld [vmem:[%s7132_s1 + $0x8] sm:$0xf] }
  0x2e   : > { %v4617_v38 = vld [vmem:[%s7132_s1 + $0x1c] sm:$0xf0]  ;;  %1185 = vmatpush.bf16.msra.mxu3 %v4041_v27  ;;  %v3966_v41 = vld [vmem:[%s7132_s1 + $0x20] sm:$0xf0]  ;;  %v4618_v43 = vld [vmem:[%s7132_s1 + $0x24] sm:$0xf0] }
  0x2f   : > { %v4614_v44 = vld [vmem:[%s7132_s1 + $0xc] sm:$0xf]  ;;  %v410_v46 = vld [vmem:[%s5224_s27] sm:$0xf]  ;;  %919 = vmatpush.bf16.msra.mxu0 %v3997_v31  ;;  %v3965_v47 = vor.u32 %v4617_v38, %v3964_v37  ;;  %v411_v48 = vld [vmem:[%s5224_s27 + $0x4] sm:$0xf]  ;;  %v3969_v52 = vor.u32 %v4613_v39, %v3966_v41  ;;  %v3973_v53 = vor.u32 %v4618_v43, %v3972_v42 }
  0x30   : > { %v3974_v45 = vld [vmem:[%s7132_s1 + $0x28] sm:$0xf0]  ;;  %v445_v49 = vunpack.c.l.bf16 %v410_v46  ;;  %v4084_v50 = vld [vmem:[%s7132_s1 + $0xd8] sm:$0xf]  ;;  %1008 = vmatpush.bf16.msra.mxu1 %v4001_v35  ;;  %v446_v54 = vunpack.c.l.bf16 %v411_v48  ;;  %v4640_v55 = vld [vmem:[%s7132_s1 + $0xdc] sm:$0xf] }
  0x31   : > { %v4644_v51 = vld [vmem:[%s7132_s1 + $0xf4] sm:$0xf0]  ;;  %1097 = vmatpush.bf16.msra.mxu2 %v4005_v36  ;;  %v4086_v56 = vld [vmem:[%s7132_s1 + $0xf8] sm:$0xf0]  ;;  %v4076_v57 = vld [vmem:[%s7132_s1 + $0xd0] sm:$0xf]  ;;  %v3977_v58 = vor.u32 %v4614_v44, %v3974_v45 }
  0x32   : > { %1186 = vmatpush.bf16.msra.mxu3 %v4009_v40  ;;  %v477_v59 = vmax.f32 %v445_v49, 0.0  ;;  %v4085_v60 = vor.u32 %v4644_v51, %v4084_v50  ;;  %v4643_v61 = vld [vmem:[%s7132_s1 + $0xec] sm:$0xf0]  ;;  %v4639_v62 = vld [vmem:[%s7132_s1 + $0xd4] sm:$0xf]  ;;  %v478_v63 = vmax.f32 %v446_v54, 0.0  ;;  %vm5276_vm1 = vmpackc.low %vm444_vm0, %vm444_vm0  ;;  %v4089_v2 = vor.u32 %v4640_v55, %v4086_v56 }
  0x33   : > { %v4077_v3 = vor.u32 %v4643_v61, %v4076_v57  ;;  %v4078_v4 = vld [vmem:[%s7132_s1 + $0xf0] sm:$0xf0]  ;;  %v412_v5 = vld [vmem:[%s5224_s27 + $0x8] sm:$0xf]  ;;  %920 = vmatpush.bf16.msra.mxu0 %v3965_v47  ;;  %v413_v8 = vld [vmem:[%s5224_s27 + $0xc] sm:$0xf] }
  0x34   : > { %v509_v6 = vpack.c.bf16 %v477_v59, %v477_v59  ;;  %v4081_v7 = vor.u32 %v4639_v62, %v4078_v4  ;;  %1009 = vmatpush.bf16.msra.mxu1 %v3969_v52  ;;  %v510_v9 = vpack.c.bf16 %v478_v63, %v478_v63  ;;  %v447_v1 = vunpack.c.l.bf16 %v412_v5  ;;  %v414_v22 = vld [vmem:[%s5224_s27 + $0x10] sm:$0xf]  ;;  %v415_v23 = vld [vmem:[%s5224_s27 + $0x14] sm:$0xf]  ;;  %v416_v35 = vld [vmem:[%s5224_s27 + $0x18] sm:$0xf] }
  0x35   : > { %1098 = vmatpush.bf16.msra.mxu2 %v3973_v53  ;;  %v448_v10 = vunpack.c.l.bf16 %v413_v8  ;;  %v449_v26 = vunpack.c.l.bf16 %v414_v22  ;;  %v450_v27 = vunpack.c.l.bf16 %v415_v23  ;;  %v417_v36 = vld [vmem:[%s5224_s27 + $0x1c] sm:$0xf]  ;;  %v451_v39 = vunpack.c.l.bf16 %v416_v35  ;;  %v4636_v47 = vld [vmem:[%s7132_s1 + $0xb4] sm:$0xf0]  ;;  %v4044_v51 = vld [vmem:[%s7132_s1 + $0x90] sm:$0xf] }
  0x36   : > { %1187 = vmatpush.bf16.msra.mxu3 %v3977_v58  ;;  %v542_v11 = vsel %vm5276_vm1, %v509_v6, %v410_v46  ;;  %v543_v12 = vsel %vm5276_vm1, %v510_v9, %v411_v48  ;;  %v479_v15 = vmax.f32 %v447_v1, 0.0  ;;  %v452_v40 = vunpack.c.l.bf16 %v417_v36  ;;  %v4052_v46 = vld [vmem:[%s7132_s1 + $0x98] sm:$0xf]  ;;  %v4632_v48 = vld [vmem:[%s7132_s1 + $0x9c] sm:$0xf]  ;;  %s6909_s14 = scalar_lea.vmem [#allocation8], %s3959_s29 }
  0x37   : > { %v656_v13 = vunpack.c.l.b16 %v542_v11  ;;  %1273 = vmatpush.bf16.msrb.mxu0 %v4077_v3  ;;  %v657_v14 = vunpack.c.l.b16 %v543_v12  ;;  %v480_v16 = vmax.f32 %v448_v10, 0.0  ;;  %v481_v29 = vmax.f32 %v449_v26, 0.0  ;;  %v4054_v50 = vld [vmem:[%s7132_s1 + $0xb8] sm:$0xf0]  ;;  %v4635_v52 = vld [vmem:[%s7132_s1 + $0xac] sm:$0xf0] }
  0x38   : > { %1362 = vmatpush.bf16.msrb.mxu1 %v4081_v7  ;;  %v511_v18 = vpack.c.bf16 %v479_v15, %v479_v15  ;;  %v482_v30 = vmax.f32 %v450_v27, 0.0  ;;  %v483_v42 = vmax.f32 %v451_v39, 0.0  ;;  %v484_v43 = vmax.f32 %v452_v40, 0.0  ;;  %v4631_v55 = vld [vmem:[%s7132_s1 + $0x94] sm:$0xf]  ;;  %s7070_s16 = scalar_lea.sflag [#allocation4], %s386_s28 }
  0x39   : > { %1451 = vmatpush.bf16.msrb.mxu2 %v4085_v60  ;;  %v5289_v17 = vpack.c.b16 %v657_v14, %v656_v13  ;;  %v512_v19 = vpack.c.bf16 %v480_v16, %v480_v16  ;;  %v513_v31 = vpack.c.bf16 %v481_v29, %v481_v29  ;;  %v4053_v49 = vor.u32 %v4636_v47, %v4052_v46  ;;  %v4046_v56 = vld [vmem:[%s7132_s1 + $0xb0] sm:$0xf0]  ;;  %v418_v60 = vld [vmem:[%s5224_s27 + $0x20] sm:$0xf]  ;;  %v419_v61 = vld [vmem:[%s5224_s27 + $0x24] sm:$0xf] }
  0x3a   : > { %1540 = vmatpush.bf16.msrb.mxu3 %v4089_v2  ;;  %v544_v20 = vsel %vm5276_vm1, %v511_v18, %v412_v5  ;;  %v514_v32 = vpack.c.bf16 %v482_v30, %v482_v30  ;;  %v515_v44 = vpack.c.bf16 %v483_v42, %v483_v42  ;;  %v516_v45 = vpack.c.bf16 %v484_v43, %v484_v43  ;;  %v420_v10 = vld [vmem:[%s5224_s27 + $0x28] sm:$0xf]  ;;  %v421_v11 = vld [vmem:[%s5224_s27 + $0x2c] sm:$0xf]  ;;  %v425_v39 = vld [vmem:[%s5224_s27 + $0x3c] sm:$0xf] }
  0x3b   : > { %4090 = vmatmul.msk.bf16.vlgmr.msra.gmra.mxu0 %vm864_vm2, %v5289_v17  ;;  %4106 = vmatmul.msk.bf16.vlgmr.msra.gmra.mxu1 %vm864_vm2, %v5289_v17  ;;  %v545_v21 = vsel %vm5276_vm1, %v512_v19, %v413_v8  ;;  %v658_v24 = vunpack.c.l.b16 %v544_v20  ;;  %v546_v33 = vsel %vm5276_vm1, %v513_v31, %v414_v22  ;;  %v4057_v53 = vor.u32 %v4632_v48, %v4054_v50  ;;  %v4020_v50 = vld [vmem:[%s7132_s1 + $0x58] sm:$0xf] }
  0x3c   : > { %4122 = vmatmul.msk.bf16.vlgmr.msra.gmra.mxu2 %vm864_vm2, %v5289_v17  ;;  %4138 = vmatmul.msk.bf16.vlgmr.msra.gmra.mxu3 %vm864_vm2, %v5289_v17  ;;  %v659_v25 = vunpack.c.l.b16 %v545_v21  ;;  %v547_v34 = vsel %vm5276_vm1, %v514_v32, %v415_v23  ;;  %v660_v37 = vunpack.c.l.b16 %v546_v33  ;;  %v4045_v54 = vor.u32 %v4635_v52, %v4044_v51  ;;  %v4628_v51 = vld [vmem:[%s7132_s1 + $0x74] sm:$0xf0]  ;;  %v4624_v52 = vld [vmem:[%s7132_s1 + $0x5c] sm:$0xf] }
  0x3d   : > { %v661_v38 = vunpack.c.l.b16 %v547_v34  ;;  %1452 = vmatpush.bf16.msrb.mxu2 %v4053_v49  ;;  %v4049_v57 = vor.u32 %v4631_v55, %v4046_v56  ;;  %v548_v58 = vsel %vm5276_vm1, %v515_v44, %v416_v35  ;;  %v549_v59 = vsel %vm5276_vm1, %v516_v45, %v417_v36 }
  0x3e   : > { %v5305_v28 = vpack.c.b16 %v659_v25, %v658_v24  ;;  %1541 = vmatpush.bf16.msrb.mxu3 %v4057_v53  ;;  %1274 = vmatpush.bf16.msrb.mxu0 %v4045_v54  ;;  %v662_v62 = vunpack.c.l.b16 %v548_v58  ;;  %v663_v63 = vunpack.c.l.b16 %v549_v59  ;;  %v453_v2 = vunpack.c.l.bf16 %v418_v60  ;;  %v422_v24 = vld [vmem:[%s5224_s27 + $0x30] sm:$0xf]  ;;  %v423_v25 = vld [vmem:[%s5224_s27 + $0x34] sm:$0xf]  ;;  %v4022_v54 = vld [vmem:[%s7132_s1 + $0x78] sm:$0xf0] }
  0x3f   : > { %v5321_v41 = vpack.c.b16 %v661_v38, %v660_v37  ;;  %1363 = vmatpush.bf16.msrb.mxu1 %v4049_v57  ;;  %v454_v3 = vunpack.c.l.bf16 %v419_v61  ;;  %v455_v14 = vunpack.c.l.bf16 %v420_v10  ;;  %v456_v15 = vunpack.c.l.bf16 %v421_v11  ;;  %v424_v38 = vld [vmem:[%s5224_s27 + $0x38] sm:$0xf]  ;;  %v426_v58 = vld [vmem:[%s5224_s27 + $0x40] sm:$0xf]  ;;  %v427_v59 = vld [vmem:[%s5224_s27 + $0x44] sm:$0xf] }
  0x40   : > { %v5361_v4 = vpack.c.b16 %v663_v63, %v662_v62  ;;  %v485_v5 = vmax.f32 %v453_v2, 0.0  ;;  %v457_v29 = vunpack.c.l.bf16 %v422_v24  ;;  %v458_v30 = vunpack.c.l.bf16 %v423_v25  ;;  %v4012_v2 = vld [vmem:[%s7132_s1 + $0x50] sm:$0xf] }
  0x41   : > { %v486_v6 = vmax.f32 %v454_v3, 0.0  ;;  %v487_v18 = vmax.f32 %v455_v14, 0.0  ;;  %v488_v19 = vmax.f32 %v456_v15, 0.0  ;;  %v459_v43 = vunpack.c.l.bf16 %v424_v38  ;;  %v4627_v3 = vld [vmem:[%s7132_s1 + $0x6c] sm:$0xf0] }
  0x42   : > { %v517_v7 = vpack.c.bf16 %v485_v5, %v485_v5  ;;  %v489_v32 = vmax.f32 %v457_v29, 0.0  ;;  %v490_v33 = vmax.f32 %v458_v30, 0.0  ;;  %v460_v44 = vunpack.c.l.bf16 %v425_v39  ;;  %v4623_v5 = vld [vmem:[%s7132_s1 + $0x54] sm:$0xf]  ;;  %v428_v15 = vld [vmem:[%s5224_s27 + $0x48] sm:$0xf] }
  0x43   : > { %v518_v8 = vpack.c.bf16 %v486_v6, %v486_v6  ;;  %v519_v20 = vpack.c.bf16 %v487_v18, %v487_v18  ;;  %v520_v21 = vpack.c.bf16 %v488_v19, %v488_v19  ;;  %v491_v46 = vmax.f32 %v459_v43, 0.0  ;;  %v429_v18 = vld [vmem:[%s5224_s27 + $0x4c] sm:$0xf] }
  0x44   : > { %v550_v9 = vsel %vm5276_vm1, %v517_v7, %v418_v60  ;;  %v521_v34 = vpack.c.bf16 %v489_v32, %v489_v32  ;;  %v522_v35 = vpack.c.bf16 %v490_v33, %v490_v33  ;;  %v492_v47 = vmax.f32 %v460_v44, 0.0  ;;  %v4014_v7 = vld [vmem:[%s7132_s1 + $0x70] sm:$0xf0] }
  0x45   : > { %v551_v1 = vsel %vm5276_vm1, %v518_v8, %v419_v61  ;;  %v664_v12 = vunpack.c.l.b16 %v550_v9  ;;  %v552_v22 = vsel %vm5276_vm1, %v519_v20, %v420_v10  ;;  %v553_v23 = vsel %vm5276_vm1, %v520_v21, %v421_v11 }
  0x46   : > { %v665_v13 = vunpack.c.l.b16 %v551_v1  ;;  %v666_v26 = vunpack.c.l.b16 %v552_v22  ;;  %v667_v27 = vunpack.c.l.b16 %v553_v23  ;;  %v554_v36 = vsel %vm5276_vm1, %v521_v34, %v422_v24  ;;  %v606_v23 = vld [vmem:[%s7133_s2] sm:$0xff] }
  0x47   : > { %v555_v37 = vsel %vm5276_vm1, %v522_v35, %v423_v25  ;;  %v668_v40 = vunpack.c.l.b16 %v554_v36  ;;  %v523_v48 = vpack.c.bf16 %v491_v46, %v491_v46  ;;  %v524_v49 = vpack.c.bf16 %v492_v47, %v492_v47 }
  0x48   : > { %v5377_v16 = vpack.c.b16 %v665_v13, %v664_v12  ;;  %v5393_v31 = vpack.c.b16 %v667_v27, %v666_v26  ;;  %v669_v42 = vunpack.c.l.b16 %v555_v37  ;;  %v4021_v53 = vor.u32 %v4628_v51, %v4020_v50  ;;  %v431_v50 = vld [vmem:[%s5224_s27 + $0x54] sm:$0xf] }
  0x49   : > { %v4025_v55 = vor.u32 %v4624_v52, %v4022_v54  ;;  %v556_v56 = vsel %vm5276_vm1, %v523_v48, %v424_v38  ;;  %v557_v57 = vsel %vm5276_vm1, %v524_v49, %v425_v39  ;;  %v461_v62 = vunpack.c.l.bf16 %v426_v58  ;;  %v430_v49 = vld [vmem:[%s5224_s27 + $0x50] sm:$0xf] }
  0x4a   : > { %v5409_v45 = vpack.c.b16 %v669_v42, %v668_v40  ;;  %1453 = vmatpush.bf16.msrb.mxu2 %v4021_v53  ;;  %v670_v60 = vunpack.c.l.b16 %v556_v56  ;;  %v671_v61 = vunpack.c.l.b16 %v557_v57  ;;  %v462_v63 = vunpack.c.l.bf16 %v427_v59 }
  0x4b   : > { %4091 = vmatmul.msk.bf16.gmra.mxu0 %vm864_vm2, %v5305_v28  ;;  %4107 = vmatmul.msk.bf16.gmra.mxu1 %vm864_vm2, %v5305_v28  ;;  %v4013_v6 = vor.u32 %v4627_v3, %v4012_v2  ;;  %v4017_v8 = vor.u32 %v4623_v5, %v4014_v7  ;;  %v493_v1 = vmax.f32 %v461_v62, 0.0  ;;  %v463_v21 = vunpack.c.l.bf16 %v428_v15 }
  0x4c   : > { %4123 = vmatmul.msk.bf16.gmra.mxu2 %vm864_vm2, %v5305_v28  ;;  %4139 = vmatmul.msk.bf16.gmra.mxu3 %vm864_vm2, %v5305_v28  ;;  %v5449_v9 = vpack.c.b16 %v671_v61, %v670_v60  ;;  %v494_v10 = vmax.f32 %v462_v63, 0.0  ;;  %v464_v22 = vunpack.c.l.bf16 %v429_v18  ;;  %v5470_v30 = vperm.slane %v606_v23, 0 }
  0x4d   : > { %1542 = vmatpush.bf16.msrb.mxu3 %v4025_v55  ;;  %1275 = vmatpush.bf16.msrb.mxu0 %v4013_v6  ;;  %v525_v11 = vpack.c.bf16 %v493_v1, %v493_v1  ;;  %v495_v27 = vmax.f32 %v463_v21, 0.0  ;;  %v5472_v32 = vperm.slane %v606_v23, 1  ;;  %v5482_v33 = vperm.slane %v606_v23, 2 }
  0x4e   : > { %1364 = vmatpush.bf16.msrb.mxu1 %v4017_v8  ;;  %v526_v12 = vpack.c.bf16 %v494_v10, %v494_v10  ;;  %v496_v29 = vmax.f32 %v464_v22, 0.0  ;;  %v5484_v34 = vperm.slane %v606_v23, 3  ;;  %v465_v55 = vunpack.c.l.bf16 %v430_v49 }
  0x4f   : > { %v558_v13 = vsel %vm5276_vm1, %v525_v11, %v426_v58  ;;  %v527_v35 = vpack.c.bf16 %v495_v27, %v495_v27  ;;  %v466_v56 = vunpack.c.l.bf16 %v431_v50 }
  0x50   : > { %v559_v14 = vsel %vm5276_vm1, %v526_v12, %v427_v59  ;;  %v672_v19 = vunpack.c.l.b16 %v558_v13  ;;  %v528_v36 = vpack.c.bf16 %v496_v29, %v496_v29  ;;  %v497_v60 = vmax.f32 %v465_v55, 0.0 }
  0x51   : > { %v673_v20 = vunpack.c.l.b16 %v559_v14  ;;  %v560_v47 = vsel %vm5276_vm1, %v527_v35, %v428_v15  ;;  %v498_v61 = vmax.f32 %v466_v56, 0.0 }
  0x52   : > { %v561_v48 = vsel %vm5276_vm1, %v528_v36, %v429_v18  ;;  %v674_v53 = vunpack.c.l.b16 %v560_v47  ;;  %v529_v1 = vpack.c.bf16 %v497_v60, %v497_v60  ;;  %v432_v36 = vld [vmem:[%s5224_s27 + $0x58] sm:$0xf] }
  0x53   : > { %v5468_v24 = vpack.c.b16 %v673_v20, %v672_v19  ;;  %v675_v54 = vunpack.c.l.b16 %v561_v48  ;;  %v530_v10 = vpack.c.bf16 %v498_v61, %v498_v61 }
  0x54   : > { %v562_v29 = vsel %vm5276_vm1, %v529_v1, %v430_v49  ;;  %v4616_v1 = vld [vmem:[%s7132_s1 + $0x1c] sm:$0xf] }
  0x55   : > { %v5496_v59 = vpack.c.b16 %v675_v54, %v674_v53  ;;  %v563_v35 = vsel %vm5276_vm1, %v530_v10, %v431_v50  ;;  %v3990_v10 = vld [vmem:[%s7132_s1 + $0x38] sm:$0xf0] }
  0x5b   : > { %4092 = vmatmul.msk.bf16.gmra.mxu0 %vm864_vm2, %v5321_v41  ;;  %4108 = vmatmul.msk.bf16.gmra.mxu1 %vm864_vm2, %v5321_v41 }
  0x5c   : > { %4124 = vmatmul.msk.bf16.gmra.mxu2 %vm864_vm2, %v5321_v41  ;;  %4140 = vmatmul.msk.bf16.gmra.mxu3 %vm864_vm2, %v5321_v41 }
  0x6b   : > { %4093 = vmatmul.msk.bf16.gmra.mxu0 %vm864_vm2, %v5361_v4  ;;  %4109 = vmatmul.msk.bf16.gmra.mxu1 %vm864_vm2, %v5361_v4 }
  0x6c   : > { %4125 = vmatmul.msk.bf16.gmra.mxu2 %vm864_vm2, %v5361_v4  ;;  %4141 = vmatmul.msk.bf16.gmra.mxu3 %vm864_vm2, %v5361_v4 }
  0x7b   : > { %4094 = vmatmul.msk.bf16.gmra.mxu0 %vm864_vm2, %v5377_v16  ;;  %4110 = vmatmul.msk.bf16.gmra.mxu1 %vm864_vm2, %v5377_v16 }
  0x7c   : > { %4126 = vmatmul.msk.bf16.gmra.mxu2 %vm864_vm2, %v5377_v16  ;;  %4142 = vmatmul.msk.bf16.gmra.mxu3 %vm864_vm2, %v5377_v16 }
  0x8b   : > { %4095 = vmatmul.msk.bf16.gmra.mxu0 %vm864_vm2, %v5393_v31  ;;  %4111 = vmatmul.msk.bf16.gmra.mxu1 %vm864_vm2, %v5393_v31 }
  0x8c   : > { %4127 = vmatmul.msk.bf16.gmra.mxu2 %vm864_vm2, %v5393_v31  ;;  %4143 = vmatmul.msk.bf16.gmra.mxu3 %vm864_vm2, %v5393_v31 }
  0x9b   : > { %4096 = vmatmul.msk.bf16.gmra.mxu0 %vm864_vm2, %v5409_v45  ;;  %4112 = vmatmul.msk.bf16.gmra.mxu1 %vm864_vm2, %v5409_v45 }
  0x9c   : > { %4128 = vmatmul.msk.bf16.gmra.mxu2 %vm864_vm2, %v5409_v45  ;;  %4144 = vmatmul.msk.bf16.gmra.mxu3 %vm864_vm2, %v5409_v45 }
  0xab   : > { %4097 = vmatmul.msk.bf16.gmra.mxu0 %vm864_vm2, %v5449_v9  ;;  %4113 = vmatmul.msk.bf16.gmra.mxu1 %vm864_vm2, %v5449_v9 }
  0xac   : > { %4129 = vmatmul.msk.bf16.gmra.mxu2 %vm864_vm2, %v5449_v9  ;;  %4145 = vmatmul.msk.bf16.gmra.mxu3 %vm864_vm2, %v5449_v9 }
  0xb8   : > { %v922_v25 = vpop.f32.mrf.mxu0  ;;  %v1011_v26 = vpop.f32.mrf.mxu1 }
  0xb9   : > { %v923_v37 = vadd.f32 %v922_v25, %v5470_v30  ;;  %v1012_v38 = vadd.f32 %v1011_v26, %v5472_v32 }
  0xbb   : > { %4098 = vmatmul.msk.bf16.gmra.mxu0 %vm864_vm2, %v5468_v24  ;;  %4114 = vmatmul.msk.bf16.gmra.mxu1 %vm864_vm2, %v5468_v24 }
  0xbc   : > { %4130 = vmatmul.msk.bf16.gmra.mxu2 %vm864_vm2, %v5468_v24  ;;  %4146 = vmatmul.msk.bf16.gmra.mxu3 %vm864_vm2, %v5468_v24 }
  0xbf   : > { %v1100_v39 = vpop.f32.mrf.mxu2  ;;  %v1189_v40 = vpop.f32.mrf.mxu3 }
  0xc0   : > { %v1101_v42 = vadd.f32 %v1100_v39, %v5482_v33  ;;  %v1190_v43 = vadd.f32 %v1189_v40, %v5484_v34  ;;  %v924_v44 = vpop.f32.mrf.mxu0  ;;  %v1013_v46 = vpop.f32.mrf.mxu1  ;;  %v676_v40 = vunpack.c.l.b16 %v562_v29  ;;  %v434_v29 = vld [vmem:[%s5224_s27 + $0x60] sm:$0xf] }
  0xc1   : > { %v925_v62 = vadd.f32 %v924_v44, %v5470_v30  ;;  %v1014_v63 = vadd.f32 %v1013_v46, %v5472_v32 }
  0xc2   : > { %v1625_v51 = vmul.f32 %v1101_v42, %v923_v37  ;;  %v1626_v52 = vmul.f32 %v1190_v43, %v1012_v38  ;;  %v433_v37 = vld [vmem:[%s5224_s27 + $0x5c] sm:$0xf]  ;;  %v677_v42 = vunpack.c.l.b16 %v563_v35  ;;  %v467_v43 = vunpack.c.l.bf16 %v432_v36  ;;  %v435_v35 = vld [vmem:[%s5224_s27 + $0x64] sm:$0xf] }
  0xc3   : > { %v468_v44 = vunpack.c.l.bf16 %v433_v37 }
  0xc4   : > { %v1689_v11 = vmax.f32 %v1625_v51, 0.0  ;;  %v1690_v12 = vmax.f32 %v1626_v52, 0.0  ;;  %v5524_v48 = vpack.c.b16 %v677_v42, %v676_v40  ;;  %v499_v51 = vmax.f32 %v467_v43, 0.0 }
  0xc5   : > { %v500_v52 = vmax.f32 %v468_v44, 0.0  ;;  %v469_v43 = vunpack.c.l.bf16 %v434_v29  ;;  %v470_v44 = vunpack.c.l.bf16 %v435_v35 }
  0xc7   : > { %v1102_v57 = vpop.f32.mrf.mxu2  ;;  %v1191_v58 = vpop.f32.mrf.mxu3 }
  0xc8   : > { %v1103_v2 = vadd.f32 %v1102_v57, %v5482_v33  ;;  %v1192_v3 = vadd.f32 %v1191_v58, %v5484_v34  ;;  %v927_v5 = vpop.f32.mrf.mxu0  ;;  %v1016_v6 = vpop.f32.mrf.mxu1 }
  0xc9   : > { %v928_v19 = vadd.f32 %v927_v5, %v5470_v30  ;;  %v1017_v20 = vadd.f32 %v1016_v6, %v5472_v32  ;;  %v3988_v5 = vld [vmem:[%s7132_s1 + $0x18] sm:$0xf] }
  0xca   : > { %v1627_v7 = vmul.f32 %v1103_v2, %v925_v62  ;;  %v1628_v8 = vmul.f32 %v1192_v3, %v1014_v63  ;;  %v531_v2 = vpack.c.bf16 %v499_v51, %v499_v51  ;;  %v532_v3 = vpack.c.bf16 %v500_v52, %v500_v52  ;;  %v4620_v6 = vld [vmem:[%s7132_s1 + $0x34] sm:$0xf0]  ;;  %v3982_v51 = vld [vmem:[%s7132_s1 + $0x30] sm:$0xf0] }
  0xcb   : > { %4099 = vmatmul.msk.bf16.gmra.mxu0 %vm864_vm2, %v5496_v59  ;;  %4115 = vmatmul.msk.bf16.gmra.mxu1 %vm864_vm2, %v5496_v59 }
  0xcc   : > { %v1691_v13 = vmax.f32 %v1627_v7, 0.0  ;;  %v1692_v14 = vmax.f32 %v1628_v8, 0.0  ;;  %4131 = vmatmul.msk.bf16.gmra.mxu2 %vm864_vm2, %v5496_v59  ;;  %4147 = vmatmul.msk.bf16.gmra.mxu3 %vm864_vm2, %v5496_v59  ;;  %v3989_v8 = vor.u32 %v4620_v6, %v3988_v5 }
  0xce   : > { %v5510_v15 = vpack.c.bf16 %v1691_v13, %v1689_v11  ;;  %v5512_v18 = vpack.c.bf16 %v1692_v14, %v1690_v12  ;;  %v3993_v12 = vor.u32 %v4616_v1, %v3990_v10  ;;  %1454 = vmatpush.bf16.msrb.mxu2 %v3989_v8 }
  0xcf   : > { %v1105_v21 = vpop.f32.mrf.mxu2  ;;  %v1194_v22 = vpop.f32.mrf.mxu3 }
  0xd0   : > { %v1106_v23 = vadd.f32 %v1105_v21, %v5482_v33  ;;  %v1195_v25 = vadd.f32 %v1194_v22, %v5484_v34  ;;  %v929_v26 = vpop.f32.mrf.mxu0  ;;  %v1018_v27 = vpop.f32.mrf.mxu1  ;;  %1543 = vmatpush.bf16.msrb.mxu3 %v3993_v12 }
  0xd1   : > { %v930_v53 = vadd.f32 %v929_v26, %v5470_v30  ;;  %v1019_v49 = vadd.f32 %v1018_v27, %v5472_v32  ;;  %v564_v26 = vsel %vm5276_vm1, %v531_v2, %v432_v36  ;;  %v565_v27 = vsel %vm5276_vm1, %v532_v3, %v433_v37  ;;  %v4619_v36 = vld [vmem:[%s7132_s1 + $0x2c] sm:$0xf0]  ;;  %v4615_v37 = vld [vmem:[%s7132_s1 + $0x14] sm:$0xf] }
  0xd2   : > { %v1629_v38 = vmul.f32 %v1106_v23, %v928_v19  ;;  %v1630_v39 = vmul.f32 %v1195_v25, %v1017_v20  ;;  %v678_v40 = vunpack.c.l.b16 %v564_v26  ;;  %v679_v42 = vunpack.c.l.b16 %v565_v27 }
  0xd3   : > { %v3985_v52 = vor.u32 %v4615_v37, %v3982_v51 }
  0xd4   : > { %v1693_v60 = vmax.f32 %v1629_v38, 0.0  ;;  %v1694_v61 = vmax.f32 %v1630_v39, 0.0 }
  0xd5   : > { %1365 = vmatpush.bf16.msrb.mxu1 %v3985_v52 }
  0xd7   : > { %v1107_v46 = vpop.f32.mrf.mxu2  ;;  %v1196_v47 = vpop.f32.mrf.mxu3 }
  0xd8   : > { %v1108_v50 = vadd.f32 %v1107_v46, %v5482_v33  ;;  %v1197_v54 = vadd.f32 %v1196_v47, %v5484_v34  ;;  %v932_v55 = vpop.f32.mrf.mxu0  ;;  %v1021_v56 = vpop.f32.mrf.mxu1  ;;  %v3980_v46 = vld [vmem:[%s7132_s1 + $0x10] sm:$0xf] }
  0xd9   : > { %v933_v7 = vadd.f32 %v932_v55, %v5470_v30  ;;  %v1022_v11 = vadd.f32 %v1021_v56, %v5472_v32  ;;  %v3981_v47 = vor.u32 %v4619_v36, %v3980_v46  ;;  %v502_v55 = vmax.f32 %v470_v44, 0.0 }
  0xda   : > { %v1631_v57 = vmul.f32 %v1108_v50, %v930_v53  ;;  %v1632_v58 = vmul.f32 %v1197_v54, %v1019_v49  ;;  %v5576_v50 = vpack.c.b16 %v679_v42, %v678_v40  ;;  %v501_v54 = vmax.f32 %v469_v43, 0.0  ;;  %v437_v40 = vld [vmem:[%s5224_s27 + $0x6c] sm:$0xf] }
  0xdb   : > { %4100 = vmatmul.msk.bf16.gmra.mxu0 %vm864_vm2, %v5524_v48  ;;  %4116 = vmatmul.msk.bf16.gmra.mxu1 %vm864_vm2, %v5524_v48  ;;  %v534_v5 = vpack.c.bf16 %v502_v55, %v502_v55 }
  0xdc   : > { %v1695_v62 = vmax.f32 %v1631_v57, 0.0  ;;  %v1696_v63 = vmax.f32 %v1632_v58, 0.0  ;;  %4132 = vmatmul.msk.bf16.gmra.mxu2 %vm864_vm2, %v5524_v48  ;;  %4148 = vmatmul.msk.bf16.gmra.mxu3 %vm864_vm2, %v5524_v48  ;;  %v533_v3 = vpack.c.bf16 %v501_v54, %v501_v54 }
  0xdd   : > { %1276 = vmatpush.bf16.msrb.mxu0 %v3981_v47  ;;  %v472_v47 = vunpack.c.l.bf16 %v437_v40 }
  0xde   : > { %v5552_v13 = vpack.c.bf16 %v1695_v62, %v1693_v60  ;;  %v5554_v14 = vpack.c.bf16 %v1696_v63, %v1694_v61  ;;  %v566_v27 = vsel %vm5276_vm1, %v533_v3, %v434_v29 }
  0xdf   : > { %v1110_v19 = vpop.f32.mrf.mxu2  ;;  %v1199_v20 = vpop.f32.mrf.mxu3  ;;  %v680_v44 = vunpack.c.l.b16 %v566_v27  ;;  %v438_v27 = vld [vmem:[%s5224_s27 + $0x70] sm:$0xf] }
  0xe0   : > { %v1111_v21 = vadd.f32 %v1110_v19, %v5482_v33  ;;  %v1200_v22 = vadd.f32 %v1199_v20, %v5484_v34  ;;  %v934_v23 = vpop.f32.mrf.mxu0  ;;  %v1023_v25 = vpop.f32.mrf.mxu1 }
  0xe1   : > { %v935_v56 = vadd.f32 %v934_v23, %v5470_v30  ;;  %v1024_v57 = vadd.f32 %v1023_v25, %v5472_v32 }
  0xe2   : > { %v1633_v38 = vmul.f32 %v1111_v21, %v933_v7  ;;  %v1634_v39 = vmul.f32 %v1200_v22, %v1022_v11 }
  0xe4   : > { %v1697_v6 = vmax.f32 %v1633_v38, 0.0  ;;  %v1698_v7 = vmax.f32 %v1634_v39, 0.0  ;;  %v567_v38 = vsel %vm5276_vm1, %v534_v5, %v435_v35  ;;  %v436_v39 = vld [vmem:[%s5224_s27 + $0x68] sm:$0xf] }
  0xe5   : > { %v681_v46 = vunpack.c.l.b16 %v567_v38  ;;  %v471_v36 = vunpack.c.l.bf16 %v436_v39  ;;  %v439_v38 = vld [vmem:[%s5224_s27 + $0x74] sm:$0xf] }
  0xe7   : > { %v1112_v53 = vpop.f32.mrf.mxu2  ;;  %v1201_v49 = vpop.f32.mrf.mxu3  ;;  %v5604_v52 = vpack.c.b16 %v681_v46, %v680_v44 }
  0xe8   : > { %v1113_v58 = vadd.f32 %v1112_v53, %v5482_v33  ;;  %v1202_v60 = vadd.f32 %v1201_v49, %v5484_v34  ;;  %v937_v61 = vpop.f32.mrf.mxu0  ;;  %v1026_v62 = vpop.f32.mrf.mxu1  ;;  %v503_v53 = vmax.f32 %v471_v36, 0.0  ;;  %v504_v49 = vmax.f32 %v472_v47, 0.0 }
  0xe9   : > { %v938_v10 = vadd.f32 %v937_v61, %v5470_v30  ;;  %v1027_v11 = vadd.f32 %v1026_v62, %v5472_v32  ;;  %v473_v36 = vunpack.c.l.bf16 %v438_v27  ;;  %v474_v47 = vunpack.c.l.bf16 %v439_v38 }
  0xea   : > { %v1635_v63 = vmul.f32 %v1113_v58, %v935_v56  ;;  %v1636_v2 = vmul.f32 %v1202_v60, %v1024_v57  ;;  %v535_v61 = vpack.c.bf16 %v503_v53, %v503_v53  ;;  %v536_v62 = vpack.c.bf16 %v504_v49, %v504_v49 }
  0xeb   : > { %4101 = vmatmul.msk.bf16.gmra.mxu0 %vm864_vm2, %v5576_v50  ;;  %4117 = vmatmul.msk.bf16.gmra.mxu1 %vm864_vm2, %v5576_v50  ;;  %v505_v49 = vmax.f32 %v473_v36, 0.0 }
  0xec   : > { %v1699_v8 = vmax.f32 %v1635_v63, 0.0  ;;  %v1700_v1 = vmax.f32 %v1636_v2, 0.0  ;;  %4133 = vmatmul.msk.bf16.gmra.mxu2 %vm864_vm2, %v5576_v50  ;;  %4149 = vmatmul.msk.bf16.gmra.mxu3 %vm864_vm2, %v5576_v50 }
  0xee   : > { %v5592_v12 = vpack.c.bf16 %v1699_v8, %v1697_v6  ;;  %v5594_v19 = vpack.c.bf16 %v1700_v1, %v1698_v7 }
  0xef   : > { %v1115_v20 = vpop.f32.mrf.mxu2  ;;  %v1204_v21 = vpop.f32.mrf.mxu3 }
  0xf0   : > { %v1116_v22 = vadd.f32 %v1115_v20, %v5482_v33  ;;  %v1205_v23 = vadd.f32 %v1204_v21, %v5484_v34  ;;  %v939_v25 = vpop.f32.mrf.mxu0  ;;  %v1028_v26 = vpop.f32.mrf.mxu1 }
  0xf1   : > { %v940_v54 = vadd.f32 %v939_v25, %v5470_v30  ;;  %v1029_v29 = vadd.f32 %v1028_v26, %v5472_v32  ;;  %v568_v25 = vsel %vm5276_vm1, %v535_v61, %v436_v39  ;;  %v569_v26 = vsel %vm5276_vm1, %v536_v62, %v437_v40 }
  0xf2   : > { %v1637_v42 = vmul.f32 %v1116_v22, %v938_v10  ;;  %v1638_v43 = vmul.f32 %v1205_v23, %v1027_v11  ;;  %v682_v44 = vunpack.c.l.b16 %v568_v25  ;;  %v683_v46 = vunpack.c.l.b16 %v569_v26 }
  0xf4   : > { %v1701_v63 = vmax.f32 %v1637_v42, 0.0  ;;  %v1702_v2 = vmax.f32 %v1638_v43, 0.0  ;;  %v5632_v53 = vpack.c.b16 %v683_v46, %v682_v44  ;;  %v441_v44 = vld [vmem:[%s5224_s27 + $0x7c] sm:$0xf] }
  0xf7   : > { %v1117_v37 = vpop.f32.mrf.mxu2  ;;  %v1206_v51 = vpop.f32.mrf.mxu3 }
  0xf8   : > { %v1118_v35 = vadd.f32 %v1117_v37, %v5482_v33  ;;  %v1207_v55 = vadd.f32 %v1206_v51, %v5484_v34  ;;  %v942_v56 = vpop.f32.mrf.mxu0  ;;  %v1031_v57 = vpop.f32.mrf.mxu1 }
  0xf9   : > { %v943_v6 = vadd.f32 %v942_v56, %v5470_v30  ;;  %v1032_v7 = vadd.f32 %v1031_v57, %v5472_v32 }
  0xfa   : > { %v1639_v58 = vmul.f32 %v1118_v35, %v940_v54  ;;  %v1640_v60 = vmul.f32 %v1207_v55, %v1029_v29  ;;  %v506_v54 = vmax.f32 %v474_v47, 0.0 }
  0xfb   : > { %4102 = vmatmul.msk.bf16.gmra.mxu0 %vm864_vm2, %v5604_v52  ;;  %4118 = vmatmul.msk.bf16.gmra.mxu1 %vm864_vm2, %v5604_v52 }
  0xfc   : > { %v1703_v3 = vmax.f32 %v1639_v58, 0.0  ;;  %v1704_v5 = vmax.f32 %v1640_v60, 0.0  ;;  %4134 = vmatmul.msk.bf16.gmra.mxu2 %vm864_vm2, %v5604_v52  ;;  %4150 = vmatmul.msk.bf16.gmra.mxu3 %vm864_vm2, %v5604_v52  ;;  %v537_v60 = vpack.c.bf16 %v505_v49, %v505_v49  ;;  %v538_v61 = vpack.c.bf16 %v506_v54, %v506_v54 }
  0xfd   : > { %v476_v49 = vunpack.c.l.bf16 %v441_v44 }
  0xfe   : > { %v5620_v8 = vpack.c.bf16 %v1703_v3, %v1701_v63  ;;  %v5622_v1 = vpack.c.bf16 %v1704_v5, %v1702_v2  ;;  %v570_v26 = vsel %vm5276_vm1, %v537_v60, %v438_v27 }
  0xff   : > { %v1120_v10 = vpop.f32.mrf.mxu2  ;;  %v1209_v11 = vpop.f32.mrf.mxu3  ;;  %v684_v47 = vunpack.c.l.b16 %v570_v26 }
 0x100   : > { %v1121_v20 = vadd.f32 %v1120_v10, %v5482_v33  ;;  %v1210_v21 = vadd.f32 %v1209_v11, %v5484_v34  ;;  %v944_v22 = vpop.f32.mrf.mxu0  ;;  %v1033_v23 = vpop.f32.mrf.mxu1 }
 0x101   : > { %v945_v29 = vadd.f32 %v944_v22, %v5470_v30  ;;  %v1034_v39 = vadd.f32 %v1033_v23, %v5472_v32 }
 0x102   : > { %v1641_v42 = vmul.f32 %v1121_v20, %v943_v6  ;;  %v1642_v43 = vmul.f32 %v1210_v21, %v1032_v7 }
 0x104   : > { %v1705_v62 = vmax.f32 %v1641_v42, 0.0  ;;  %v1706_v63 = vmax.f32 %v1642_v43, 0.0  ;;  %v571_v42 = vsel %vm5276_vm1, %v538_v61, %v439_v38  ;;  %v440_v43 = vld [vmem:[%s5224_s27 + $0x78] sm:$0xf]  ;;  %s3840_s27 = ssub.s32 (%p5088_p5), 48, %s5137_s5 }
 0x105   : > { %p3841_p0 = scmp.lt.s32.totalorder (%p5088_p5), %s3840_s27, 32 }
 0x107   : > { %v1122_v37 = vpop.f32.mrf.mxu2  ;;  %v1211_v51 = vpop.f32.mrf.mxu3 }
 0x108   : > { %v1123_v40 = vadd.f32 %v1122_v37, %v5482_v33  ;;  %v1212_v35 = vadd.f32 %v1211_v51, %v5484_v34  ;;  %v947_v55 = vpop.f32.mrf.mxu0  ;;  %v1036_v56 = vpop.f32.mrf.mxu1  ;;  %v685_v37 = vunpack.c.l.b16 %v571_v42  ;;  %v475_v51 = vunpack.c.l.bf16 %v440_v43 }
 0x109   : > { %v948_v5 = vadd.f32 %v947_v55, %v5470_v30  ;;  %v1037_v6 = vadd.f32 %v1036_v56, %v5472_v32 }
 0x10a   : > { %v1643_v57 = vmul.f32 %v1123_v40, %v945_v29  ;;  %v1644_v58 = vmul.f32 %v1212_v35, %v1034_v39  ;;  %v5660_v39 = vpack.c.b16 %v685_v37, %v684_v47  ;;  %v507_v40 = vmax.f32 %v475_v51, 0.0 }
 0x10b   : > { %4103 = vmatmul.msk.bf16.gmra.mxu0 %vm864_vm2, %v5632_v53  ;;  %4119 = vmatmul.msk.bf16.gmra.mxu1 %vm864_vm2, %v5632_v53  ;;  %v508_v35 = vmax.f32 %v476_v49, 0.0 }
 0x10c   : > { %v1707_v2 = vmax.f32 %v1643_v57, 0.0  ;;  %v1708_v3 = vmax.f32 %v1644_v58, 0.0  ;;  %4135 = vmatmul.msk.bf16.gmra.mxu2 %vm864_vm2, %v5632_v53  ;;  %4151 = vmatmul.msk.bf16.gmra.mxu3 %vm864_vm2, %v5632_v53 }
 0x10e   : > { %v5648_v7 = vpack.c.bf16 %v1707_v2, %v1705_v62  ;;  %v5650_v10 = vpack.c.bf16 %v1708_v3, %v1706_v63 }
 0x10f   : > { %v1125_v11 = vpop.f32.mrf.mxu2  ;;  %v1214_v20 = vpop.f32.mrf.mxu3 }
 0x110   : > { %v1126_v21 = vadd.f32 %v1125_v11, %v5482_v33  ;;  %v1215_v22 = vadd.f32 %v1214_v20, %v5484_v34  ;;  %v949_v23 = vpop.f32.mrf.mxu0  ;;  %v1038_v25 = vpop.f32.mrf.mxu1  ;;  %v4659_v11 = vld [vmem:[#allocation2 + $0x74] sm:$0xf]  ;;  %v4278_v20 = vld [vmem:[#allocation2 + $0x78] sm:$0xf0] }
 0x111   : > { %v950_v55 = vadd.f32 %v949_v23, %v5470_v30  ;;  %v1039_v27 = vadd.f32 %v1038_v25, %v5472_v32  ;;  %v4675_v23 = vld [vmem:[#allocation2 + $0xf4] sm:$0xf]  ;;  %v4342_v25 = vld [vmem:[#allocation2 + $0xf8] sm:$0xf0] }
 0x112   : > { %v1645_v46 = vmul.f32 %v1126_v21, %v948_v5  ;;  %v1646_v36 = vmul.f32 %v1215_v22, %v1037_v6  ;;  %v539_v5 = vpack.c.bf16 %v507_v40, %v507_v40  ;;  %v540_v6 = vpack.c.bf16 %v508_v35, %v508_v35 }
 0x113   : > { %v4281_v22 = vor.u32 %v4659_v11, %v4278_v20  ;;  %v4345_v42 = vor.u32 %v4675_v23, %v4342_v25 }
 0x114   : > { %v1709_v62 = vmax.f32 %v1645_v46, 0.0  ;;  %v1710_v63 = vmax.f32 %v1646_v36, 0.0  ;;  %v572_v40 = vsel %vm5276_vm1, %v539_v5, %v440_v43  ;;  %v573_v35 = vsel %vm5276_vm1, %v540_v6, %v441_v44 }
 0x115   : > { %2161 = vmatpush.bf16.msra.mxu2 %v4281_v22  ;;  %2250 = vmatpush.bf16.msra.mxu3 %v4345_v42 }
 0x117   : > { %v1127_v54 = vpop.f32.mrf.mxu2  ;;  %v1216_v29 = vpop.f32.mrf.mxu3 }
 0x118   : > { %v1128_v38 = vadd.f32 %v1127_v54, %v5482_v33  ;;  %v1217_v56 = vadd.f32 %v1216_v29, %v5484_v34  ;;  %v952_v57 = vpop.f32.mrf.mxu0  ;;  %v1041_v58 = vpop.f32.mrf.mxu1 }
 0x119   : > { %v953_v21 = vadd.f32 %v952_v57, %v5470_v30  ;;  %v1042_v26 = vadd.f32 %v1041_v58, %v5472_v32  ;;  %v4276_v57 = vld [vmem:[#allocation2 + $0x70] sm:$0xf]  ;;  %v4660_v58 = vld [vmem:[#allocation2 + $0x74] sm:$0xf0] }
 0x11a   : > { %v1647_v60 = vmul.f32 %v1128_v38, %v950_v55  ;;  %v1648_v61 = vmul.f32 %v1217_v56, %v1039_v27  ;;  %v686_v38 = vunpack.c.l.b16 %v572_v40  ;;  %v687_v56 = vunpack.c.l.b16 %v573_v35 }
 0x11b   : > { %4104 = vmatmul.msk.bf16.gmra.mxu0 %vm864_vm2, %v5660_v39  ;;  %4120 = vmatmul.msk.bf16.gmra.mxu1 %vm864_vm2, %v5660_v39 }
 0x11c   : > { %v1711_v2 = vmax.f32 %v1647_v60, 0.0  ;;  %v1712_v3 = vmax.f32 %v1648_v61, 0.0  ;;  %4136 = vmatmul.msk.bf16.gmra.mxu2 %vm864_vm2, %v5660_v39  ;;  %4152 = vmatmul.msk.bf16.gmra.mxu3 %vm864_vm2, %v5660_v39  ;;  %v4277_v60 = vor.u32 %v4660_v58, %v4276_v57  ;;  %v4340_v61 = vld [vmem:[#allocation2 + $0xf0] sm:$0xf]  ;;  %v5686_v11 = vpack.c.b16 %v687_v56, %v686_v38 }
 0x11e   : > { %v5676_v46 = vpack.c.bf16 %v1711_v2, %v1709_v62  ;;  %v5678_v36 = vpack.c.bf16 %v1712_v3, %v1710_v63  ;;  %v4676_v62 = vld [vmem:[#allocation2 + $0xf4] sm:$0xf0]  ;;  %1983 = vmatpush.bf16.msra.mxu0 %v4277_v60 }
 0x11f   : > { %v1130_v47 = vpop.f32.mrf.mxu2  ;;  %v1219_v37 = vpop.f32.mrf.mxu3  ;;  %v4341_v63 = vor.u32 %v4676_v62, %v4340_v61 }
 0x120   : > { %v1131_v51 = vadd.f32 %v1130_v47, %v5482_v33  ;;  %v1220_v49 = vadd.f32 %v1219_v37, %v5484_v34  ;;  %v954_v54 = vpop.f32.mrf.mxu0  ;;  %v1043_v29 = vpop.f32.mrf.mxu1 }
 0x121   : > { %v955_v43 = vadd.f32 %v954_v54, %v5470_v30  ;;  %v1044_v0 = vadd.f32 %v1043_v29, %v5472_v32  ;;  %2072 = vmatpush.bf16.msra.mxu1 %v4341_v63 }
 0x122   : > { %v1649_v55 = vmul.f32 %v1131_v51, %v953_v21  ;;  %v1650_v27 = vmul.f32 %v1220_v49, %v1042_v26 }
 0x124   : > { %v1713_v23 = vmax.f32 %v1649_v55, 0.0  ;;  %v1714_v25 = vmax.f32 %v1650_v27, 0.0 }
 0x127   : > { %v1132_v2 = vpop.f32.mrf.mxu2  ;;  %v1221_v3 = vpop.f32.mrf.mxu3 }
 0x128   : > { %v1133_v44 = vadd.f32 %v1132_v2, %v5482_v33  ;;  %v1222_v5 = vadd.f32 %v1221_v3, %v5484_v34  ;;  %v957_v6 = vpop.f32.mrf.mxu0  ;;  %v1046_v20 = vpop.f32.mrf.mxu1 }
 0x129   : > { %v958_v47 = vadd.f32 %v957_v6, %v5470_v30  ;;  %v1047_v37 = vadd.f32 %v1046_v20, %v5472_v32 }
 0x12a   : > { %v1651_v21 = vmul.f32 %v1133_v44, %v955_v43  ;;  %v1652_v22 = vmul.f32 %v1222_v5, %v1044_v0 }
 0x12b   : > { %4105 = vmatmul.msk.bf16.gmra.mxu0 %vm864_vm2, %v5686_v11  ;;  %4121 = vmatmul.msk.bf16.gmra.mxu1 %vm864_vm2, %v5686_v11 }
 0x12c   : > { %v1715_v26 = vmax.f32 %v1651_v21, 0.0  ;;  %v1716_v42 = vmax.f32 %v1652_v22, 0.0  ;;  %4137 = vmatmul.msk.bf16.gmra.mxu2 %vm864_vm2, %v5686_v11  ;;  %4153 = vmatmul.msk.bf16.gmra.mxu3 %vm864_vm2, %v5686_v11  ;;  %v4657_v21 = vld [vmem:[#allocation2 + $0x64] sm:$0xf]  ;;  %v4270_v22 = vld [vmem:[#allocation2 + $0x68] sm:$0xf0] }
 0x12e   : > { %v5702_v51 = vpack.c.bf16 %v1715_v26, %v1713_v23  ;;  %v5704_v49 = vpack.c.bf16 %v1716_v42, %v1714_v25  ;;  %v4273_v25 = vor.u32 %v4657_v21, %v4270_v22  ;;  %v4673_v26 = vld [vmem:[#allocation2 + $0xe4] sm:$0xf]  ;;  %v4334_v42 = vld [vmem:[#allocation2 + $0xe8] sm:$0xf0] }
 0x12f   : > { %v1135_v54 = vpop.f32.mrf.mxu2  ;;  %v1224_v29 = vpop.f32.mrf.mxu3 }
 0x130   : > { %v1136_v40 = vadd.f32 %v1135_v54, %v5482_v33  ;;  %v1225_v35 = vadd.f32 %v1224_v29, %v5484_v34  ;;  %v959_v55 = vpop.f32.mrf.mxu0  ;;  %v1048_v27 = vpop.f32.mrf.mxu1  ;;  %2162 = vmatpush.bf16.msra.mxu2 %v4273_v25 }
 0x131   : > { %v960_v60 = vadd.f32 %v959_v55, %v5470_v30  ;;  %v1049_v61 = vadd.f32 %v1048_v27, %v5472_v32 }
 0x132   : > { %v1653_v38 = vmul.f32 %v1136_v40, %v958_v47  ;;  %v1654_v56 = vmul.f32 %v1225_v35, %v1047_v37  ;;  %v4337_v37 = vor.u32 %v4673_v26, %v4334_v42 }
 0x134   : > { %v1717_v44 = vmax.f32 %v1653_v38, 0.0  ;;  %v1718_v5 = vmax.f32 %v1654_v56, 0.0  ;;  %2251 = vmatpush.bf16.msra.mxu3 %v4337_v37 }
 0x137   : > { %v1137_v57 = vpop.f32.mrf.mxu2  ;;  %v1226_v58 = vpop.f32.mrf.mxu3 }
 0x138   : > { %v1138_v62 = vadd.f32 %v1137_v57, %v5482_v33  ;;  %v1227_v63 = vadd.f32 %v1226_v58, %v5484_v34  ;;  %v962_v2 = vpop.f32.mrf.mxu0  ;;  %v1051_v3 = vpop.f32.mrf.mxu1  ;;  %v4268_v58 = vld [vmem:[#allocation2 + $0x60] sm:$0xf] }
 0x139   : > { %v963_v23 = vadd.f32 %v962_v2, %v5470_v30  ;;  %v1052_v47 = vadd.f32 %v1051_v3, %v5472_v32 }
 0x13a   : > { %v1655_v43 = vmul.f32 %v1138_v62, %v960_v60  ;;  %v1656_v0 = vmul.f32 %v1227_v63, %v1049_v61  ;;  %v4658_v60 = vld [vmem:[#allocation2 + $0x64] sm:$0xf0]  ;;  %v4332_v62 = vld [vmem:[#allocation2 + $0xe0] sm:$0xf] }
 0x13b   : > { %4154 = vmatmul.msk.bf16.vlgmr.msrb.gmra.mxu0 %vm864_vm2, %v5289_v17  ;;  %4170 = vmatmul.msk.bf16.vlgmr.msrb.gmra.mxu1 %vm864_vm2, %v5289_v17  ;;  %v4269_v61 = vor.u32 %v4658_v60, %v4268_v58  ;;  %v4674_v63 = vld [vmem:[#allocation2 + $0xe4] sm:$0xf0] }
 0x13c   : > { %v1719_v6 = vmax.f32 %v1655_v43, 0.0  ;;  %v1720_v20 = vmax.f32 %v1656_v0, 0.0  ;;  %4186 = vmatmul.msk.bf16.vlgmr.msrb.gmra.mxu2 %vm864_vm2, %v5289_v17  ;;  %4202 = vmatmul.msk.bf16.vlgmr.msrb.gmra.mxu3 %vm864_vm2, %v5289_v17  ;;  %v4333_v2 = vor.u32 %v4674_v63, %v4332_v62 }
 0x13d   : > { %1984 = vmatpush.bf16.msra.mxu0 %v4269_v61 }
 0x13e   : > { %v5722_v54 = vpack.c.bf16 %v1719_v6, %v1717_v44  ;;  %v5724_v29 = vpack.c.bf16 %v1720_v20, %v1718_v5  ;;  %2073 = vmatpush.bf16.msra.mxu1 %v4333_v2 }
 0x13f   : > { %v1140_v40 = vpop.f32.mrf.mxu2  ;;  %v1229_v35 = vpop.f32.mrf.mxu3 }
 0x140   : > { %v1141_v55 = vadd.f32 %v1140_v40, %v5482_v33  ;;  %v1230_v17 = vadd.f32 %v1229_v35, %v5484_v34  ;;  %v964_v27 = vpop.f32.mrf.mxu0  ;;  %v1053_v38 = vpop.f32.mrf.mxu1 }
 0x141   : > { %v965_v0 = vadd.f32 %v964_v27, %v5470_v30  ;;  %v1054_v44 = vadd.f32 %v1053_v38, %v5472_v32 }
 0x142   : > { %v1657_v56 = vmul.f32 %v1141_v55, %v963_v23  ;;  %v1658_v57 = vmul.f32 %v1230_v17, %v1052_v47 }
 0x144   : > { %v1721_v25 = vmax.f32 %v1657_v56, 0.0  ;;  %v1722_v26 = vmax.f32 %v1658_v57, 0.0 }
 0x147   : > { %v1142_v3 = vpop.f32.mrf.mxu2  ;;  %v1231_v43 = vpop.f32.mrf.mxu3 }
 0x148   : > { %v1143_v5 = vadd.f32 %v1142_v3, %v5482_v33  ;;  %v1232_v6 = vadd.f32 %v1231_v43, %v5484_v34  ;;  %v967_v20 = vpop.f32.mrf.mxu0  ;;  %v1056_v21 = vpop.f32.mrf.mxu1 }
 0x149   : > { %v968_v37 = vadd.f32 %v967_v20, %v5470_v30  ;;  %v1057_v40 = vadd.f32 %v1056_v21, %v5472_v32 }
 0x14a   : > { %v1659_v22 = vmul.f32 %v1143_v5, %v965_v0  ;;  %v1660_v23 = vmul.f32 %v1232_v6, %v1054_v44 }
 0x14b   : > { %4155 = vmatmul.msk.bf16.gmra.mxu0 %vm864_vm2, %v5305_v28  ;;  %4171 = vmatmul.msk.bf16.gmra.mxu1 %vm864_vm2, %v5305_v28 }
 0x14c   : > { %v1723_v42 = vmax.f32 %v1659_v22, 0.0  ;;  %v1724_v47 = vmax.f32 %v1660_v23, 0.0  ;;  %4187 = vmatmul.msk.bf16.gmra.mxu2 %vm864_vm2, %v5305_v28  ;;  %4203 = vmatmul.msk.bf16.gmra.mxu3 %vm864_vm2, %v5305_v28 }
 0x14e   : > { %v5742_v35 = vpack.c.bf16 %v1723_v42, %v1721_v25  ;;  %v5744_v55 = vpack.c.bf16 %v1724_v47, %v1722_v26  ;;  %v4655_v25 = vld [vmem:[#allocation2 + $0x54] sm:$0xf]  ;;  %v4262_v26 = vld [vmem:[#allocation2 + $0x58] sm:$0xf0] }
 0x14f   : > { %v1145_v17 = vpop.f32.mrf.mxu2  ;;  %v1234_v27 = vpop.f32.mrf.mxu3  ;;  %v4265_v47 = vor.u32 %v4655_v25, %v4262_v26 }
 0x150   : > { %v1146_v38 = vadd.f32 %v1145_v17, %v5482_v33  ;;  %v1235_v56 = vadd.f32 %v1234_v27, %v5484_v34  ;;  %v969_v57 = vpop.f32.mrf.mxu0  ;;  %v1058_v58 = vpop.f32.mrf.mxu1 }
 0x151   : > { %v970_v63 = vadd.f32 %v969_v57, %v5470_v30  ;;  %v1059_v2 = vadd.f32 %v1058_v58, %v5472_v32  ;;  %2163 = vmatpush.bf16.msra.mxu2 %v4265_v47 }
 0x152   : > { %v1661_v60 = vmul.f32 %v1146_v38, %v968_v37  ;;  %v1662_v61 = vmul.f32 %v1235_v56, %v1057_v40  ;;  %v4671_v37 = vld [vmem:[#allocation2 + $0xd4] sm:$0xf]  ;;  %v4326_v40 = vld [vmem:[#allocation2 + $0xd8] sm:$0xf0] }
 0x153   : > { %v4329_v27 = vor.u32 %v4671_v37, %v4326_v40 }
 0x154   : > { %v1725_v20 = vmax.f32 %v1661_v60, 0.0  ;;  %v1726_v21 = vmax.f32 %v1662_v61, 0.0 }
 0x155   : > { %2252 = vmatpush.bf16.msra.mxu3 %v4329_v27 }
 0x157   : > { %v1147_v62 = vpop.f32.mrf.mxu2  ;;  %v1236_v28 = vpop.f32.mrf.mxu3 }
 0x158   : > { %v1148_v3 = vadd.f32 %v1147_v62, %v5482_v33  ;;  %v1237_v43 = vadd.f32 %v1236_v28, %v5484_v34  ;;  %v972_v0 = vpop.f32.mrf.mxu0  ;;  %v1061_v44 = vpop.f32.mrf.mxu1 }
 0x159   : > { %v973_v42 = vadd.f32 %v972_v0, %v5470_v30  ;;  %v1062_v17 = vadd.f32 %v1061_v44, %v5472_v32  ;;  %v4324_v0 = vld [vmem:[#allocation2 + $0xd0] sm:$0xf]  ;;  %v4672_v44 = vld [vmem:[#allocation2 + $0xd4] sm:$0xf0] }
 0x15a   : > { %v1663_v5 = vmul.f32 %v1148_v3, %v970_v63  ;;  %v1664_v6 = vmul.f32 %v1237_v43, %v1059_v2  ;;  %v4260_v2 = vld [vmem:[#allocation2 + $0x50] sm:$0xf]  ;;  %v4656_v3 = vld [vmem:[#allocation2 + $0x54] sm:$0xf0] }
 0x15b   : > { %4156 = vmatmul.msk.bf16.gmra.mxu0 %vm864_vm2, %v5321_v41  ;;  %4172 = vmatmul.msk.bf16.gmra.mxu1 %vm864_vm2, %v5321_v41  ;;  %v4261_v43 = vor.u32 %v4656_v3, %v4260_v2 }
 0x15c   : > { %v1727_v22 = vmax.f32 %v1663_v5, 0.0  ;;  %v1728_v23 = vmax.f32 %v1664_v6, 0.0  ;;  %4188 = vmatmul.msk.bf16.gmra.mxu2 %vm864_vm2, %v5321_v41  ;;  %4204 = vmatmul.msk.bf16.gmra.mxu3 %vm864_vm2, %v5321_v41  ;;  %v4325_v5 = vor.u32 %v4672_v44, %v4324_v0 }
 0x15d   : > { %1985 = vmatpush.bf16.msra.mxu0 %v4261_v43 }
 0x15e   : > { %v5762_v38 = vpack.c.bf16 %v1727_v22, %v1725_v20  ;;  %v5764_v56 = vpack.c.bf16 %v1728_v23, %v1726_v21  ;;  %2074 = vmatpush.bf16.msra.mxu1 %v4325_v5 }
 0x15f   : > { %v1150_v57 = vpop.f32.mrf.mxu2  ;;  %v1239_v58 = vpop.f32.mrf.mxu3 }
 0x160   : > { %v1151_v60 = vadd.f32 %v1150_v57, %v5482_v33  ;;  %v1240_v41 = vadd.f32 %v1239_v58, %v5484_v34  ;;  %v974_v61 = vpop.f32.mrf.mxu0  ;;  %v1063_v62 = vpop.f32.mrf.mxu1 }
 0x161   : > { %v975_v21 = vadd.f32 %v974_v61, %v5470_v30  ;;  %v1064_v22 = vadd.f32 %v1063_v62, %v5472_v32 }
 0x162   : > { %v1665_v28 = vmul.f32 %v1151_v60, %v973_v42  ;;  %v1666_v63 = vmul.f32 %v1240_v41, %v1062_v17 }
 0x164   : > { %v1729_v40 = vmax.f32 %v1665_v28, 0.0  ;;  %v1730_v17 = vmax.f32 %v1666_v63, 0.0 }
 0x167   : > { %v1152_v6 = vpop.f32.mrf.mxu2  ;;  %v1241_v20 = vpop.f32.mrf.mxu3 }
 0x168   : > { %v1153_v23 = vadd.f32 %v1152_v6, %v5482_v33  ;;  %v1242_v25 = vadd.f32 %v1241_v20, %v5484_v34  ;;  %v977_v26 = vpop.f32.mrf.mxu0  ;;  %v1066_v42 = vpop.f32.mrf.mxu1 }
 0x169   : > { %v978_v58 = vadd.f32 %v977_v26, %v5470_v30  ;;  %v1067_v60 = vadd.f32 %v1066_v42, %v5472_v32 }
 0x16a   : > { %v1667_v47 = vmul.f32 %v1153_v23, %v975_v21  ;;  %v1668_v37 = vmul.f32 %v1242_v25, %v1064_v22 }
 0x16b   : > { %4157 = vmatmul.msk.bf16.gmra.mxu0 %vm864_vm2, %v5361_v4  ;;  %4173 = vmatmul.msk.bf16.gmra.mxu1 %vm864_vm2, %v5361_v4 }
 0x16c   : > { %v1731_v27 = vmax.f32 %v1667_v47, 0.0  ;;  %v1732_v57 = vmax.f32 %v1668_v37, 0.0  ;;  %4189 = vmatmul.msk.bf16.gmra.mxu2 %vm864_vm2, %v5361_v4  ;;  %4205 = vmatmul.msk.bf16.gmra.mxu3 %vm864_vm2, %v5361_v4 }
 0x16e   : > { %v5782_v41 = vpack.c.bf16 %v1731_v27, %v1729_v40  ;;  %v5784_v61 = vpack.c.bf16 %v1732_v57, %v1730_v17  ;;  %v4653_v27 = vld [vmem:[#allocation2 + $0x44] sm:$0xf]  ;;  %v4254_v57 = vld [vmem:[#allocation2 + $0x48] sm:$0xf0] }
 0x16f   : > { %v1155_v62 = vpop.f32.mrf.mxu2  ;;  %v1244_v2 = vpop.f32.mrf.mxu3 }
 0x170   : > { %v1156_v28 = vadd.f32 %v1155_v62, %v5482_v33  ;;  %v1245_v63 = vadd.f32 %v1244_v2, %v5484_v34  ;;  %v979_v3 = vpop.f32.mrf.mxu0  ;;  %v1068_v43 = vpop.f32.mrf.mxu1  ;;  %v4669_v62 = vld [vmem:[#allocation2 + $0xc4] sm:$0xf]  ;;  %v4318_v2 = vld [vmem:[#allocation2 + $0xc8] sm:$0xf0] }
 0x171   : > { %v980_v6 = vadd.f32 %v979_v3, %v5470_v30  ;;  %v1069_v20 = vadd.f32 %v1068_v43, %v5472_v32 }
 0x172   : > { %v1669_v0 = vmul.f32 %v1156_v28, %v978_v58  ;;  %v1670_v44 = vmul.f32 %v1245_v63, %v1067_v60  ;;  %v4257_v60 = vor.u32 %v4653_v27, %v4254_v57  ;;  %v4321_v63 = vor.u32 %v4669_v62, %v4318_v2 }
 0x174   : > { %v1733_v47 = vmax.f32 %v1669_v0, 0.0  ;;  %v1734_v37 = vmax.f32 %v1670_v44, 0.0  ;;  %2164 = vmatpush.bf16.msra.mxu2 %v4257_v60  ;;  %2253 = vmatpush.bf16.msra.mxu3 %v4321_v63 }
 0x177   : > { %v1157_v5 = vpop.f32.mrf.mxu2  ;;  %v1246_v4 = vpop.f32.mrf.mxu3 }
 0x178   : > { %v1158_v21 = vadd.f32 %v1157_v5, %v5482_v33  ;;  %v1247_v22 = vadd.f32 %v1246_v4, %v5484_v34  ;;  %v982_v23 = vpop.f32.mrf.mxu0  ;;  %v1071_v25 = vpop.f32.mrf.mxu1 }
 0x179   : > { %v983_v58 = vadd.f32 %v982_v23, %v5470_v30  ;;  %v1072_v28 = vadd.f32 %v1071_v25, %v5472_v32  ;;  %v4654_v23 = vld [vmem:[#allocation2 + $0x44] sm:$0xf0] }
 0x17a   : > { %v1671_v26 = vmul.f32 %v1158_v21, %v980_v6  ;;  %v1672_v42 = vmul.f32 %v1247_v22, %v1069_v20  ;;  %v4252_v22 = vld [vmem:[#allocation2 + $0x40] sm:$0xf] }
 0x17b   : > { %4158 = vmatmul.msk.bf16.gmra.mxu0 %vm864_vm2, %v5377_v16  ;;  %4174 = vmatmul.msk.bf16.gmra.mxu1 %vm864_vm2, %v5377_v16  ;;  %v4253_v25 = vor.u32 %v4654_v23, %v4252_v22 }
 0x17c   : > { %v1735_v40 = vmax.f32 %v1671_v26, 0.0  ;;  %v1736_v17 = vmax.f32 %v1672_v42, 0.0  ;;  %4190 = vmatmul.msk.bf16.gmra.mxu2 %vm864_vm2, %v5377_v16  ;;  %4206 = vmatmul.msk.bf16.gmra.mxu3 %vm864_vm2, %v5377_v16  ;;  %v4316_v26 = vld [vmem:[#allocation2 + $0xc0] sm:$0xf]  ;;  %v4670_v42 = vld [vmem:[#allocation2 + $0xc4] sm:$0xf0] }
 0x17d   : > { %1986 = vmatpush.bf16.msra.mxu0 %v4253_v25 }
 0x17e   : > { %v5802_v3 = vpack.c.bf16 %v1735_v40, %v1733_v47  ;;  %v5804_v43 = vpack.c.bf16 %v1736_v17, %v1734_v37  ;;  %v4317_v47 = vor.u32 %v4670_v42, %v4316_v26 }
 0x17f   : > { %v1160_v0 = vpop.f32.mrf.mxu2  ;;  %v1249_v44 = vpop.f32.mrf.mxu3 }
 0x180   : > { %v1161_v5 = vadd.f32 %v1160_v0, %v5482_v33  ;;  %v1250_v16 = vadd.f32 %v1249_v44, %v5484_v34  ;;  %v984_v4 = vpop.f32.mrf.mxu0  ;;  %v1073_v6 = vpop.f32.mrf.mxu1  ;;  %2075 = vmatpush.bf16.msra.mxu1 %v4317_v47 }
 0x181   : > { %v985_v17 = vadd.f32 %v984_v4, %v5470_v30  ;;  %v1074_v27 = vadd.f32 %v1073_v6, %v5472_v32 }
 0x182   : > { %v1673_v20 = vmul.f32 %v1161_v5, %v983_v58  ;;  %v1674_v21 = vmul.f32 %v1250_v16, %v1072_v28 }
 0x184   : > { %v1737_v63 = vmax.f32 %v1673_v20, 0.0  ;;  %v1738_v0 = vmax.f32 %v1674_v21, 0.0 }
 0x187   : > { %v1162_v37 = vpop.f32.mrf.mxu2  ;;  %v1251_v40 = vpop.f32.mrf.mxu3 }
 0x188   : > { %v1163_v57 = vadd.f32 %v1162_v37, %v5482_v33  ;;  %v1252_v60 = vadd.f32 %v1251_v40, %v5484_v34  ;;  %v987_v62 = vpop.f32.mrf.mxu0  ;;  %v1076_v58 = vpop.f32.mrf.mxu1 }
 0x189   : > { %v988_v16 = vadd.f32 %v987_v62, %v5470_v30  ;;  %v1077_v4 = vadd.f32 %v1076_v58, %v5472_v32 }
 0x18a   : > { %v1675_v2 = vmul.f32 %v1163_v57, %v985_v17  ;;  %v1676_v28 = vmul.f32 %v1252_v60, %v1074_v27 }
 0x18b   : > { %4159 = vmatmul.msk.bf16.gmra.mxu0 %vm864_vm2, %v5393_v31  ;;  %4175 = vmatmul.msk.bf16.gmra.mxu1 %vm864_vm2, %v5393_v31 }
 0x18c   : > { %v1739_v44 = vmax.f32 %v1675_v2, 0.0  ;;  %v1740_v5 = vmax.f32 %v1676_v28, 0.0  ;;  %4191 = vmatmul.msk.bf16.gmra.mxu2 %vm864_vm2, %v5393_v31  ;;  %4207 = vmatmul.msk.bf16.gmra.mxu3 %vm864_vm2, %v5393_v31 }
 0x18e   : > { %v5822_v6 = vpack.c.bf16 %v1739_v44, %v1737_v63  ;;  %v5824_v22 = vpack.c.bf16 %v1740_v5, %v1738_v0 }
 0x18f   : > { %v1165_v23 = vpop.f32.mrf.mxu2  ;;  %v1254_v25 = vpop.f32.mrf.mxu3 }
 0x190   : > { %v1166_v20 = vadd.f32 %v1165_v23, %v5482_v33  ;;  %v1255_v21 = vadd.f32 %v1254_v25, %v5484_v34  ;;  %v989_v26 = vpop.f32.mrf.mxu0  ;;  %v1078_v42 = vpop.f32.mrf.mxu1  ;;  %v4246_v23 = vld [vmem:[#allocation2 + $0x38] sm:$0xf0]  ;;  %v4667_v25 = vld [vmem:[#allocation2 + $0xb4] sm:$0xf] }
 0x191   : > { %v990_v17 = vadd.f32 %v989_v26, %v5470_v30  ;;  %v1079_v27 = vadd.f32 %v1078_v42, %v5472_v32 }
 0x192   : > { %v1677_v47 = vmul.f32 %v1166_v20, %v988_v16  ;;  %v1678_v37 = vmul.f32 %v1255_v21, %v1077_v4  ;;  %v4651_v16 = vld [vmem:[#allocation2 + $0x34] sm:$0xf]  ;;  %v4310_v20 = vld [vmem:[#allocation2 + $0xb8] sm:$0xf0] }
 0x193   : > { %v4249_v26 = vor.u32 %v4651_v16, %v4246_v23  ;;  %v4313_v42 = vor.u32 %v4667_v25, %v4310_v20 }
 0x194   : > { %v1741_v63 = vmax.f32 %v1677_v47, 0.0  ;;  %v1742_v0 = vmax.f32 %v1678_v37, 0.0 }
 0x195   : > { %2165 = vmatpush.bf16.msra.mxu2 %v4249_v26  ;;  %2254 = vmatpush.bf16.msra.mxu3 %v4313_v42 }
 0x197   : > { %v1167_v40 = vpop.f32.mrf.mxu2  ;;  %v1256_v31 = vpop.f32.mrf.mxu3 }
 0x198   : > { %v1168_v57 = vadd.f32 %v1167_v40, %v5482_v33  ;;  %v1257_v60 = vadd.f32 %v1256_v31, %v5484_v34  ;;  %v992_v62 = vpop.f32.mrf.mxu0  ;;  %v1081_v58 = vpop.f32.mrf.mxu1 }
 0x199   : > { %v993_v4 = vadd.f32 %v992_v62, %v5470_v30  ;;  %v1082_v21 = vadd.f32 %v1081_v58, %v5472_v32  ;;  %v4652_v62 = vld [vmem:[#allocation2 + $0x34] sm:$0xf0] }
 0x19a   : > { %v1679_v2 = vmul.f32 %v1168_v57, %v990_v17  ;;  %v1680_v28 = vmul.f32 %v1257_v60, %v1079_v27  ;;  %v4244_v60 = vld [vmem:[#allocation2 + $0x30] sm:$0xf] }
 0x19b   : > { %4160 = vmatmul.msk.bf16.gmra.mxu0 %vm864_vm2, %v5409_v45  ;;  %4176 = vmatmul.msk.bf16.gmra.mxu1 %vm864_vm2, %v5409_v45  ;;  %v4245_v16 = vor.u32 %v4652_v62, %v4244_v60 }
 0x19c   : > { %v1743_v44 = vmax.f32 %v1679_v2, 0.0  ;;  %v1744_v5 = vmax.f32 %v1680_v28, 0.0  ;;  %4192 = vmatmul.msk.bf16.gmra.mxu2 %vm864_vm2, %v5409_v45  ;;  %4208 = vmatmul.msk.bf16.gmra.mxu3 %vm864_vm2, %v5409_v45  ;;  %v4308_v2 = vld [vmem:[#allocation2 + $0xb0] sm:$0xf] }
 0x19d   : > { %1987 = vmatpush.bf16.msra.mxu0 %v4245_v16 }
 0x19e   : > { %v5842_v47 = vpack.c.bf16 %v1743_v44, %v1741_v63  ;;  %v5844_v31 = vpack.c.bf16 %v1744_v5, %v1742_v0  ;;  %v4668_v63 = vld [vmem:[#allocation2 + $0xb4] sm:$0xf0] }
 0x19f   : > { %v1170_v37 = vpop.f32.mrf.mxu2  ;;  %v1259_v40 = vpop.f32.mrf.mxu3  ;;  %v4309_v44 = vor.u32 %v4668_v63, %v4308_v2 }
 0x1a0   : > { %7158 = vst [vmem:[#allocation13_spill] sm:$0xff] %v5842_v47  ;;  %v1171_v17 = vadd.f32 %v1170_v37, %v5482_v33  ;;  %v1260_v45 = vadd.f32 %v1259_v40, %v5484_v34  ;;  %v994_v27 = vpop.f32.mrf.mxu0  ;;  %v1083_v57 = vpop.f32.mrf.mxu1 }
 0x1a1   : > { %7159 = vst [vmem:[#allocation14_spill] sm:$0xff] %v5844_v31  ;;  %2076 = vmatpush.bf16.msra.mxu1 %v4309_v44  ;;  %v995_v23 = vadd.f32 %v994_v27, %v5470_v30  ;;  %v1084_v25 = vadd.f32 %v1083_v57, %v5472_v32 }
 0x1a2   : > { %v1681_v58 = vmul.f32 %v1171_v17, %v993_v4  ;;  %v1682_v28 = vmul.f32 %v1260_v45, %v1082_v21 }
 0x1a4   : > { %v1745_v21 = vmax.f32 %v1681_v58, 0.0  ;;  %v1746_v17 = vmax.f32 %v1682_v28, 0.0 }
 0x1a7   : > { %v1172_v0 = vpop.f32.mrf.mxu2  ;;  %v1261_v5 = vpop.f32.mrf.mxu3 }
 0x1a8   : > { %v1173_v20 = vadd.f32 %v1172_v0, %v5482_v33  ;;  %v1262_v26 = vadd.f32 %v1261_v5, %v5484_v34  ;;  %v997_v42 = vpop.f32.mrf.mxu0  ;;  %v1086_v37 = vpop.f32.mrf.mxu1 }
 0x1a9   : > { %v998_v57 = vadd.f32 %v997_v42, %v5470_v30  ;;  %v1087_v60 = vadd.f32 %v1086_v37, %v5472_v32 }
 0x1aa   : > { %v1683_v40 = vmul.f32 %v1173_v20, %v995_v23  ;;  %v1684_v4 = vmul.f32 %v1262_v26, %v1084_v25 }
 0x1ab   : > { %4161 = vmatmul.msk.bf16.gmra.mxu0 %vm864_vm2, %v5449_v9  ;;  %4177 = vmatmul.msk.bf16.gmra.mxu1 %vm864_vm2, %v5449_v9 }
 0x1ac   : > { %v1747_v45 = vmax.f32 %v1683_v40, 0.0  ;;  %v1748_v27 = vmax.f32 %v1684_v4, 0.0  ;;  %4193 = vmatmul.msk.bf16.gmra.mxu2 %vm864_vm2, %v5449_v9  ;;  %4209 = vmatmul.msk.bf16.gmra.mxu3 %vm864_vm2, %v5449_v9 }
 0x1ae   : > { %v5862_v62 = vpack.c.bf16 %v1747_v45, %v1745_v21  ;;  %v5864_v2 = vpack.c.bf16 %v1748_v27, %v1746_v17 }
 0x1af   : > { %v1175_v16 = vpop.f32.mrf.mxu2  ;;  %v1264_v63 = vpop.f32.mrf.mxu3 }
 0x1b0   : > { %7160 = vst [vmem:[#allocation15_spill] sm:$0xff] %v5862_v62  ;;  %v1176_v58 = vadd.f32 %v1175_v16, %v5482_v33  ;;  %v1265_v28 = vadd.f32 %v1264_v63, %v5484_v34  ;;  %v999_v44 = vpop.f32.mrf.mxu0  ;;  %v1088_v0 = vpop.f32.mrf.mxu1  ;;  %v4302_v16 = vld [vmem:[#allocation2 + $0xa8] sm:$0xf0]  ;;  %v4662_v62 = vld [vmem:[#allocation2 + $0x84] sm:$0xf0] }
 0x1b1   : > { %7161 = vst [vmem:[#allocation16_spill] sm:$0xff] %v5864_v2  ;;  %v1000_v20 = vadd.f32 %v999_v44, %v5470_v30  ;;  %v1089_v26 = vadd.f32 %v1088_v0, %v5472_v32  ;;  %v4284_v2 = vld [vmem:[#allocation2 + $0x80] sm:$0xf] }
 0x1b2   : > { %v1685_v5 = vmul.f32 %v1176_v58, %v998_v57  ;;  %v1686_v23 = vmul.f32 %v1265_v28, %v1087_v60  ;;  %v4665_v60 = vld [vmem:[#allocation2 + $0xa4] sm:$0xf]  ;;  %v4285_v31 = vor.u32 %v4662_v62, %v4284_v2 }
 0x1b3   : > { %v4305_v63 = vor.u32 %v4665_v60, %v4302_v16 }
 0x1b4   : > { %v1749_v45 = vmax.f32 %v1685_v5, 0.0  ;;  %v1750_v27 = vmax.f32 %v1686_v23, 0.0 }
 0x1b5   : > { %2255 = vmatpush.bf16.msra.mxu3 %v4305_v63  ;;  %v4230_v63 = vld [vmem:[#allocation2 + $0x18] sm:$0xf0] }
 0x1b7   : > { %v1177_v25 = vpop.f32.mrf.mxu2  ;;  %v1266_v9 = vpop.f32.mrf.mxu3 }
 0x1b8   : > { %v1178_v42 = vadd.f32 %v1177_v25, %v5482_v33  ;;  %v1267_v37 = vadd.f32 %v1266_v9, %v5484_v34  ;;  %v5872_v40 = vpop.f32.mrf.mxu0  ;;  %v5874_v4 = vpop.f32.mrf.mxu1  ;;  %v4649_v33 = vld [vmem:[#allocation2 + $0x24] sm:$0xf]  ;;  %v4238_v34 = vld [vmem:[#allocation2 + $0x28] sm:$0xf0]  ;;  %v4650_v25 = vld [vmem:[#allocation2 + $0x24] sm:$0xf0] }
 0x1b9   : > { %v4241_v57 = vor.u32 %v4649_v33, %v4238_v34  ;;  %v4300_v9 = vld [vmem:[#allocation2 + $0xa0] sm:$0xf] }
 0x1ba   : > { %v1687_v21 = vmul.f32 %v1178_v42, %v1000_v20  ;;  %v1688_v17 = vmul.f32 %v1267_v37, %v1089_v26  ;;  %v4666_v26 = vld [vmem:[#allocation2 + $0xa4] sm:$0xf0] }
 0x1bb   : > { %4162 = vmatmul.msk.bf16.gmra.mxu0 %vm864_vm2, %v5468_v24  ;;  %4178 = vmatmul.msk.bf16.gmra.mxu1 %vm864_vm2, %v5468_v24  ;;  %v4301_v42 = vor.u32 %v4666_v26, %v4300_v9  ;;  %v4294_v9 = vld [vmem:[#allocation2 + $0x98] sm:$0xf0] }
 0x1bc   : > { %v1751_v30 = vmax.f32 %v1687_v21, 0.0  ;;  %v1752_v32 = vmax.f32 %v1688_v17, 0.0  ;;  %4194 = vmatmul.msk.bf16.gmra.mxu2 %vm864_vm2, %v5468_v24  ;;  %4210 = vmatmul.msk.bf16.gmra.mxu3 %vm864_vm2, %v5468_v24  ;;  %v4236_v24 = vld [vmem:[#allocation2 + $0x20] sm:$0xf] }
 0x1bd   : > { %2166 = vmatpush.bf16.msra.mxu2 %v4241_v57  ;;  %v4237_v20 = vor.u32 %v4650_v25, %v4236_v24  ;;  %2077 = vmatpush.bf16.msra.mxu1 %v4301_v42  ;;  %v4663_v24 = vld [vmem:[#allocation2 + $0x94] sm:$0xf] }
 0x1be   : > { %v5884_v58 = vpack.c.bf16 %v1751_v30, %v1749_v45  ;;  %v5886_v28 = vpack.c.bf16 %v1752_v32, %v1750_v27 }
 0x1bf   : > { %v5888_v44 = vpop.f32.mrf.mxu2  ;;  %v5890_v0 = vpop.f32.mrf.mxu3  ;;  %1988 = vmatpush.bf16.msra.mxu0 %v4237_v20  ;;  %v4297_v20 = vor.u32 %v4663_v24, %v4294_v9 }
 0x1c0   : > { %7162 = vst [vmem:[#allocation17_spill] sm:$0xff] %v5884_v58  ;;  %v5892_v5 = vpop.f32.mrf.mxu0  ;;  %v5894_v23 = vpop.f32.mrf.mxu1  ;;  %v4646_v58 = vld [vmem:[#allocation2 + $0x4] sm:$0xf0] }
 0x1c1   : > { %7163 = vst [vmem:[#allocation18_spill] sm:$0xff] %v5886_v28  ;;  %2256 = vmatpush.bf16.msra.mxu3 %v4297_v20  ;;  %v4220_v28 = vld [vmem:[#allocation2] sm:$0xf] }
 0x1c2   : > { %7164 = vst [vmem:[#allocation19_spill] sm:$0xff] %v5888_v44 }
 0x1c3   : > { %7165 = vst [vmem:[#allocation20_spill] sm:$0xff] %v5890_v0 }
 0x1c7   : > { %v5896_v37 = vpop.f32.mrf.mxu2  ;;  %v5898_v21 = vpop.f32.mrf.mxu3 }
 0x1c8   : > { %7166 = vst [vmem:[#allocation21_spill] sm:$0xff] %v5896_v37  ;;  %v5900_v17 = vpop.f32.mrf.mxu0  ;;  %v5902_v45 = vpop.f32.mrf.mxu1  ;;  %v4664_v37 = vld [vmem:[#allocation2 + $0x94] sm:$0xf0] }
 0x1c9   : > { %7167 = vst [vmem:[#allocation22_spill] sm:$0xff] %v5898_v21  ;;  %v4292_v21 = vld [vmem:[#allocation2 + $0x90] sm:$0xf] }
 0x1ca   : > { %v4293_v0 = vor.u32 %v4664_v37, %v4292_v21 }
 0x1cb   : > { %4163 = vmatmul.msk.bf16.gmra.mxu0 %vm864_vm2, %v5496_v59  ;;  %4179 = vmatmul.msk.bf16.gmra.mxu1 %vm864_vm2, %v5496_v59 }
 0x1cc   : > { %4195 = vmatmul.msk.bf16.gmra.mxu2 %vm864_vm2, %v5496_v59  ;;  %4211 = vmatmul.msk.bf16.gmra.mxu3 %vm864_vm2, %v5496_v59  ;;  %v4647_v59 = vld [vmem:[#allocation2 + $0x14] sm:$0xf] }
 0x1cd   : > { %v4233_v25 = vor.u32 %v4647_v59, %v4230_v63  ;;  %2078 = vmatpush.bf16.msra.mxu1 %v4293_v0 }
 0x1cf   : > { %v5912_v27 = vpop.f32.mrf.mxu2  ;;  %v5914_v30 = vpop.f32.mrf.mxu3  ;;  %2167 = vmatpush.bf16.msra.mxu2 %v4233_v25 }
 0x1d0   : > { %7168 = vst [vmem:[#allocation23_spill] sm:$0xff] %v5912_v27  ;;  %v5916_v32 = vpop.f32.mrf.mxu0  ;;  %v5918_v33 = vpop.f32.mrf.mxu1  ;;  %v4648_v27 = vld [vmem:[#allocation2 + $0x14] sm:$0xf0] }
 0x1d1   : > { %7169 = vst [vmem:[#allocation24_spill] sm:$0xff] %v5914_v30  ;;  %v4228_v30 = vld [vmem:[#allocation2 + $0x10] sm:$0xf]  ;;  %2079 = vmatpush.bf16.msra.mxu1 %v4285_v31 }
 0x1d7   : > { %v5920_v34 = vpop.f32.mrf.mxu2  ;;  %v5922_v57 = vpop.f32.mrf.mxu3 }
 0x1d8   : > { %7170 = vst [vmem:[#allocation25_spill] sm:$0xff] %v5920_v34  ;;  %v5924_v60 = vpop.f32.mrf.mxu0  ;;  %v5926_v16 = vpop.f32.mrf.mxu1 }
 0x1d9   : > { %7171 = vst [vmem:[#allocation26_spill] sm:$0xff] %v5922_v57 }
 0x1db   : > { %4164 = vmatmul.msk.bf16.gmra.mxu0 %vm864_vm2, %v5524_v48  ;;  %4180 = vmatmul.msk.bf16.gmra.mxu1 %vm864_vm2, %v5524_v48 }
 0x1dc   : > { %4196 = vmatmul.msk.bf16.gmra.mxu2 %vm864_vm2, %v5524_v48  ;;  %4212 = vmatmul.msk.bf16.gmra.mxu3 %vm864_vm2, %v5524_v48  ;;  %v4229_v48 = vor.u32 %v4648_v27, %v4228_v30 }
 0x1de   : > { %1989 = vmatpush.bf16.msra.mxu0 %v4229_v48 }
 0x1df   : > { %v5936_v26 = vpop.f32.mrf.mxu2  ;;  %v5938_v42 = vpop.f32.mrf.mxu3 }
 0x1e0   : > { %7172 = vst [vmem:[#allocation27_spill] sm:$0xff] %v5936_v26  ;;  %v5940_v57 = vpop.f32.mrf.mxu0  ;;  %v5942_v34 = vpop.f32.mrf.mxu1 }
 0x1e1   : > { %7173 = vst [vmem:[#allocation28_spill] sm:$0xff] %v5938_v42 }
 0x1e7   : > { %v5944_v59 = vpop.f32.mrf.mxu2  ;;  %v5946_v63 = vpop.f32.mrf.mxu3 }
 0x1e8   : > { %7174 = vst [vmem:[#allocation29_spill] sm:$0xff] %v5944_v59  ;;  %v5948_v24 = vpop.f32.mrf.mxu0  ;;  %v5950_v25 = vpop.f32.mrf.mxu1 }
 0x1e9   : > { %7175 = vst [vmem:[#allocation30_spill] sm:$0xff] %v5946_v63 }
 0x1eb   : > { %4165 = vmatmul.msk.bf16.gmra.mxu0 %vm864_vm2, %v5576_v50  ;;  %4181 = vmatmul.msk.bf16.gmra.mxu1 %vm864_vm2, %v5576_v50 }
 0x1ec   : > { %4197 = vmatmul.msk.bf16.gmra.mxu2 %vm864_vm2, %v5576_v50  ;;  %4213 = vmatmul.msk.bf16.gmra.mxu3 %vm864_vm2, %v5576_v50  ;;  %v4645_v50 = vld [vmem:[#allocation2 + $0x4] sm:$0xf] }
 0x1ef   : > { %v5960_v0 = vpop.f32.mrf.mxu2  ;;  %v5962_v37 = vpop.f32.mrf.mxu3 }
 0x1f0   : > { %7176 = vst [vmem:[#allocation31_spill] sm:$0xff] %v5960_v0  ;;  %v5964_v21 = vpop.f32.mrf.mxu0  ;;  %v5966_v27 = vpop.f32.mrf.mxu1  ;;  %v4286_v0 = vld [vmem:[#allocation2 + $0x88] sm:$0xf0] }
 0x1f1   : > { %7177 = vst [vmem:[#allocation32_spill] sm:$0xff] %v5962_v37  ;;  %v4661_v37 = vld [vmem:[#allocation2 + $0x84] sm:$0xf] }
 0x1f2   : > { %v4289_v63 = vor.u32 %v4661_v37, %v4286_v0 }
 0x1f4   : > { %2257 = vmatpush.bf16.msra.mxu3 %v4289_v63 }
 0x1f7   : > { %v5968_v30 = vpop.f32.mrf.mxu2  ;;  %v5970_v9 = vpop.f32.mrf.mxu3 }
 0x1f8   : > { %7178 = vst [vmem:[#allocation33_spill] sm:$0xff] %v5968_v30  ;;  %v5972_v20 = vpop.f32.mrf.mxu0  ;;  %v5974_v48 = vpop.f32.mrf.mxu1  ;;  %v4222_v30 = vld [vmem:[#allocation2 + $0x8] sm:$0xf0] }
 0x1f9   : > { %7179 = vst [vmem:[#allocation34_spill] sm:$0xff] %v5970_v9  ;;  %v4225_v9 = vor.u32 %v4645_v50, %v4222_v30 }
 0x1fb   : > { %4166 = vmatmul.msk.bf16.gmra.mxu0 %vm864_vm2, %v5604_v52  ;;  %4182 = vmatmul.msk.bf16.gmra.mxu1 %vm864_vm2, %v5604_v52 }
 0x1fc   : > { %4198 = vmatmul.msk.bf16.gmra.mxu2 %vm864_vm2, %v5604_v52  ;;  %4214 = vmatmul.msk.bf16.gmra.mxu3 %vm864_vm2, %v5604_v52  ;;  %v4221_v52 = vor.u32 %v4646_v58, %v4220_v28 }
 0x1fd   : > { %2168 = vmatpush.bf16.msra.mxu2 %v4225_v9 }
 0x1fe   : > { %1990 = vmatpush.bf16.msra.mxu0 %v4221_v52 }
 0x1ff   : > { %v5984_v59 = vpop.f32.mrf.mxu2  ;;  %v5986_v42 = vpop.f32.mrf.mxu3 }
 0x200   : > { %7180 = vst [vmem:[#allocation35_spill] sm:$0xff] %v5984_v59  ;;  %v5988_v26 = vpop.f32.mrf.mxu0  ;;  %v5990_v44 = vpop.f32.mrf.mxu1 }
 0x201   : > { %7181 = vst [vmem:[#allocation36_spill] sm:$0xff] %v5986_v42 }
 0x207   : > { %v5992_v30 = vpop.f32.mrf.mxu2  ;;  %v5994_v0 = vpop.f32.mrf.mxu3 }
 0x208   : > { %7182 = vst [vmem:[#allocation37_spill] sm:$0xff] %v5992_v30  ;;  %v5996_v37 = vpop.f32.mrf.mxu0  ;;  %v5998_v9 = vpop.f32.mrf.mxu1 }
 0x209   : > { %7183 = vst [vmem:[#allocation38_spill] sm:$0xff] %v5994_v0 }
 0x20a   : > { %7184 = vst [vmem:[#allocation39_spill] sm:$0xff] %v5998_v9  ;;  %v4708_v9 = vld [vmem:[#allocation5 + $0xf4] sm:$0xf0] }
 0x20b   : > { %4167 = vmatmul.msk.bf16.gmra.mxu0 %vm864_vm2, %v5632_v53  ;;  %4183 = vmatmul.msk.bf16.gmra.mxu1 %vm864_vm2, %v5632_v53 }
 0x20c   : > { %4199 = vmatmul.msk.bf16.gmra.mxu2 %vm864_vm2, %v5632_v53  ;;  %4215 = vmatmul.msk.bf16.gmra.mxu3 %vm864_vm2, %v5632_v53  ;;  %v4691_v53 = vld [vmem:[#allocation5 + $0x74] sm:$0xf] }
 0x20f   : > { %v6008_v31 = vpop.f32.mrf.mxu2  ;;  %v6010_v62 = vpop.f32.mrf.mxu3 }
 0x210   : > { %7185 = vst [vmem:[#allocation40_spill] sm:$0xff] %v6008_v31  ;;  %v6012_v2 = vpop.f32.mrf.mxu0  ;;  %v6014_v58 = vpop.f32.mrf.mxu1  ;;  %v4470_v31 = vld [vmem:[#allocation5 + $0xf8] sm:$0xf0] }
 0x211   : > { %7186 = vst [vmem:[#allocation41_spill] sm:$0xff] %v6010_v62  ;;  %v4707_v62 = vld [vmem:[#allocation5 + $0xf4] sm:$0xf] }
 0x212   : > { %7187 = vst [vmem:[#allocation42_spill] sm:$0xff] %v6012_v2  ;;  %v4473_v0 = vor.u32 %v4707_v62, %v4470_v31  ;;  %v4468_v2 = vld [vmem:[#allocation5 + $0xf0] sm:$0xf] }
 0x213   : > { %7188 = vst [vmem:[#allocation43_spill] sm:$0xff] %v6014_v58  ;;  %v4692_v58 = vld [vmem:[#allocation5 + $0x74] sm:$0xf0]  ;;  %v4469_v47 = vor.u32 %v4708_v9, %v4468_v2 }
 0x214   : > { %2964 = vmatpush.bf16.msrb.mxu3 %v4473_v0 }
 0x215   : > { %2786 = vmatpush.bf16.msrb.mxu1 %v4469_v47 }
 0x217   : > { %v6016_v28 = vpop.f32.mrf.mxu2  ;;  %v6018_v63 = vpop.f32.mrf.mxu3 }
 0x218   : > { %7189 = vst [vmem:[#allocation44_spill] sm:$0xff] %v6016_v28  ;;  %v6020_v50 = vpop.f32.mrf.mxu0  ;;  %v6022_v52 = vpop.f32.mrf.mxu1  ;;  %v4406_v28 = vld [vmem:[#allocation5 + $0x78] sm:$0xf0] }
 0x219   : > { %7190 = vst [vmem:[#allocation45_spill] sm:$0xff] %v6018_v63  ;;  %v4409_v63 = vor.u32 %v4691_v53, %v4406_v28 }
 0x21a   : > { %7191 = vst [vmem:[#allocation46_spill] sm:$0xff] %v6020_v50  ;;  %v4404_v50 = vld [vmem:[#allocation5 + $0x70] sm:$0xf] }
 0x21b   : > { %7192 = vst [vmem:[#allocation47_spill] sm:$0xff] %v6022_v52  ;;  %4168 = vmatmul.msk.bf16.gmra.mxu0 %vm864_vm2, %v5660_v39  ;;  %4184 = vmatmul.msk.bf16.gmra.mxu1 %vm864_vm2, %v5660_v39 }
 0x21c   : > { %4200 = vmatmul.msk.bf16.gmra.mxu2 %vm864_vm2, %v5660_v39  ;;  %4216 = vmatmul.msk.bf16.gmra.mxu3 %vm864_vm2, %v5660_v39  ;;  %v4405_v39 = vor.u32 %v4692_v58, %v4404_v50 }
 0x21d   : > { %2875 = vmatpush.bf16.msrb.mxu2 %v4409_v63 }
 0x21e   : > { %2697 = vmatpush.bf16.msrb.mxu0 %v4405_v39 }
 0x21f   : > { %v6032_v30 = vpop.f32.mrf.mxu2  ;;  %v6034_v42 = vpop.f32.mrf.mxu3 }
 0x220   : > { %7193 = vst [vmem:[#allocation48_spill] sm:$0xff] %v6032_v30  ;;  %v6036_v59 = vpop.f32.mrf.mxu0  ;;  %v6038_v52 = vpop.f32.mrf.mxu1 }
 0x221   : > { %7194 = vst [vmem:[#allocation49_spill] sm:$0xff] %v6034_v42 }
 0x227   : > { %v6040_v28 = vpop.f32.mrf.mxu2  ;;  %v6042_v31 = vpop.f32.mrf.mxu3 }
 0x228   : > { %7195 = vst [vmem:[#allocation50_spill] sm:$0xff] %v6040_v28  ;;  %v6044_v62 = vpop.f32.mrf.mxu0  ;;  %v6046_v63 = vpop.f32.mrf.mxu1  ;;  %v4462_v28 = vld [vmem:[#allocation5 + $0xe8] sm:$0xf0] }
 0x229   : > { %7196 = vst [vmem:[#allocation51_spill] sm:$0xff] %v6042_v31 }
 0x22a   : > { %7197 = vst [vmem:[#allocation52_spill] sm:$0xff] %v6046_v63 }
 0x22b   : > { %4169 = vmatmul.msk.bf16.gmra.mxu0 %vm864_vm2, %v5686_v11  ;;  %4185 = vmatmul.msk.bf16.gmra.mxu1 %vm864_vm2, %v5686_v11 }
 0x22c   : > { %4201 = vmatmul.msk.bf16.gmra.mxu2 %vm864_vm2, %v5686_v11  ;;  %4217 = vmatmul.msk.bf16.gmra.mxu3 %vm864_vm2, %v5686_v11  ;;  %v4689_v11 = vld [vmem:[#allocation5 + $0x64] sm:$0xf] }
 0x22f   : > { %v6056_v47 = vpop.f32.mrf.mxu2  ;;  %v6058_v0 = vpop.f32.mrf.mxu3 }
 0x230   : > { %7198 = vst [vmem:[#allocation53_spill] sm:$0xff] %v6056_v47  ;;  %v6060_v9 = vpop.f32.mrf.mxu0  ;;  %v6062_v2 = vpop.f32.mrf.mxu1  ;;  %v4705_v47 = vld [vmem:[#allocation5 + $0xe4] sm:$0xf] }
 0x231   : > { %7199 = vst [vmem:[#allocation54_spill] sm:$0xff] %v6058_v0  ;;  %v4398_v0 = vld [vmem:[#allocation5 + $0x68] sm:$0xf0] }
 0x232   : > { %7200 = vst [vmem:[#allocation55_spill] sm:$0xff] %v6060_v9  ;;  %v4401_v31 = vor.u32 %v4689_v11, %v4398_v0  ;;  %v4706_v9 = vld [vmem:[#allocation5 + $0xe4] sm:$0xf0] }
 0x233   : > { %7201 = vst [vmem:[#allocation56_spill] sm:$0xff] %v6062_v2  ;;  %v4460_v2 = vld [vmem:[#allocation5 + $0xe0] sm:$0xf] }
 0x234   : > { %2876 = vmatpush.bf16.msrb.mxu2 %v4401_v31  ;;  %v4461_v63 = vor.u32 %v4706_v9, %v4460_v2 }
 0x236   : > { %2787 = vmatpush.bf16.msrb.mxu1 %v4461_v63 }
 0x237   : > { %v6064_v58 = vpop.f32.mrf.mxu2  ;;  %v6066_v50 = vpop.f32.mrf.mxu3 }
 0x238   : > { %7202 = vst [vmem:[#allocation57_spill] sm:$0xff] %v6064_v58  ;;  %v6068_v53 = vpop.f32.mrf.mxu0  ;;  %v6070_v39 = vpop.f32.mrf.mxu1  ;;  %v4465_v58 = vor.u32 %v4705_v47, %v4462_v28 }
 0x239   : > { %7203 = vst [vmem:[#allocation58_spill] sm:$0xff] %v6066_v50 }
 0x23a   : > { %7204 = vst [vmem:[#allocation59_spill] sm:$0xff] %v6068_v53  ;;  %2965 = vmatpush.bf16.msrb.mxu3 %v4465_v58  ;;  %v4396_v53 = vld [vmem:[#allocation5 + $0x60] sm:$0xf] }
 0x23b   : > { %7205 = vst [vmem:[#allocation60_spill] sm:$0xff] %v6070_v39  ;;  %1991 = vmatmul.bf16.vlgmr.msra.gmra.mxu0 %v5510_v15  ;;  %2080 = vmatmul.bf16.vlgmr.msra.gmra.mxu1 %v5512_v18 }
 0x23c   : > { %2169 = vmatmul.bf16.vlgmr.msra.gmra.mxu2 %v5510_v15  ;;  %2258 = vmatmul.bf16.vlgmr.msra.gmra.mxu3 %v5512_v18  ;;  %v4690_v15 = vld [vmem:[#allocation5 + $0x64] sm:$0xf0] }
 0x23d   : > { %v4397_v18 = vor.u32 %v4690_v15, %v4396_v53 }
 0x23f   : > { %v6076_v42 = vpop.f32.mrf.mxu2  ;;  %v6078_v50 = vpop.f32.mrf.mxu3  ;;  %2698 = vmatpush.bf16.msrb.mxu0 %v4397_v18 }
 0x240   : > { %7206 = vst [vmem:[#allocation61_spill] sm:$0xff] %v6076_v42  ;;  %v6080_v30 = vpop.f32.mrf.mxu0  ;;  %v6082_v39 = vpop.f32.mrf.mxu1 }
 0x241   : > { %7207 = vst [vmem:[#allocation62_spill] sm:$0xff] %v6078_v50 }
 0x247   : > { %v6084_v0 = vpop.f32.mrf.mxu2  ;;  %v6086_v28 = vpop.f32.mrf.mxu3 }
 0x248   : > { %7208 = vst [vmem:[#allocation63_spill] sm:$0xff] %v6084_v0  ;;  %v6088_v47 = vpop.f32.mrf.mxu0  ;;  %v6090_v31 = vpop.f32.mrf.mxu1 }
 0x249   : > { %7209 = vst [vmem:[#allocation64_spill] sm:$0xff] %v6086_v28  ;;  %v4454_v28 = vld [vmem:[#allocation5 + $0xd8] sm:$0xf0] }
 0x24b   : > { %1996 = vmatmul.bf16.gmra.mxu0 %v5552_v13  ;;  %2085 = vmatmul.bf16.gmra.mxu1 %v5554_v14 }
 0x24c   : > { %2174 = vmatmul.bf16.gmra.mxu2 %v5552_v13  ;;  %2263 = vmatmul.bf16.gmra.mxu3 %v5554_v14  ;;  %v4687_v13 = vld [vmem:[#allocation5 + $0x54] sm:$0xf]  ;;  %v4390_v14 = vld [vmem:[#allocation5 + $0x58] sm:$0xf0] }
 0x24f   : > { %v6096_v58 = vpop.f32.mrf.mxu2  ;;  %v6098_v9 = vpop.f32.mrf.mxu3 }
 0x250   : > { %7210 = vst [vmem:[#allocation65_spill] sm:$0xff] %v6096_v58  ;;  %v6100_v63 = vpop.f32.mrf.mxu0  ;;  %v6102_v2 = vpop.f32.mrf.mxu1  ;;  %v4393_v58 = vor.u32 %v4687_v13, %v4390_v14 }
 0x251   : > { %7211 = vst [vmem:[#allocation66_spill] sm:$0xff] %v6098_v9  ;;  %v4703_v9 = vld [vmem:[#allocation5 + $0xd4] sm:$0xf] }
 0x252   : > { %7212 = vst [vmem:[#allocation67_spill] sm:$0xff] %v6100_v63  ;;  %2877 = vmatpush.bf16.msrb.mxu2 %v4393_v58 }
 0x253   : > { %7213 = vst [vmem:[#allocation68_spill] sm:$0xff] %v6102_v2  ;;  %v4704_v2 = vld [vmem:[#allocation5 + $0xd4] sm:$0xf0] }
 0x257   : > { %v6104_v53 = vpop.f32.mrf.mxu2  ;;  %v6106_v11 = vpop.f32.mrf.mxu3 }
 0x258   : > { %7214 = vst [vmem:[#allocation69_spill] sm:$0xff] %v6104_v53  ;;  %v6108_v15 = vpop.f32.mrf.mxu0  ;;  %v6110_v18 = vpop.f32.mrf.mxu1  ;;  %v4457_v53 = vor.u32 %v4703_v9, %v4454_v28 }
 0x259   : > { %7215 = vst [vmem:[#allocation70_spill] sm:$0xff] %v6106_v11 }
 0x25a   : > { %7216 = vst [vmem:[#allocation71_spill] sm:$0xff] %v6108_v15  ;;  %2966 = vmatpush.bf16.msrb.mxu3 %v4457_v53  ;;  %v4452_v15 = vld [vmem:[#allocation5 + $0xd0] sm:$0xf] }
 0x25b   : > { %7217 = vst [vmem:[#allocation72_spill] sm:$0xff] %v6110_v18  ;;  %2001 = vmatmul.bf16.gmra.mxu0 %v5592_v12  ;;  %2090 = vmatmul.bf16.gmra.mxu1 %v5594_v19  ;;  %v4388_v18 = vld [vmem:[#allocation5 + $0x50] sm:$0xf]  ;;  %v4453_v63 = vor.u32 %v4704_v2, %v4452_v15 }
 0x25c   : > { %2179 = vmatmul.bf16.gmra.mxu2 %v5592_v12  ;;  %2268 = vmatmul.bf16.gmra.mxu3 %v5594_v19  ;;  %v4688_v12 = vld [vmem:[#allocation5 + $0x54] sm:$0xf0] }
 0x25d   : > { %v4389_v19 = vor.u32 %v4688_v12, %v4388_v18  ;;  %2788 = vmatpush.bf16.msrb.mxu1 %v4453_v63 }
 0x25f   : > { %v6116_v0 = vpop.f32.mrf.mxu2  ;;  %v6118_v11 = vpop.f32.mrf.mxu3  ;;  %2699 = vmatpush.bf16.msrb.mxu0 %v4389_v19 }
 0x260   : > { %7218 = vst [vmem:[#allocation73_spill] sm:$0xff] %v6116_v0  ;;  %v6120_v50 = vpop.f32.mrf.mxu0  ;;  %v6122_v42 = vpop.f32.mrf.mxu1 }
 0x261   : > { %7219 = vst [vmem:[#allocation74_spill] sm:$0xff] %v6118_v11 }
 0x267   : > { %v6124_v13 = vpop.f32.mrf.mxu2  ;;  %v6126_v28 = vpop.f32.mrf.mxu3 }
 0x268   : > { %7220 = vst [vmem:[#allocation75_spill] sm:$0xff] %v6124_v13  ;;  %v6128_v9 = vpop.f32.mrf.mxu0  ;;  %v6130_v58 = vpop.f32.mrf.mxu1 }
 0x269   : > { %7221 = vst [vmem:[#allocation76_spill] sm:$0xff] %v6126_v28  ;;  %v4446_v28 = vld [vmem:[#allocation5 + $0xc8] sm:$0xf0] }
 0x26a   : > { %7222 = vst [vmem:[#allocation77_spill] sm:$0xff] %v6130_v58  ;;  %v4682_v58 = vld [vmem:[#allocation5 + $0x24] sm:$0xf0] }
 0x26b   : > { %2006 = vmatmul.bf16.gmra.mxu0 %v5620_v8  ;;  %2095 = vmatmul.bf16.gmra.mxu1 %v5622_v1 }
 0x26c   : > { %2184 = vmatmul.bf16.gmra.mxu2 %v5620_v8  ;;  %2273 = vmatmul.bf16.gmra.mxu3 %v5622_v1  ;;  %v4685_v8 = vld [vmem:[#allocation5 + $0x44] sm:$0xf]  ;;  %v4382_v1 = vld [vmem:[#allocation5 + $0x48] sm:$0xf0] }
 0x26f   : > { %v6136_v53 = vpop.f32.mrf.mxu2  ;;  %v6138_v2 = vpop.f32.mrf.mxu3 }
 0x270   : > { %7223 = vst [vmem:[#allocation78_spill] sm:$0xff] %v6136_v53  ;;  %v6140_v63 = vpop.f32.mrf.mxu0  ;;  %v6142_v15 = vpop.f32.mrf.mxu1  ;;  %v4385_v53 = vor.u32 %v4685_v8, %v4382_v1 }
 0x271   : > { %7224 = vst [vmem:[#allocation79_spill] sm:$0xff] %v6138_v2  ;;  %v4701_v2 = vld [vmem:[#allocation5 + $0xc4] sm:$0xf] }
 0x272   : > { %7225 = vst [vmem:[#allocation80_spill] sm:$0xff] %v6140_v63  ;;  %2878 = vmatpush.bf16.msrb.mxu2 %v4385_v53 }
 0x273   : > { %7226 = vst [vmem:[#allocation81_spill] sm:$0xff] %v6142_v15  ;;  %v4702_v15 = vld [vmem:[#allocation5 + $0xc4] sm:$0xf0] }
 0x277   : > { %v6144_v18 = vpop.f32.mrf.mxu2  ;;  %v6146_v14 = vpop.f32.mrf.mxu3 }
 0x278   : > { %7227 = vst [vmem:[#allocation82_spill] sm:$0xff] %v6144_v18  ;;  %v6148_v12 = vpop.f32.mrf.mxu0  ;;  %v6150_v19 = vpop.f32.mrf.mxu1  ;;  %v4449_v18 = vor.u32 %v4701_v2, %v4446_v28 }
 0x279   : > { %7228 = vst [vmem:[#allocation83_spill] sm:$0xff] %v6146_v14 }
 0x27a   : > { %7229 = vst [vmem:[#allocation84_spill] sm:$0xff] %v6148_v12  ;;  %2967 = vmatpush.bf16.msrb.mxu3 %v4449_v18  ;;  %v4444_v12 = vld [vmem:[#allocation5 + $0xc0] sm:$0xf] }
 0x27b   : > { %7230 = vst [vmem:[#allocation85_spill] sm:$0xff] %v6150_v19  ;;  %2011 = vmatmul.bf16.gmra.mxu0 %v5648_v7  ;;  %2100 = vmatmul.bf16.gmra.mxu1 %v5650_v10  ;;  %v4380_v19 = vld [vmem:[#allocation5 + $0x40] sm:$0xf]  ;;  %v4445_v63 = vor.u32 %v4702_v15, %v4444_v12 }
 0x27c   : > { %2189 = vmatmul.bf16.gmra.mxu2 %v5648_v7  ;;  %2278 = vmatmul.bf16.gmra.mxu3 %v5650_v10  ;;  %v4686_v7 = vld [vmem:[#allocation5 + $0x44] sm:$0xf0] }
 0x27d   : > { %v4381_v10 = vor.u32 %v4686_v7, %v4380_v19  ;;  %2789 = vmatpush.bf16.msrb.mxu1 %v4445_v63 }
 0x27f   : > { %v6156_v13 = vpop.f32.mrf.mxu2  ;;  %v6158_v14 = vpop.f32.mrf.mxu3  ;;  %2700 = vmatpush.bf16.msrb.mxu0 %v4381_v10 }
 0x280   : > { %7231 = vst [vmem:[#allocation86_spill] sm:$0xff] %v6156_v13  ;;  %v6160_v11 = vpop.f32.mrf.mxu0  ;;  %v6162_v0 = vpop.f32.mrf.mxu1 }
 0x281   : > { %7232 = vst [vmem:[#allocation87_spill] sm:$0xff] %v6158_v14  ;;  %v4438_v14 = vld [vmem:[#allocation5 + $0xb8] sm:$0xf0] }
 0x282   : > { %7233 = vst [vmem:[#allocation88_spill] sm:$0xff] %v6160_v11  ;;  %v4364_v11 = vld [vmem:[#allocation5 + $0x20] sm:$0xf] }
 0x283   : > { %7234 = vst [vmem:[#allocation89_spill] sm:$0xff] %v6162_v0 }
 0x287   : > { %v6164_v8 = vpop.f32.mrf.mxu2  ;;  %v6166_v28 = vpop.f32.mrf.mxu3 }
 0x288   : > { %7235 = vst [vmem:[#allocation90_spill] sm:$0xff] %v6164_v8  ;;  %v6168_v2 = vpop.f32.mrf.mxu0  ;;  %v6170_v53 = vpop.f32.mrf.mxu1 }
 0x289   : > { %7236 = vst [vmem:[#allocation91_spill] sm:$0xff] %v6166_v28 }
 0x28a   : > { %7237 = vst [vmem:[#allocation92_spill] sm:$0xff] %v6168_v2 }
 0x28b   : > { %7238 = vst [vmem:[#allocation93_spill] sm:$0xff] %v6170_v53  ;;  %2016 = vmatmul.bf16.gmra.mxu0 %v5676_v46  ;;  %2105 = vmatmul.bf16.gmra.mxu1 %v5678_v36 }
 0x28c   : > { %2194 = vmatmul.bf16.gmra.mxu2 %v5676_v46  ;;  %2283 = vmatmul.bf16.gmra.mxu3 %v5678_v36 }
 0x28f   : > { %v6176_v18 = vpop.f32.mrf.mxu2  ;;  %v6178_v15 = vpop.f32.mrf.mxu3 }
 0x290   : > { %7239 = vst [vmem:[#allocation94_spill] sm:$0xff] %v6176_v18  ;;  %v6180_v63 = vpop.f32.mrf.mxu0  ;;  %v6182_v12 = vpop.f32.mrf.mxu1  ;;  %v4699_v18 = vld [vmem:[#allocation5 + $0xb4] sm:$0xf] }
 0x291   : > { %7240 = vst [vmem:[#allocation95_spill] sm:$0xff] %v6178_v15  ;;  %v4683_v15 = vld [vmem:[#allocation5 + $0x34] sm:$0xf]  ;;  %v4441_v13 = vor.u32 %v4699_v18, %v4438_v14 }
 0x292   : > { %7241 = vst [vmem:[#allocation96_spill] sm:$0xff] %v6180_v63 }
 0x293   : > { %7242 = vst [vmem:[#allocation97_spill] sm:$0xff] %v6182_v12  ;;  %2968 = vmatpush.bf16.msrb.mxu3 %v4441_v13  ;;  %v4436_v12 = vld [vmem:[#allocation5 + $0xb0] sm:$0xf] }
 0x297   : > { %v6184_v19 = vpop.f32.mrf.mxu2  ;;  %v6186_v1 = vpop.f32.mrf.mxu3 }
 0x298   : > { %7243 = vst [vmem:[#allocation98_spill] sm:$0xff] %v6184_v19  ;;  %v6188_v7 = vpop.f32.mrf.mxu0  ;;  %v6190_v10 = vpop.f32.mrf.mxu1  ;;  %v4374_v19 = vld [vmem:[#allocation5 + $0x38] sm:$0xf0] }
 0x299   : > { %7244 = vst [vmem:[#allocation99_spill] sm:$0xff] %v6186_v1  ;;  %v4377_v8 = vor.u32 %v4683_v15, %v4374_v19  ;;  %v1817_v19 = vld [vmem:[%s7135_s4] sm:$0x3] }
 0x29a   : > { %7245 = vst [vmem:[#allocation100_spill] sm:$0xff] %v6188_v7  ;;  %v4684_v7 = vld [vmem:[#allocation5 + $0x34] sm:$0xf0] }
 0x29b   : > { %7246 = vst [vmem:[#allocation101_spill] sm:$0xff] %v6190_v10  ;;  %2021 = vmatmul.bf16.gmra.mxu0 %v5702_v51  ;;  %2110 = vmatmul.bf16.gmra.mxu1 %v5704_v49 }
 0x29c   : > { %2199 = vmatmul.bf16.gmra.mxu2 %v5702_v51  ;;  %2288 = vmatmul.bf16.gmra.mxu3 %v5704_v49 }
 0x29d   : > { %2879 = vmatpush.bf16.msrb.mxu2 %v4377_v8 }
 0x29f   : > { %v6196_v46 = vpop.f32.mrf.mxu2  ;;  %v6198_v36 = vpop.f32.mrf.mxu3 }
 0x2a0   : > { %7247 = vst [vmem:[#allocation102_spill] sm:$0xff] %v6196_v46  ;;  %v6200_v1 = vpop.f32.mrf.mxu0  ;;  %v6202_v28 = vpop.f32.mrf.mxu1 }
 0x2a1   : > { %7248 = vst [vmem:[#allocation103_spill] sm:$0xff] %v6198_v36  ;;  %v4372_v36 = vld [vmem:[#allocation5 + $0x30] sm:$0xf] }
 0x2a2   : > { %7249 = vst [vmem:[#allocation104_spill] sm:$0xff] %v6200_v1  ;;  %v4373_v63 = vor.u32 %v4684_v7, %v4372_v36  ;;  %v4700_v1 = vld [vmem:[#allocation5 + $0xb4] sm:$0xf0]  ;;  %v6227_v7 = vperm.slane %v1817_v19, 0 }
 0x2a3   : > { %7250 = vst [vmem:[#allocation105_spill] sm:$0xff] %v6202_v28  ;;  %v4437_v14 = vor.u32 %v4700_v1, %v4436_v12  ;;  %v4430_v28 = vld [vmem:[#allocation5 + $0xa8] sm:$0xf0] }
 0x2a4   : > { %2701 = vmatpush.bf16.msrb.mxu0 %v4373_v63 }
 0x2a5   : > { %2790 = vmatpush.bf16.msrb.mxu1 %v4437_v14 }
 0x2a7   : > { %v6204_v10 = vpop.f32.mrf.mxu2  ;;  %v6206_v51 = vpop.f32.mrf.mxu3 }
 0x2a8   : > { %7251 = vst [vmem:[#allocation106_spill] sm:$0xff] %v6204_v10  ;;  %v6208_v49 = vpop.f32.mrf.mxu0  ;;  %v6210_v46 = vpop.f32.mrf.mxu1 }
 0x2a9   : > { %7252 = vst [vmem:[#allocation107_spill] sm:$0xff] %v6206_v51  ;;  %v6245_v51 = vperm.slane %v1817_v19, 1 }
 0x2aa   : > { %7253 = vst [vmem:[#allocation108_spill] sm:$0xff] %v6208_v49  ;;  %v4697_v49 = vld [vmem:[#allocation5 + $0xa4] sm:$0xf] }
 0x2ab   : > { %7254 = vst [vmem:[#allocation109_spill] sm:$0xff] %v6210_v46  ;;  %2026 = vmatmul.bf16.gmra.mxu0 %v5722_v54  ;;  %2115 = vmatmul.bf16.gmra.mxu1 %v5724_v29  ;;  %v4433_v53 = vor.u32 %v4697_v49, %v4430_v28 }
 0x2ac   : > { %2204 = vmatmul.bf16.gmra.mxu2 %v5722_v54  ;;  %2293 = vmatmul.bf16.gmra.mxu3 %v5724_v29  ;;  %v4817_v54 = vld [vmem:[%s7133_s2] sm:$0xff] }
 0x2ad   : > { %v6232_v29 = vperm.slane %v4817_v54, 4  ;;  %2969 = vmatpush.bf16.msrb.mxu3 %v4433_v53 }
 0x2af   : > { %v6216_v13 = vpop.f32.mrf.mxu2  ;;  %v6218_v8 = vpop.f32.mrf.mxu3 }
 0x2b0   : > { %7255 = vst [vmem:[#allocation110_spill] sm:$0xff] %v6216_v13  ;;  %v6220_v18 = vpop.f32.mrf.mxu0  ;;  %v6222_v15 = vpop.f32.mrf.mxu1 }
 0x2b1   : > { %7256 = vst [vmem:[#allocation111_spill] sm:$0xff] %v6218_v8  ;;  %v1279_v8 = vadd.f32 %v5872_v40, %v6232_v29 }
 0x2b2   : > { %7257 = vst [vmem:[#allocation112_spill] sm:$0xff] %v6220_v18  ;;  %v4366_v18 = vld [vmem:[#allocation5 + $0x28] sm:$0xf0] }
 0x2b3   : > { %7258 = vst [vmem:[#allocation113_spill] sm:$0xff] %v6222_v15 }
 0x2b7   : > { %v6234_v63 = vpop.f32.mrf.mxu2  ;;  %v6236_v12 = vpop.f32.mrf.mxu3 }
 0x2b8   : > { %7259 = vst [vmem:[#allocation114_spill] sm:$0xff] %v6234_v63  ;;  %v1992_v1 = vpop.f32.mrf.mxu0  ;;  %v2081_v36 = vpop.f32.mrf.mxu1 }
 0x2b9   : > { %7260 = vst [vmem:[#allocation115_spill] sm:$0xff] %v6236_v12  ;;  %v1993_v14 = vadd.f32 %v1992_v1, %v6227_v7  ;;  %v6247_v12 = vperm.slane %v4817_v54, 5  ;;  %v4681_v1 = vld [vmem:[#allocation5 + $0x24] sm:$0xf] }
 0x2ba   : > { %v4369_v46 = vor.u32 %v4681_v1, %v4366_v18 }
 0x2bb   : > { %v2082_v13 = vadd.f32 %v2081_v36, %v1993_v14  ;;  %2031 = vmatmul.bf16.gmra.mxu0 %v5742_v35  ;;  %2120 = vmatmul.bf16.gmra.mxu1 %v5744_v55 }
 0x2bc   : > { %2209 = vmatmul.bf16.gmra.mxu2 %v5742_v35  ;;  %2298 = vmatmul.bf16.gmra.mxu3 %v5744_v55  ;;  %v1368_v55 = vadd.f32 %v5874_v4, %v6247_v12  ;;  %v4365_v4 = vor.u32 %v4682_v58, %v4364_v11 }
 0x2bd   : > { %v2339_v63 = vmul.f32 %v2082_v13, %v1279_v8  ;;  %2880 = vmatpush.bf16.msrb.mxu2 %v4369_v46  ;;  %v1281_v8 = vadd.f32 %v5892_v5, %v6232_v29  ;;  %v4698_v46 = vld [vmem:[#allocation5 + $0xa4] sm:$0xf0] }
 0x2be   : > { %2702 = vmatpush.bf16.msrb.mxu0 %v4365_v4 }
 0x2bf   : > { %v2170_v10 = vpop.f32.mrf.mxu2  ;;  %v2259_v15 = vpop.f32.mrf.mxu3  ;;  %v2403_v2 = vmax.f32 %v2339_v63, 0.0  ;;  %v1370_v63 = vadd.f32 %v5894_v23, %v6247_v12 }
 0x2c0   : > { %v2171_v40 = vadd.f32 %v2170_v10, %v6245_v51  ;;  %v1994_v36 = vpop.f32.mrf.mxu0  ;;  %v2083_v14 = vpop.f32.mrf.mxu1 }
 0x2c1   : > { %v1995_v35 = vadd.f32 %v1994_v36, %v6227_v7 }
 0x2c2   : > { %v2260_v13 = vadd.f32 %v2259_v15, %v2171_v40  ;;  %v4428_v15 = vld [vmem:[#allocation5 + $0xa0] sm:$0xf] }
 0x2c3   : > { %v2084_v19 = vadd.f32 %v2083_v14, %v1995_v35  ;;  %v4429_v53 = vor.u32 %v4698_v46, %v4428_v15  ;;  %v1284_v35 = vadd.f32 %v5900_v17, %v6232_v29 }
 0x2c4   : > { %v2340_v54 = vmul.f32 %v2260_v13, %v1368_v55 }
 0x2c5   : > { %v2341_v10 = vmul.f32 %v2084_v19, %v1281_v8  ;;  %2791 = vmatpush.bf16.msrb.mxu1 %v4429_v53 }
 0x2c6   : > { %v2404_v58 = vmax.f32 %v2340_v54, 0.0 }
 0x2c7   : > { %v2405_v0 = vmax.f32 %v2341_v10, 0.0  ;;  %v2172_v18 = vpop.f32.mrf.mxu2  ;;  %v2261_v1 = vpop.f32.mrf.mxu3 }
 0x2c8   : > { %v2173_v28 = vadd.f32 %v2172_v18, %v6245_v51  ;;  %v1997_v49 = vpop.f32.mrf.mxu0  ;;  %v2086_v36 = vpop.f32.mrf.mxu1 }
 0x2c9   : > { %v6256_v40 = vpack.c.bf16 %v2405_v0, %v2403_v2  ;;  %v1998_v5 = vadd.f32 %v1997_v49, %v6227_v7 }
 0x2ca   : > { %v2262_v14 = vadd.f32 %v2261_v1, %v2173_v28  ;;  %v1373_v1 = vadd.f32 %v5902_v45, %v6247_v12  ;;  %v1375_v45 = vadd.f32 %v5918_v33, %v6247_v12  ;;  %v4679_v33 = vld [vmem:[#allocation5 + $0x14] sm:$0xf] }
 0x2cb   : > { %v2087_v55 = vadd.f32 %v2086_v36, %v1998_v5  ;;  %2036 = vmatmul.bf16.gmra.mxu0 %v5762_v38  ;;  %2125 = vmatmul.bf16.gmra.mxu1 %v5764_v56 }
 0x2cc   : > { %v2342_v11 = vmul.f32 %v2262_v14, %v1370_v63  ;;  %2214 = vmatmul.bf16.gmra.mxu2 %v5762_v38  ;;  %2303 = vmatmul.bf16.gmra.mxu3 %v5764_v56  ;;  %v1286_v56 = vadd.f32 %v5916_v32, %v6232_v29  ;;  %v1289_v32 = vadd.f32 %v5924_v60, %v6232_v29 }
 0x2cd   : > { %v2343_v0 = vmul.f32 %v2087_v55, %v1284_v35 }
 0x2ce   : > { %v2406_v2 = vmax.f32 %v2342_v11, 0.0 }
 0x2cf   : > { %v2175_v23 = vpop.f32.mrf.mxu2  ;;  %v2264_v13 = vpop.f32.mrf.mxu3  ;;  %v2407_v36 = vmax.f32 %v2343_v0, 0.0 }
 0x2d0   : > { %v6267_v8 = vpack.c.bf16 %v2406_v2, %v2404_v58  ;;  %v2176_v17 = vadd.f32 %v2175_v23, %v6245_v51  ;;  %v1999_v19 = vpop.f32.mrf.mxu0  ;;  %v2088_v10 = vpop.f32.mrf.mxu1 }
 0x2d1   : > { %v2000_v18 = vadd.f32 %v1999_v19, %v6227_v7  ;;  %v4358_v19 = vld [vmem:[#allocation5 + $0x18] sm:$0xf0] }
 0x2d2   : > { %v2265_v38 = vadd.f32 %v2264_v13, %v2176_v17 }
 0x2d3   : > { %v2089_v28 = vadd.f32 %v2088_v10, %v2000_v18 }
 0x2d4   : > { %v2344_v54 = vmul.f32 %v2265_v38, %v1373_v1  ;;  %v4361_v1 = vor.u32 %v4679_v33, %v4358_v19  ;;  %v4695_v38 = vld [vmem:[#allocation5 + $0x94] sm:$0xf]  ;;  %v1294_v19 = vadd.f32 %v5948_v24, %v6232_v29 }
 0x2d5   : > { %v2345_v49 = vmul.f32 %v2089_v28, %v1286_v56  ;;  %v4422_v56 = vld [vmem:[#allocation5 + $0x98] sm:$0xf0] }
 0x2d6   : > { %v2408_v2 = vmax.f32 %v2344_v54, 0.0  ;;  %2881 = vmatpush.bf16.msrb.mxu2 %v4361_v1 }
 0x2d7   : > { %v2409_v4 = vmax.f32 %v2345_v49, 0.0  ;;  %v2177_v15 = vpop.f32.mrf.mxu2  ;;  %v2266_v46 = vpop.f32.mrf.mxu3  ;;  %v4425_v49 = vor.u32 %v4695_v38, %v4422_v56 }
 0x2d8   : > { %v2178_v5 = vadd.f32 %v2177_v15, %v6245_v51  ;;  %v2002_v53 = vpop.f32.mrf.mxu0  ;;  %v2091_v63 = vpop.f32.mrf.mxu1 }
 0x2d9   : > { %v2003_v14 = vadd.f32 %v2002_v53, %v6227_v7  ;;  %v6277_v35 = vpack.c.bf16 %v2409_v4, %v2407_v36  ;;  %v1291_v36 = vadd.f32 %v5940_v57, %v6232_v29  ;;  %2970 = vmatpush.bf16.msrb.mxu3 %v4425_v49 }
 0x2da   : > { %v2267_v55 = vadd.f32 %v2266_v46, %v2178_v5 }
 0x2db   : > { %v2092_v11 = vadd.f32 %v2091_v63, %v2003_v14  ;;  %2041 = vmatmul.bf16.gmra.mxu0 %v5782_v41  ;;  %2130 = vmatmul.bf16.gmra.mxu1 %v5784_v61 }
 0x2dc   : > { %v2346_v0 = vmul.f32 %v2267_v55, %v1375_v45  ;;  %2219 = vmatmul.bf16.gmra.mxu2 %v5782_v41  ;;  %2308 = vmatmul.bf16.gmra.mxu3 %v5784_v61  ;;  %v1378_v61 = vadd.f32 %v5926_v16, %v6247_v12  ;;  %v4356_v45 = vld [vmem:[#allocation5 + $0x10] sm:$0xf]  ;;  %v4680_v55 = vld [vmem:[#allocation5 + $0x14] sm:$0xf0] }
 0x2dd   : > { %v2347_v58 = vmul.f32 %v2092_v11, %v1289_v32  ;;  %v4357_v16 = vor.u32 %v4680_v55, %v4356_v45 }
 0x2de   : > { %v2410_v23 = vmax.f32 %v2346_v0, 0.0 }
 0x2df   : > { %v2180_v13 = vpop.f32.mrf.mxu2  ;;  %v2269_v17 = vpop.f32.mrf.mxu3  ;;  %v2411_v5 = vmax.f32 %v2347_v58, 0.0  ;;  %v1380_v58 = vadd.f32 %v5942_v34, %v6247_v12  ;;  %2703 = vmatpush.bf16.msrb.mxu0 %v4357_v16 }
 0x2e0   : > { %v2181_v10 = vadd.f32 %v2180_v13, %v6245_v51  ;;  %v2004_v60 = vpop.f32.mrf.mxu0  ;;  %v2093_v18 = vpop.f32.mrf.mxu1  ;;  %v6288_v28 = vpack.c.bf16 %v2410_v23, %v2408_v2  ;;  %v4420_v2 = vld [vmem:[#allocation5 + $0x90] sm:$0xf]  ;;  %v4696_v23 = vld [vmem:[#allocation5 + $0x94] sm:$0xf0] }
 0x2e1   : > { %v2005_v41 = vadd.f32 %v2004_v60, %v6227_v7  ;;  %v4421_v57 = vor.u32 %v4696_v23, %v4420_v2 }
 0x2e2   : > { %v2270_v54 = vadd.f32 %v2269_v17, %v2181_v10 }
 0x2e3   : > { %v2094_v4 = vadd.f32 %v2093_v18, %v2005_v41  ;;  %2792 = vmatpush.bf16.msrb.mxu1 %v4421_v57 }
 0x2e4   : > { %v2348_v15 = vmul.f32 %v2270_v54, %v1378_v61 }
 0x2e5   : > { %v2349_v46 = vmul.f32 %v2094_v4, %v1291_v36  ;;  %v1383_v36 = vadd.f32 %v5950_v25, %v6247_v12  ;;  %v1385_v25 = vadd.f32 %v5966_v27, %v6247_v12  ;;  %v4677_v27 = vld [vmem:[#allocation5 + $0x4] sm:$0xf] }
 0x2e6   : > { %v2412_v1 = vmax.f32 %v2348_v15, 0.0 }
 0x2e7   : > { %v2413_v53 = vmax.f32 %v2349_v46, 0.0  ;;  %v2182_v63 = vpop.f32.mrf.mxu2  ;;  %v2271_v14 = vpop.f32.mrf.mxu3 }
 0x2e8   : > { %v2183_v32 = vadd.f32 %v2182_v63, %v6245_v51  ;;  %v2007_v11 = vpop.f32.mrf.mxu0  ;;  %v2096_v0 = vpop.f32.mrf.mxu1 }
 0x2e9   : > { %v2008_v13 = vadd.f32 %v2007_v11, %v6227_v7  ;;  %v6297_v17 = vpack.c.bf16 %v2413_v53, %v2411_v5 }
 0x2ea   : > { %v2272_v33 = vadd.f32 %v2271_v14, %v2183_v32 }
 0x2eb   : > { %v2097_v10 = vadd.f32 %v2096_v0, %v2008_v13  ;;  %2046 = vmatmul.bf16.gmra.mxu0 %v5802_v3  ;;  %2135 = vmatmul.bf16.gmra.mxu1 %v5804_v43 }
 0x2ec   : > { %v2350_v60 = vmul.f32 %v2272_v33, %v1380_v58  ;;  %2224 = vmatmul.bf16.gmra.mxu2 %v5802_v3  ;;  %2313 = vmatmul.bf16.gmra.mxu3 %v5804_v43  ;;  %v1296_v43 = vadd.f32 %v5964_v21, %v6232_v29  ;;  %v1299_v21 = vadd.f32 %v5972_v20, %v6232_v29 }
 0x2ed   : > { %v2351_v18 = vmul.f32 %v2097_v10, %v1294_v19  ;;  %v4350_v10 = vld [vmem:[#allocation5 + $0x8] sm:$0xf0] }
 0x2ee   : > { %v2414_v38 = vmax.f32 %v2350_v60, 0.0 }
 0x2ef   : > { %v2185_v34 = vpop.f32.mrf.mxu2  ;;  %v2274_v56 = vpop.f32.mrf.mxu3  ;;  %v2415_v5 = vmax.f32 %v2351_v18, 0.0 }
 0x2f0   : > { %v2186_v41 = vadd.f32 %v2185_v34, %v6245_v51  ;;  %v2009_v49 = vpop.f32.mrf.mxu0  ;;  %v2098_v24 = vpop.f32.mrf.mxu1  ;;  %v6308_v61 = vpack.c.bf16 %v2414_v38, %v2412_v1  ;;  %v4353_v1 = vor.u32 %v4677_v27, %v4350_v10  ;;  %v4693_v38 = vld [vmem:[#allocation5 + $0x84] sm:$0xf]  ;;  %v4414_v34 = vld [vmem:[#allocation5 + $0x88] sm:$0xf0] }
 0x2f1   : > { %v2010_v54 = vadd.f32 %v2009_v49, %v6227_v7 }
 0x2f2   : > { %v2275_v3 = vadd.f32 %v2274_v56, %v2186_v41  ;;  %v4417_v41 = vor.u32 %v4693_v38, %v4414_v34  ;;  %2882 = vmatpush.bf16.msrb.mxu2 %v4353_v1  ;;  %v7263_v38 = vld [vmem:[#allocation39_spill] sm:$0xff] }
 0x2f3   : > { %v2099_v4 = vadd.f32 %v2098_v24, %v2010_v54  ;;  %v1301_v24 = vadd.f32 %v5988_v26, %v6232_v29  ;;  %v1393_v34 = vadd.f32 %v7263_v38, %v6247_v12 }
 0x2f4   : > { %v2352_v15 = vmul.f32 %v2275_v3, %v1383_v36  ;;  %2971 = vmatpush.bf16.msrb.mxu3 %v4417_v41  ;;  %v7264_v41 = vld [vmem:[#allocation42_spill] sm:$0xff] }
 0x2f5   : > { %v2353_v46 = vmul.f32 %v2099_v4, %v1296_v43 }
 0x2f6   : > { %v2416_v57 = vmax.f32 %v2352_v15, 0.0 }
 0x2f7   : > { %v2417_v53 = vmax.f32 %v2353_v46, 0.0  ;;  %v2187_v63 = vpop.f32.mrf.mxu2  ;;  %v2276_v14 = vpop.f32.mrf.mxu3 }
 0x2f8   : > { %v2188_v45 = vadd.f32 %v2187_v63, %v6245_v51  ;;  %v2012_v55 = vpop.f32.mrf.mxu0  ;;  %v2101_v32 = vpop.f32.mrf.mxu1 }
 0x2f9   : > { %v2013_v11 = vadd.f32 %v2012_v55, %v6227_v7  ;;  %v6317_v0 = vpack.c.bf16 %v2417_v53, %v2415_v5  ;;  %v4348_v5 = vld [vmem:[#allocation5] sm:$0xf]  ;;  %v4678_v53 = vld [vmem:[#allocation5 + $0x4] sm:$0xf0] }
 0x2fa   : > { %v2277_v16 = vadd.f32 %v2276_v14, %v2188_v45  ;;  %v4412_v55 = vld [vmem:[#allocation5 + $0x80] sm:$0xf] }
 0x2fb   : > { %v2102_v2 = vadd.f32 %v2101_v32, %v2013_v11  ;;  %2051 = vmatmul.bf16.gmra.mxu0 %v5822_v6  ;;  %2140 = vmatmul.bf16.gmra.mxu1 %v5824_v22  ;;  %v4694_v32 = vld [vmem:[#allocation5 + $0x84] sm:$0xf0] }
 0x2fc   : > { %v2354_v23 = vmul.f32 %v2277_v16, %v1385_v25  ;;  %2229 = vmatmul.bf16.gmra.mxu2 %v5822_v6  ;;  %2318 = vmatmul.bf16.gmra.mxu3 %v5824_v22  ;;  %v1388_v22 = vadd.f32 %v5974_v48, %v6247_v12  ;;  %v4349_v48 = vor.u32 %v4678_v53, %v4348_v5 }
 0x2fd   : > { %v2355_v13 = vmul.f32 %v2102_v2, %v1299_v21  ;;  %v4413_v26 = vor.u32 %v4694_v32, %v4412_v55  ;;  %v1390_v16 = vadd.f32 %v5990_v44, %v6247_v12  ;;  %v1304_v2 = vadd.f32 %v5996_v37, %v6232_v29  ;;  %v7266_v55 = vld [vmem:[#allocation46_spill] sm:$0xff] }
 0x2fe   : > { %v2418_v58 = vmax.f32 %v2354_v23, 0.0  ;;  %2704 = vmatpush.bf16.msrb.mxu0 %v4349_v48  ;;  %v1309_v32 = vadd.f32 %v7266_v55, %v6232_v29  ;;  %v4596_v55 = vld [vmem:[#allocation7 + $0xf0] sm:$0xf] }
 0x2ff   : > { %v2190_v33 = vpop.f32.mrf.mxu2  ;;  %v2279_v19 = vpop.f32.mrf.mxu3  ;;  %v2419_v43 = vmax.f32 %v2355_v13, 0.0  ;;  %v7261_v13 = vld [vmem:[#allocation13_spill] sm:$0xff]  ;;  %2793 = vmatpush.bf16.msrb.mxu1 %v4413_v26  ;;  %v7267_v26 = vld [vmem:[#allocation15_spill] sm:$0xff] }
 0x300   : > { %v2191_v60 = vadd.f32 %v2190_v33, %v6245_v51  ;;  %v2014_v20 = vpop.f32.mrf.mxu0  ;;  %v2103_v18 = vpop.f32.mrf.mxu1  ;;  %v6328_v56 = vpack.c.bf16 %v2418_v58, %v2416_v57  ;;  %v7262_v57 = vld [vmem:[#allocation14_spill] sm:$0xff] }
 0x301   : > { %v2015_v6 = vadd.f32 %v2014_v20, %v6227_v7 }
 0x302   : > { %v2280_v49 = vadd.f32 %v2279_v19, %v2191_v60 }
 0x303   : > { %v2104_v54 = vadd.f32 %v2103_v18, %v2015_v6 }
 0x304   : > { %v2356_v36 = vmul.f32 %v2280_v49, %v1388_v22  ;;  %v1306_v22 = vadd.f32 %v7264_v41, %v6232_v29 }
 0x305   : > { %v2357_v3 = vmul.f32 %v2104_v54, %v1301_v24 }
 0x306   : > { %v2420_v19 = vmax.f32 %v2356_v36, 0.0 }
 0x307   : > { %v2421_v4 = vmax.f32 %v2357_v3, 0.0  ;;  %v2192_v15 = vpop.f32.mrf.mxu2  ;;  %v2281_v46 = vpop.f32.mrf.mxu3 }
 0x308   : > { %v2193_v63 = vadd.f32 %v2192_v15, %v6245_v51  ;;  %v2017_v14 = vpop.f32.mrf.mxu0  ;;  %v2106_v45 = vpop.f32.mrf.mxu1 }
 0x309   : > { %v2018_v11 = vadd.f32 %v2017_v14, %v6227_v7  ;;  %v6337_v25 = vpack.c.bf16 %v2421_v4, %v2419_v43  ;;  %v7265_v14 = vld [vmem:[#allocation43_spill] sm:$0xff] }
 0x30a   : > { %v2282_v21 = vadd.f32 %v2281_v46, %v2193_v63 }
 0x30b   : > { %v2107_v23 = vadd.f32 %v2106_v45, %v2018_v11  ;;  %2056 = vmatmul.bf16.gmra.mxu0 %v7261_v13  ;;  %2145 = vmatmul.bf16.gmra.mxu1 %v7262_v57  ;;  %v1395_v45 = vadd.f32 %v7265_v14, %v6247_v12 }
 0x30c   : > { %v2358_v58 = vmul.f32 %v2282_v21, %v1390_v16  ;;  %2234 = vmatmul.bf16.gmra.mxu2 %v7261_v13  ;;  %2323 = vmatmul.bf16.gmra.mxu3 %v7262_v57  ;;  %v7268_v16 = vld [vmem:[#allocation16_spill] sm:$0xff] }
 0x30d   : > { %v2359_v33 = vmul.f32 %v2107_v23, %v1304_v2 }
 0x30e   : > { %v2422_v27 = vmax.f32 %v2358_v58, 0.0 }
 0x30f   : > { %v2195_v44 = vpop.f32.mrf.mxu2  ;;  %v2284_v10 = vpop.f32.mrf.mxu3  ;;  %v2423_v36 = vmax.f32 %v2359_v33, 0.0  ;;  %v4723_v33 = vld [vmem:[#allocation7 + $0x74] sm:$0xf] }
 0x310   : > { %v2196_v60 = vadd.f32 %v2195_v44, %v6245_v51  ;;  %v2019_v20 = vpop.f32.mrf.mxu0  ;;  %v2108_v37 = vpop.f32.mrf.mxu1  ;;  %v6348_v18 = vpack.c.bf16 %v2422_v27, %v2420_v19  ;;  %v4534_v19 = vld [vmem:[#allocation7 + $0x78] sm:$0xf0] }
 0x311   : > { %v2020_v1 = vadd.f32 %v2019_v20, %v6227_v7  ;;  %v4739_v20 = vld [vmem:[#allocation7 + $0xf4] sm:$0xf] }
 0x312   : > { %v2285_v6 = vadd.f32 %v2284_v10, %v2196_v60  ;;  %v4537_v60 = vor.u32 %v4723_v33, %v4534_v19 }
 0x313   : > { %v2109_v49 = vadd.f32 %v2108_v37, %v2020_v1  ;;  %v4598_v37 = vld [vmem:[#allocation7 + $0xf8] sm:$0xf0] }
 0x314   : > { %v2360_v24 = vmul.f32 %v2285_v6, %v1393_v34  ;;  %v4601_v34 = vor.u32 %v4739_v20, %v4598_v37  ;;  %v7269_v6 = vld [vmem:[#allocation47_spill] sm:$0xff]  ;;  %3589 = vmatpush.bf16.msra.mxu2 %v4537_v60 }
 0x315   : > { %v2361_v54 = vmul.f32 %v2109_v49, %v1306_v22  ;;  %v1398_v41 = vadd.f32 %v7269_v6, %v6247_v12  ;;  %v1311_v49 = vadd.f32 %v6036_v59, %v6232_v29 }
 0x316   : > { %v2424_v23 = vmax.f32 %v2360_v24, 0.0  ;;  %3678 = vmatpush.bf16.msra.mxu3 %v4601_v34 }
 0x317   : > { %v2425_v3 = vmax.f32 %v2361_v54, 0.0  ;;  %v2197_v43 = vpop.f32.mrf.mxu2  ;;  %v2286_v4 = vpop.f32.mrf.mxu3 }
 0x318   : > { %v2198_v15 = vadd.f32 %v2197_v43, %v6245_v51  ;;  %v2022_v46 = vpop.f32.mrf.mxu0  ;;  %v2111_v5 = vpop.f32.mrf.mxu1 }
 0x319   : > { %v2023_v53 = vadd.f32 %v2022_v46, %v6227_v7  ;;  %v6357_v63 = vpack.c.bf16 %v2425_v3, %v2423_v36  ;;  %v4532_v46 = vld [vmem:[#allocation7 + $0x70] sm:$0xf] }
 0x31a   : > { %v2287_v48 = vadd.f32 %v2286_v4, %v2198_v15 }
 0x31b   : > { %v2112_v11 = vadd.f32 %v2111_v5, %v2023_v53  ;;  %2061 = vmatmul.bf16.gmra.mxu0 %v7267_v26  ;;  %2150 = vmatmul.bf16.gmra.mxu1 %v7268_v16  ;;  %v4724_v5 = vld [vmem:[#allocation7 + $0x74] sm:$0xf0] }
 0x31c   : > { %v2362_v21 = vmul.f32 %v2287_v48, %v1395_v45  ;;  %2239 = vmatmul.bf16.gmra.mxu2 %v7267_v26  ;;  %2328 = vmatmul.bf16.gmra.mxu3 %v7268_v16  ;;  %v4533_v48 = vor.u32 %v4724_v5, %v4532_v46  ;;  %v1400_v16 = vadd.f32 %v6038_v52, %v6247_v12 }
 0x31d   : > { %v2363_v2 = vmul.f32 %v2112_v11, %v1309_v32  ;;  %v4740_v32 = vld [vmem:[#allocation7 + $0xf4] sm:$0xf0] }
 0x31e   : > { %v2426_v13 = vmax.f32 %v2362_v21, 0.0  ;;  %v4597_v59 = vor.u32 %v4740_v32, %v4596_v55  ;;  %3411 = vmatpush.bf16.msra.mxu0 %v4533_v48  ;;  %v7275_v32 = vld [vmem:[#allocation59_spill] sm:$0xff] }
 0x31f   : > { %v2200_v57 = vpop.f32.mrf.mxu2  ;;  %v2289_v58 = vpop.f32.mrf.mxu3  ;;  %v2427_v3 = vmax.f32 %v2363_v2, 0.0  ;;  %v1314_v2 = vadd.f32 %v6044_v62, %v6232_v29 }
 0x320   : > { %v2201_v27 = vadd.f32 %v2200_v57, %v6245_v51  ;;  %v2024_v44 = vpop.f32.mrf.mxu0  ;;  %v2113_v10 = vpop.f32.mrf.mxu1  ;;  %v6368_v1 = vpack.c.bf16 %v2426_v13, %v2424_v23  ;;  %v7270_v13 = vld [vmem:[#allocation17_spill] sm:$0xff]  ;;  %v7271_v57 = vld [vmem:[#allocation18_spill] sm:$0xff]  ;;  %3500 = vmatpush.bf16.msra.mxu1 %v4597_v59 }
 0x321   : > { %v2025_v38 = vadd.f32 %v2024_v44, %v6227_v7 }
 0x322   : > { %v2290_v22 = vadd.f32 %v2289_v58, %v2201_v27 }
 0x323   : > { %v2114_v24 = vadd.f32 %v2113_v10, %v2025_v38  ;;  %v7272_v38 = vld [vmem:[#allocation52_spill] sm:$0xff] }
 0x324   : > { %v2364_v54 = vmul.f32 %v2290_v22, %v1398_v41  ;;  %v1403_v34 = vadd.f32 %v7272_v38, %v6247_v12  ;;  %v7273_v41 = vld [vmem:[#allocation55_spill] sm:$0xff] }
 0x325   : > { %v2365_v36 = vmul.f32 %v2114_v24, %v1311_v49  ;;  %v1316_v22 = vadd.f32 %v7273_v41, %v6232_v29 }
 0x326   : > { %v2428_v19 = vmax.f32 %v2364_v54, 0.0 }
 0x327   : > { %v2429_v43 = vmax.f32 %v2365_v36, 0.0  ;;  %v2202_v4 = vpop.f32.mrf.mxu2  ;;  %v2291_v15 = vpop.f32.mrf.mxu3 }
 0x328   : > { %v2203_v53 = vadd.f32 %v2202_v4, %v6245_v51  ;;  %v2027_v14 = vpop.f32.mrf.mxu0  ;;  %v2116_v45 = vpop.f32.mrf.mxu1 }
 0x329   : > { %v2028_v11 = vadd.f32 %v2027_v14, %v6227_v7  ;;  %v6377_v26 = vpack.c.bf16 %v2429_v43, %v2427_v3 }
 0x32a   : > { %v2292_v21 = vadd.f32 %v2291_v15, %v2203_v53 }
 0x32b   : > { %v2117_v23 = vadd.f32 %v2116_v45, %v2028_v11  ;;  %2066 = vmatmul.bf16.gmra.mxu0 %v7270_v13  ;;  %2155 = vmatmul.bf16.gmra.mxu1 %v7271_v57  ;;  %v7274_v45 = vld [vmem:[#allocation56_spill] sm:$0xff]  ;;  %v1319_v11 = vadd.f32 %v7275_v32, %v6232_v29 }
 0x32c   : > { %v2366_v58 = vmul.f32 %v2292_v21, %v1400_v16  ;;  %2244 = vmatmul.bf16.gmra.mxu2 %v7270_v13  ;;  %2333 = vmatmul.bf16.gmra.mxu3 %v7271_v57  ;;  %v1405_v48 = vadd.f32 %v7274_v45, %v6247_v12  ;;  %v4588_v45 = vld [vmem:[#allocation7 + $0xe0] sm:$0xf] }
 0x32d   : > { %v2367_v33 = vmul.f32 %v2117_v23, %v1314_v2 }
 0x32e   : > { %v2430_v27 = vmax.f32 %v2366_v58, 0.0  ;;  %v4721_v58 = vld [vmem:[#allocation7 + $0x64] sm:$0xf] }
 0x32f   : > { %v2205_v52 = vpop.f32.mrf.mxu2  ;;  %v2294_v44 = vpop.f32.mrf.mxu3  ;;  %v2431_v36 = vmax.f32 %v2367_v33, 0.0  ;;  %v4526_v33 = vld [vmem:[#allocation7 + $0x68] sm:$0xf0] }
 0x330   : > { %v2206_v10 = vadd.f32 %v2205_v52, %v6245_v51  ;;  %v2029_v60 = vpop.f32.mrf.mxu0  ;;  %v2118_v62 = vpop.f32.mrf.mxu1  ;;  %v6388_v20 = vpack.c.bf16 %v2430_v27, %v2428_v19 }
 0x331   : > { %v2030_v37 = vadd.f32 %v2029_v60, %v6227_v7  ;;  %v4590_v60 = vld [vmem:[#allocation7 + $0xe8] sm:$0xf0] }
 0x332   : > { %v2295_v6 = vadd.f32 %v2294_v44, %v2206_v10  ;;  %v4529_v44 = vor.u32 %v4721_v58, %v4526_v33  ;;  %v4737_v10 = vld [vmem:[#allocation7 + $0xe4] sm:$0xf] }
 0x333   : > { %v2119_v49 = vadd.f32 %v2118_v62, %v2030_v37  ;;  %v4593_v37 = vor.u32 %v4737_v10, %v4590_v60 }
 0x334   : > { %v2368_v24 = vmul.f32 %v2295_v6, %v1403_v34  ;;  %3590 = vmatpush.bf16.msra.mxu2 %v4529_v44  ;;  %v1321_v6 = vadd.f32 %v6080_v30, %v6232_v29  ;;  %v1413_v44 = vadd.f32 %v6090_v31, %v6247_v12  ;;  %v7278_v31 = vld [vmem:[#allocation68_spill] sm:$0xff] }
 0x335   : > { %v2369_v54 = vmul.f32 %v2119_v49, %v1316_v22  ;;  %3679 = vmatpush.bf16.msra.mxu3 %v4593_v37 }
 0x336   : > { %v2432_v2 = vmax.f32 %v2368_v24, 0.0 }
 0x337   : > { %v2433_v3 = vmax.f32 %v2369_v54, 0.0  ;;  %v2207_v43 = vpop.f32.mrf.mxu2  ;;  %v2296_v4 = vpop.f32.mrf.mxu3 }
 0x338   : > { %v2208_v15 = vadd.f32 %v2207_v43, %v6245_v51  ;;  %v2032_v46 = vpop.f32.mrf.mxu0  ;;  %v2121_v5 = vpop.f32.mrf.mxu1  ;;  %v4524_v43 = vld [vmem:[#allocation7 + $0x60] sm:$0xf] }
 0x339   : > { %v2033_v53 = vadd.f32 %v2032_v46, %v6227_v7  ;;  %v6397_v14 = vpack.c.bf16 %v2433_v3, %v2431_v36 }
 0x33a   : > { %v2297_v55 = vadd.f32 %v2296_v4, %v2208_v15  ;;  %v4722_v4 = vld [vmem:[#allocation7 + $0x64] sm:$0xf0] }
 0x33b   : > { %v2122_v59 = vadd.f32 %v2121_v5, %v2033_v53  ;;  %2705 = vmatmul.bf16.vlgmr.msrb.gmra.mxu0 %v6256_v40  ;;  %2794 = vmatmul.bf16.vlgmr.msrb.gmra.mxu1 %v6267_v8  ;;  %v4525_v53 = vor.u32 %v4722_v4, %v4524_v43  ;;  %v7279_v43 = vld [vmem:[#allocation71_spill] sm:$0xff] }
 0x33c   : > { %v2370_v16 = vmul.f32 %v2297_v55, %v1405_v48  ;;  %2883 = vmatmul.bf16.vlgmr.msrb.gmra.mxu2 %v6256_v40  ;;  %2972 = vmatmul.bf16.vlgmr.msrb.gmra.mxu3 %v6267_v8  ;;  %v7276_v8 = vld [vmem:[#allocation60_spill] sm:$0xff]  ;;  %v4738_v48 = vld [vmem:[#allocation7 + $0xe4] sm:$0xf0]  ;;  %v1329_v4 = vadd.f32 %v7279_v43, %v6232_v29 }
 0x33d   : > { %v2371_v21 = vmul.f32 %v2122_v59, %v1319_v11  ;;  %v1408_v38 = vadd.f32 %v7276_v8, %v6247_v12  ;;  %v4589_v30 = vor.u32 %v4738_v48, %v4588_v45  ;;  %v1410_v11 = vadd.f32 %v6082_v39, %v6247_v12  ;;  %3412 = vmatpush.bf16.msra.mxu0 %v4525_v53 }
 0x33e   : > { %v2434_v23 = vmax.f32 %v2370_v16, 0.0  ;;  %v1324_v16 = vadd.f32 %v6088_v47, %v6232_v29 }
 0x33f   : > { %v2210_v13 = vpop.f32.mrf.mxu2  ;;  %v2299_v57 = vpop.f32.mrf.mxu3  ;;  %v2435_v24 = vmax.f32 %v2371_v21, 0.0  ;;  %3501 = vmatpush.bf16.msra.mxu1 %v4589_v30  ;;  %v4719_v30 = vld [vmem:[#allocation7 + $0x54] sm:$0xf] }
 0x340   : > { %v2211_v19 = vadd.f32 %v2210_v13, %v6245_v51  ;;  %v2034_v27 = vpop.f32.mrf.mxu0  ;;  %v2123_v52 = vpop.f32.mrf.mxu1  ;;  %v6408_v62 = vpack.c.bf16 %v2434_v23, %v2432_v2 }
 0x341   : > { %v2035_v40 = vadd.f32 %v2034_v27, %v6227_v7 }
 0x342   : > { %v2300_v34 = vadd.f32 %v2299_v57, %v2211_v19 }
 0x343   : > { %v2124_v41 = vadd.f32 %v2123_v52, %v2035_v40 }
 0x344   : > { %v2372_v22 = vmul.f32 %v2300_v34, %v1408_v38 }
 0x345   : > { %v2373_v49 = vmul.f32 %v2124_v41, %v1321_v6 }
 0x346   : > { %v2436_v13 = vmax.f32 %v2372_v22, 0.0 }
 0x347   : > { %v2437_v54 = vmax.f32 %v2373_v49, 0.0  ;;  %v2212_v36 = vpop.f32.mrf.mxu2  ;;  %v2301_v3 = vpop.f32.mrf.mxu3 }
 0x348   : > { %v2213_v15 = vadd.f32 %v2212_v36, %v6245_v51  ;;  %v2037_v46 = vpop.f32.mrf.mxu0  ;;  %v2126_v5 = vpop.f32.mrf.mxu1  ;;  %v1415_v36 = vadd.f32 %v7278_v31, %v6247_v12  ;;  %v1420_v31 = vadd.f32 %v6122_v42, %v6247_v12 }
 0x349   : > { %v2038_v55 = vadd.f32 %v2037_v46, %v6227_v7  ;;  %v6417_v32 = vpack.c.bf16 %v2437_v54, %v2435_v24 }
 0x34a   : > { %v2302_v59 = vadd.f32 %v2301_v3, %v2213_v15 }
 0x34b   : > { %v2127_v21 = vadd.f32 %v2126_v5, %v2038_v55  ;;  %2710 = vmatmul.bf16.gmra.mxu0 %v6277_v35  ;;  %2799 = vmatmul.bf16.gmra.mxu1 %v6288_v28 }
 0x34c   : > { %v2374_v2 = vmul.f32 %v2302_v59, %v1410_v11  ;;  %2888 = vmatmul.bf16.gmra.mxu2 %v6277_v35  ;;  %2977 = vmatmul.bf16.gmra.mxu3 %v6288_v28  ;;  %v7277_v28 = vld [vmem:[#allocation67_spill] sm:$0xff]  ;;  %v4518_v11 = vld [vmem:[#allocation7 + $0x58] sm:$0xf0] }
 0x34d   : > { %v2375_v23 = vmul.f32 %v2127_v21, %v1324_v16  ;;  %v1326_v10 = vadd.f32 %v7277_v28, %v6232_v29 }
 0x34e   : > { %v2438_v57 = vmax.f32 %v2374_v2, 0.0  ;;  %v4521_v2 = vor.u32 %v4719_v30, %v4518_v11  ;;  %v7281_v11 = vld [vmem:[#allocation77_spill] sm:$0xff] }
 0x34f   : > { %v2215_v39 = vpop.f32.mrf.mxu2  ;;  %v2304_v58 = vpop.f32.mrf.mxu3  ;;  %v2439_v8 = vmax.f32 %v2375_v23, 0.0  ;;  %v4735_v23 = vld [vmem:[#allocation7 + $0xd4] sm:$0xf] }
 0x350   : > { %v2216_v33 = vadd.f32 %v2215_v39, %v6245_v51  ;;  %v2039_v19 = vpop.f32.mrf.mxu0  ;;  %v2128_v47 = vpop.f32.mrf.mxu1  ;;  %v6428_v27 = vpack.c.bf16 %v2438_v57, %v2436_v13  ;;  %v4582_v13 = vld [vmem:[#allocation7 + $0xd8] sm:$0xf0]  ;;  %3591 = vmatpush.bf16.msra.mxu2 %v4521_v2 }
 0x351   : > { %v2040_v52 = vadd.f32 %v2039_v19, %v6227_v7  ;;  %v4585_v39 = vor.u32 %v4735_v23, %v4582_v13  ;;  %v1331_v19 = vadd.f32 %v6120_v50, %v6232_v29 }
 0x352   : > { %v2305_v35 = vadd.f32 %v2304_v58, %v2216_v33 }
 0x353   : > { %v2129_v60 = vadd.f32 %v2128_v47, %v2040_v52  ;;  %3680 = vmatpush.bf16.msra.mxu3 %v4585_v39 }
 0x354   : > { %v2376_v40 = vmul.f32 %v2305_v35, %v1413_v44 }
 0x355   : > { %v2377_v37 = vmul.f32 %v2129_v60, %v1326_v10 }
 0x356   : > { %v2440_v53 = vmax.f32 %v2376_v40, 0.0  ;;  %v4516_v40 = vld [vmem:[#allocation7 + $0x50] sm:$0xf] }
 0x357   : > { %v2441_v38 = vmax.f32 %v2377_v37, 0.0  ;;  %v2217_v34 = vpop.f32.mrf.mxu2  ;;  %v2306_v6 = vpop.f32.mrf.mxu3  ;;  %v4720_v37 = vld [vmem:[#allocation7 + $0x54] sm:$0xf0] }
 0x358   : > { %v2218_v41 = vadd.f32 %v2217_v34, %v6245_v51  ;;  %v2042_v22 = vpop.f32.mrf.mxu0  ;;  %v2131_v49 = vpop.f32.mrf.mxu1 }
 0x359   : > { %v2043_v24 = vadd.f32 %v2042_v22, %v6227_v7  ;;  %v6437_v54 = vpack.c.bf16 %v2441_v38, %v2439_v8  ;;  %v4736_v22 = vld [vmem:[#allocation7 + $0xd4] sm:$0xf0] }
 0x35a   : > { %v2307_v3 = vadd.f32 %v2306_v6, %v2218_v41  ;;  %v4517_v6 = vor.u32 %v4720_v37, %v4516_v40  ;;  %v4580_v41 = vld [vmem:[#allocation7 + $0xd0] sm:$0xf] }
 0x35b   : > { %v2132_v15 = vadd.f32 %v2131_v49, %v2043_v24  ;;  %2715 = vmatmul.bf16.gmra.mxu0 %v6297_v17  ;;  %2804 = vmatmul.bf16.gmra.mxu1 %v6308_v61  ;;  %v4581_v50 = vor.u32 %v4736_v22, %v4580_v41  ;;  %v4717_v22 = vld [vmem:[#allocation7 + $0x44] sm:$0xf] }
 0x35c   : > { %v2378_v46 = vmul.f32 %v2307_v3, %v1415_v36  ;;  %2893 = vmatmul.bf16.gmra.mxu2 %v6297_v17  ;;  %2982 = vmatmul.bf16.gmra.mxu3 %v6308_v61  ;;  %v7280_v61 = vld [vmem:[#allocation72_spill] sm:$0xff]  ;;  %v1334_v3 = vadd.f32 %v6128_v9, %v6232_v29 }
 0x35d   : > { %v2379_v5 = vmul.f32 %v2132_v15, %v1329_v4  ;;  %v1418_v58 = vadd.f32 %v7280_v61, %v6247_v12  ;;  %3413 = vmatpush.bf16.msra.mxu0 %v4517_v6  ;;  %3502 = vmatpush.bf16.msra.mxu1 %v4581_v50 }
 0x35e   : > { %v2442_v45 = vmax.f32 %v2378_v46, 0.0 }
 0x35f   : > { %v2220_v48 = vpop.f32.mrf.mxu2  ;;  %v2309_v55 = vpop.f32.mrf.mxu3  ;;  %v2443_v35 = vmax.f32 %v2379_v5, 0.0 }
 0x360   : > { %v2221_v59 = vadd.f32 %v2220_v48, %v6245_v51  ;;  %v2044_v16 = vpop.f32.mrf.mxu0  ;;  %v2133_v21 = vpop.f32.mrf.mxu1  ;;  %v6448_v57 = vpack.c.bf16 %v2442_v45, %v2440_v53 }
 0x361   : > { %v2045_v17 = vadd.f32 %v2044_v16, %v6227_v7 }
 0x362   : > { %v2310_v33 = vadd.f32 %v2309_v55, %v2221_v59  ;;  %v1423_v59 = vadd.f32 %v7281_v11, %v6247_v12 }
 0x363   : > { %v2134_v47 = vadd.f32 %v2133_v21, %v2045_v17 }
 0x364   : > { %v2380_v52 = vmul.f32 %v2310_v33, %v1418_v58 }
 0x365   : > { %v2381_v44 = vmul.f32 %v2134_v47, %v1331_v19 }
 0x366   : > { %v2444_v46 = vmax.f32 %v2380_v52, 0.0 }
 0x367   : > { %v2445_v28 = vmax.f32 %v2381_v44, 0.0  ;;  %v2222_v10 = vpop.f32.mrf.mxu2  ;;  %v2311_v60 = vpop.f32.mrf.mxu3  ;;  %v7283_v44 = vld [vmem:[#allocation81_spill] sm:$0xff] }
 0x368   : > { %v2223_v8 = vadd.f32 %v2222_v10, %v6245_v51  ;;  %v2047_v38 = vpop.f32.mrf.mxu0  ;;  %v2136_v34 = vpop.f32.mrf.mxu1  ;;  %v7284_v10 = vld [vmem:[#allocation84_spill] sm:$0xff] }
 0x369   : > { %v2048_v49 = vadd.f32 %v2047_v38, %v6227_v7  ;;  %v6457_v24 = vpack.c.bf16 %v2445_v28, %v2443_v35  ;;  %v1425_v35 = vadd.f32 %v7283_v44, %v6247_v12 }
 0x36a   : > { %v2312_v36 = vadd.f32 %v2311_v60, %v2223_v8  ;;  %v1339_v60 = vadd.f32 %v7284_v10, %v6232_v29 }
 0x36b   : > { %v2137_v43 = vadd.f32 %v2136_v34, %v2048_v49  ;;  %2720 = vmatmul.bf16.gmra.mxu0 %v6317_v0  ;;  %2809 = vmatmul.bf16.gmra.mxu1 %v6328_v56  ;;  %v4510_v49 = vld [vmem:[#allocation7 + $0x48] sm:$0xf0] }
 0x36c   : > { %v2382_v4 = vmul.f32 %v2312_v36, %v1420_v31  ;;  %2898 = vmatmul.bf16.gmra.mxu2 %v6317_v0  ;;  %2987 = vmatmul.bf16.gmra.mxu3 %v6328_v56  ;;  %v7282_v56 = vld [vmem:[#allocation80_spill] sm:$0xff] }
 0x36d   : > { %v2383_v15 = vmul.f32 %v2137_v43, %v1334_v3  ;;  %v1336_v16 = vadd.f32 %v7282_v56, %v6232_v29  ;;  %v4513_v3 = vor.u32 %v4717_v22, %v4510_v49  ;;  %v4733_v43 = vld [vmem:[#allocation7 + $0xc4] sm:$0xf] }
 0x36e   : > { %v2446_v5 = vmax.f32 %v2382_v4, 0.0  ;;  %v4574_v4 = vld [vmem:[#allocation7 + $0xc8] sm:$0xf0] }
 0x36f   : > { %v2225_v42 = vpop.f32.mrf.mxu2  ;;  %v2314_v53 = vpop.f32.mrf.mxu3  ;;  %v2447_v13 = vmax.f32 %v2383_v15, 0.0  ;;  %3592 = vmatpush.bf16.msra.mxu2 %v4513_v3 }
 0x370   : > { %v2226_v45 = vadd.f32 %v2225_v42, %v6245_v51  ;;  %v2049_v48 = vpop.f32.mrf.mxu0  ;;  %v2138_v9 = vpop.f32.mrf.mxu1  ;;  %v6468_v55 = vpack.c.bf16 %v2446_v5, %v2444_v46  ;;  %v4577_v46 = vor.u32 %v4733_v43, %v4574_v4 }
 0x371   : > { %v2050_v30 = vadd.f32 %v2049_v48, %v6227_v7 }
 0x372   : > { %v2315_v0 = vadd.f32 %v2314_v53, %v2226_v45  ;;  %v7286_v53 = vld [vmem:[#allocation88_spill] sm:$0xff]  ;;  %3681 = vmatpush.bf16.msra.mxu3 %v4577_v46 }
 0x373   : > { %v2139_v21 = vadd.f32 %v2138_v9, %v2050_v30  ;;  %v1341_v45 = vadd.f32 %v7286_v53, %v6232_v29 }
 0x374   : > { %v2384_v2 = vmul.f32 %v2315_v0, %v1423_v59 }
 0x375   : > { %v2385_v23 = vmul.f32 %v2139_v21, %v1336_v16  ;;  %v4508_v16 = vld [vmem:[#allocation7 + $0x40] sm:$0xf]  ;;  %v4718_v21 = vld [vmem:[#allocation7 + $0x44] sm:$0xf0] }
 0x376   : > { %v2448_v38 = vmax.f32 %v2384_v2, 0.0 }
 0x377   : > { %v2449_v17 = vmax.f32 %v2385_v23, 0.0  ;;  %v2227_v39 = vpop.f32.mrf.mxu2  ;;  %v2316_v61 = vpop.f32.mrf.mxu3 }
 0x378   : > { %v2228_v58 = vadd.f32 %v2227_v39, %v6245_v51  ;;  %v2052_v33 = vpop.f32.mrf.mxu0  ;;  %v2141_v19 = vpop.f32.mrf.mxu1  ;;  %v4572_v39 = vld [vmem:[#allocation7 + $0xc0] sm:$0xf] }
 0x379   : > { %v2053_v47 = vadd.f32 %v2052_v33, %v6227_v7  ;;  %v6477_v52 = vpack.c.bf16 %v2449_v17, %v2447_v13  ;;  %v4509_v17 = vor.u32 %v4718_v21, %v4508_v16  ;;  %v7292_v16 = vld [vmem:[#allocation100_spill] sm:$0xff] }
 0x37a   : > { %v2317_v28 = vadd.f32 %v2316_v61, %v2228_v58  ;;  %v4734_v61 = vld [vmem:[#allocation7 + $0xc4] sm:$0xf0]  ;;  %v1349_v21 = vadd.f32 %v7292_v16, %v6232_v29 }
 0x37b   : > { %v2142_v40 = vadd.f32 %v2141_v19, %v2053_v47  ;;  %2725 = vmatmul.bf16.gmra.mxu0 %v6337_v25  ;;  %2814 = vmatmul.bf16.gmra.mxu1 %v6348_v18  ;;  %v4573_v33 = vor.u32 %v4734_v61, %v4572_v39  ;;  %v7287_v47 = vld [vmem:[#allocation89_spill] sm:$0xff] }
 0x37c   : > { %v2386_v37 = vmul.f32 %v2317_v28, %v1425_v35  ;;  %2903 = vmatmul.bf16.gmra.mxu2 %v6337_v25  ;;  %2992 = vmatmul.bf16.gmra.mxu3 %v6348_v18  ;;  %v7285_v18 = vld [vmem:[#allocation85_spill] sm:$0xff]  ;;  %v1430_v44 = vadd.f32 %v7287_v47, %v6247_v12  ;;  %v7288_v28 = vld [vmem:[#allocation92_spill] sm:$0xff] }
 0x37d   : > { %v2387_v8 = vmul.f32 %v2142_v40, %v1339_v60  ;;  %v1428_v5 = vadd.f32 %v7285_v18, %v6247_v12  ;;  %3414 = vmatpush.bf16.msra.mxu0 %v4509_v17  ;;  %v1344_v10 = vadd.f32 %v7288_v28, %v6232_v29  ;;  %3503 = vmatpush.bf16.msra.mxu1 %v4573_v33  ;;  %v4715_v33 = vld [vmem:[#allocation7 + $0x34] sm:$0xf]  ;;  %v4502_v47 = vld [vmem:[#allocation7 + $0x38] sm:$0xf0] }
 0x37e   : > { %v2450_v34 = vmax.f32 %v2386_v37, 0.0 }
 0x37f   : > { %v2230_v6 = vpop.f32.mrf.mxu2  ;;  %v2319_v41 = vpop.f32.mrf.mxu3  ;;  %v2451_v11 = vmax.f32 %v2387_v8, 0.0 }
 0x380   : > { %v2231_v50 = vadd.f32 %v2230_v6, %v6245_v51  ;;  %v2054_v31 = vpop.f32.mrf.mxu0  ;;  %v2143_v36 = vpop.f32.mrf.mxu1  ;;  %v6488_v15 = vpack.c.bf16 %v2450_v34, %v2448_v38 }
 0x381   : > { %v2055_v25 = vadd.f32 %v2054_v31, %v6227_v7 }
 0x382   : > { %v2320_v42 = vadd.f32 %v2319_v41, %v2231_v50 }
 0x383   : > { %v2144_v48 = vadd.f32 %v2143_v36, %v2055_v25  ;;  %v7289_v36 = vld [vmem:[#allocation93_spill] sm:$0xff] }
 0x384   : > { %v2388_v9 = vmul.f32 %v2320_v42, %v1428_v5  ;;  %v1433_v3 = vadd.f32 %v7289_v36, %v6247_v12 }
 0x385   : > { %v2389_v30 = vmul.f32 %v2144_v48, %v1341_v45 }
 0x386   : > { %v2452_v8 = vmax.f32 %v2388_v9, 0.0 }
 0x387   : > { %v2453_v59 = vmax.f32 %v2389_v30, 0.0  ;;  %v2232_v0 = vpop.f32.mrf.mxu2  ;;  %v2321_v56 = vpop.f32.mrf.mxu3 }
 0x388   : > { %v2233_v2 = vadd.f32 %v2232_v0, %v6245_v51  ;;  %v2057_v23 = vpop.f32.mrf.mxu0  ;;  %v2146_v13 = vpop.f32.mrf.mxu1 }
 0x389   : > { %v2058_v58 = vadd.f32 %v2057_v23, %v6227_v7  ;;  %v6497_v19 = vpack.c.bf16 %v2453_v59, %v2451_v11  ;;  %v7291_v59 = vld [vmem:[#allocation97_spill] sm:$0xff] }
 0x38a   : > { %v2322_v35 = vadd.f32 %v2321_v56, %v2233_v2  ;;  %v1435_v0 = vadd.f32 %v7291_v59, %v6247_v12  ;;  %v4732_v59 = vld [vmem:[#allocation7 + $0xb4] sm:$0xf0] }
 0x38b   : > { %v2147_v60 = vadd.f32 %v2146_v13, %v2058_v58  ;;  %2730 = vmatmul.bf16.gmra.mxu0 %v6357_v63  ;;  %2819 = vmatmul.bf16.gmra.mxu1 %v6368_v1 }
 0x38c   : > { %v2390_v40 = vmul.f32 %v2322_v35, %v1430_v44  ;;  %2908 = vmatmul.bf16.gmra.mxu2 %v6357_v63  ;;  %2997 = vmatmul.bf16.gmra.mxu3 %v6368_v1  ;;  %v7290_v1 = vld [vmem:[#allocation96_spill] sm:$0xff] }
 0x38d   : > { %v2391_v37 = vmul.f32 %v2147_v60, %v1344_v10  ;;  %v1346_v43 = vadd.f32 %v7290_v1, %v6232_v29  ;;  %v4505_v10 = vor.u32 %v4715_v33, %v4502_v47  ;;  %v4731_v60 = vld [vmem:[#allocation7 + $0xb4] sm:$0xf] }
 0x38e   : > { %v2454_v38 = vmax.f32 %v2390_v40, 0.0  ;;  %v4566_v40 = vld [vmem:[#allocation7 + $0xb8] sm:$0xf0] }
 0x38f   : > { %v2235_v34 = vpop.f32.mrf.mxu2  ;;  %v2324_v6 = vpop.f32.mrf.mxu3  ;;  %v2455_v18 = vmax.f32 %v2391_v37, 0.0  ;;  %3593 = vmatpush.bf16.msra.mxu2 %v4505_v10 }
 0x390   : > { %v2236_v41 = vadd.f32 %v2235_v34, %v6245_v51  ;;  %v2059_v22 = vpop.f32.mrf.mxu0  ;;  %v2148_v49 = vpop.f32.mrf.mxu1  ;;  %v6508_v50 = vpack.c.bf16 %v2454_v38, %v2452_v8  ;;  %v4569_v8 = vor.u32 %v4731_v60, %v4566_v40  ;;  %v7298_v60 = vld [vmem:[#allocation112_spill] sm:$0xff] }
 0x391   : > { %v2060_v31 = vadd.f32 %v2059_v22, %v6227_v7  ;;  %v1356_v40 = vadd.f32 %v7298_v60, %v6232_v29 }
 0x392   : > { %v2325_v63 = vadd.f32 %v2324_v6, %v2236_v41  ;;  %v7294_v6 = vld [vmem:[#allocation104_spill] sm:$0xff]  ;;  %3682 = vmatpush.bf16.msra.mxu3 %v4569_v8 }
 0x393   : > { %v2149_v4 = vadd.f32 %v2148_v49, %v2060_v31  ;;  %v1351_v41 = vadd.f32 %v7294_v6, %v6232_v29 }
 0x394   : > { %v2392_v25 = vmul.f32 %v2325_v63, %v1433_v3 }
 0x395   : > { %v2393_v46 = vmul.f32 %v2149_v4, %v1346_v43 }
 0x396   : > { %v2456_v17 = vmax.f32 %v2392_v25, 0.0 }
 0x397   : > { %v2457_v5 = vmax.f32 %v2393_v46, 0.0  ;;  %v2237_v42 = vpop.f32.mrf.mxu2  ;;  %v2326_v53 = vpop.f32.mrf.mxu3 }
 0x398   : > { %v2238_v45 = vadd.f32 %v2237_v42, %v6245_v51  ;;  %v2062_v48 = vpop.f32.mrf.mxu0  ;;  %v2151_v9 = vpop.f32.mrf.mxu1  ;;  %v4564_v42 = vld [vmem:[#allocation7 + $0xb0] sm:$0xf] }
 0x399   : > { %v2063_v30 = vadd.f32 %v2062_v48, %v6227_v7  ;;  %v6517_v11 = vpack.c.bf16 %v2457_v5, %v2455_v18  ;;  %v4500_v18 = vld [vmem:[#allocation7 + $0x30] sm:$0xf]  ;;  %v4716_v5 = vld [vmem:[#allocation7 + $0x34] sm:$0xf0] }
 0x39a   : > { %v2327_v56 = vadd.f32 %v2326_v53, %v2238_v45  ;;  %v7295_v45 = vld [vmem:[#allocation105_spill] sm:$0xff] }
 0x39b   : > { %v2152_v2 = vadd.f32 %v2151_v9, %v2063_v30  ;;  %2735 = vmatmul.bf16.gmra.mxu0 %v6377_v26  ;;  %2824 = vmatmul.bf16.gmra.mxu1 %v6388_v20  ;;  %v1440_v48 = vadd.f32 %v7295_v45, %v6247_v12  ;;  %v4501_v30 = vor.u32 %v4716_v5, %v4500_v18 }
 0x39c   : > { %v2394_v23 = vmul.f32 %v2327_v56, %v1435_v0  ;;  %2913 = vmatmul.bf16.gmra.mxu2 %v6377_v26  ;;  %3002 = vmatmul.bf16.gmra.mxu3 %v6388_v20  ;;  %v7293_v20 = vld [vmem:[#allocation101_spill] sm:$0xff]  ;;  %v7296_v0 = vld [vmem:[#allocation108_spill] sm:$0xff] }
 0x39d   : > { %v2395_v13 = vmul.f32 %v2152_v2, %v1349_v21  ;;  %v1438_v38 = vadd.f32 %v7293_v20, %v6247_v12  ;;  %v1354_v56 = vadd.f32 %v7296_v0, %v6232_v29  ;;  %v4565_v21 = vor.u32 %v4732_v59, %v4564_v42  ;;  %3415 = vmatpush.bf16.msra.mxu0 %v4501_v30  ;;  %v4713_v59 = vld [vmem:[#allocation7 + $0x24] sm:$0xf]  ;;  %v4494_v0 = vld [vmem:[#allocation7 + $0x28] sm:$0xf0] }
 0x39e   : > { %v2458_v39 = vmax.f32 %v2394_v23, 0.0 }
 0x39f   : > { %v2240_v61 = vpop.f32.mrf.mxu2  ;;  %v2329_v58 = vpop.f32.mrf.mxu3  ;;  %v2459_v36 = vmax.f32 %v2395_v13, 0.0  ;;  %3504 = vmatpush.bf16.msra.mxu1 %v4565_v21 }
 0x3a0   : > { %v2241_v44 = vadd.f32 %v2240_v61, %v6245_v51  ;;  %v2064_v35 = vpop.f32.mrf.mxu0  ;;  %v2153_v28 = vpop.f32.mrf.mxu1  ;;  %v6528_v37 = vpack.c.bf16 %v2458_v39, %v2456_v17 }
 0x3a1   : > { %v2065_v26 = vadd.f32 %v2064_v35, %v6227_v7 }
 0x3a2   : > { %v2330_v34 = vadd.f32 %v2329_v58, %v2241_v44 }
 0x3a3   : > { %v2154_v22 = vadd.f32 %v2153_v28, %v2065_v26  ;;  %v7297_v28 = vld [vmem:[#allocation109_spill] sm:$0xff] }
 0x3a4   : > { %v2396_v49 = vmul.f32 %v2330_v34, %v1438_v38 }
 0x3a5   : > { %v2397_v31 = vmul.f32 %v2154_v22, %v1351_v41 }
 0x3a6   : > { %v2460_v13 = vmax.f32 %v2396_v49, 0.0 }
 0x3a7   : > { %v2461_v3 = vmax.f32 %v2397_v31, 0.0  ;;  %v2242_v63 = vpop.f32.mrf.mxu2  ;;  %v2331_v1 = vpop.f32.mrf.mxu3 }
 0x3a8   : > { %v2243_v43 = vadd.f32 %v2242_v63, %v6245_v51  ;;  %v2067_v4 = vpop.f32.mrf.mxu0  ;;  %v2156_v25 = vpop.f32.mrf.mxu1 }
 0x3a9   : > { %v2068_v46 = vadd.f32 %v2067_v4, %v6227_v7  ;;  %v6537_v53 = vpack.c.bf16 %v2461_v3, %v2459_v36 }
 0x3aa   : > { %v2332_v9 = vadd.f32 %v2331_v1, %v2243_v43  ;;  %v7299_v1 = vld [vmem:[#allocation113_spill] sm:$0xff] }
 0x3ab   : > { %v2157_v16 = vadd.f32 %v2156_v25, %v2068_v46  ;;  %2740 = vmatmul.bf16.gmra.mxu0 %v6397_v14  ;;  %2829 = vmatmul.bf16.gmra.mxu1 %v6408_v62  ;;  %v1445_v43 = vadd.f32 %v7299_v1, %v6247_v12  ;;  %v7300_v25 = vld [vmem:[#allocation19_spill] sm:$0xff] }
 0x3ac   : > { %v2398_v2 = vmul.f32 %v2332_v9, %v1440_v48  ;;  %2918 = vmatmul.bf16.gmra.mxu2 %v6397_v14  ;;  %3007 = vmatmul.bf16.gmra.mxu3 %v6408_v62  ;;  %v1443_v14 = vadd.f32 %v7297_v28, %v6247_v12  ;;  %v2531_v62 = vld [vmem:[%s7137_s6] sm:$0x3] }
 0x3ad   : > { %v2399_v23 = vmul.f32 %v2157_v16, %v1354_v56  ;;  %v6558_v38 = vperm.slane %v2531_v62, 0 }
 0x3ae   : > { %v2462_v17 = vmax.f32 %v2398_v2, 0.0  ;;  %v4497_v2 = vor.u32 %v4713_v59, %v4494_v0 }
 0x3af   : > { %v2245_v39 = vpop.f32.mrf.mxu2  ;;  %v2334_v61 = vpop.f32.mrf.mxu3  ;;  %v2463_v6 = vmax.f32 %v2399_v23, 0.0  ;;  %v4729_v23 = vld [vmem:[#allocation7 + $0xa4] sm:$0xf] }
 0x3b0   : > { %v2246_v58 = vadd.f32 %v2245_v39, %v6245_v51  ;;  %v2069_v33 = vpop.f32.mrf.mxu0  ;;  %v2158_v47 = vpop.f32.mrf.mxu1  ;;  %v6548_v44 = vpack.c.bf16 %v2462_v17, %v2460_v13  ;;  %v7301_v39 = vld [vmem:[#allocation20_spill] sm:$0xff]  ;;  %3594 = vmatpush.bf16.msra.mxu2 %v4497_v2 }
 0x3b1   : > { %v2070_v35 = vadd.f32 %v2069_v33, %v6227_v7  ;;  %v4818_v7 = vld [vmem:[%s7133_s2] sm:$0xff] }
 0x3b2   : > { %v2335_v10 = vadd.f32 %v2334_v61, %v2246_v58  ;;  %v6563_v34 = vperm.slane %v4818_v7, 6  ;;  %v6579_v45 = vperm.slane %v4818_v7, 7  ;;  %v7302_v33 = vld [vmem:[#allocation21_spill] sm:$0xff] }
 0x3b3   : > { %v2159_v26 = vadd.f32 %v2158_v47, %v2070_v35 }
 0x3b4   : > { %v2400_v8 = vmul.f32 %v2335_v10, %v1443_v14  ;;  %v1457_v46 = vadd.f32 %v7300_v25, %v6563_v34  ;;  %v1546_v61 = vadd.f32 %v7301_v39, %v6579_v45  ;;  %v1459_v47 = vadd.f32 %v7302_v33, %v6563_v34 }
 0x3b5   : > { %v2401_v20 = vmul.f32 %v2159_v26, %v1356_v40  ;;  %v4492_v26 = vld [vmem:[#allocation7 + $0x20] sm:$0xf] }
 0x3b6   : > { %v2464_v12 = vmax.f32 %v2400_v8, 0.0  ;;  %v4714_v8 = vld [vmem:[#allocation7 + $0x24] sm:$0xf0] }
 0x3b7   : > { %v2465_v41 = vmax.f32 %v2401_v20, 0.0  ;;  %v2247_v22 = vpop.f32.mrf.mxu2  ;;  %v2336_v49 = vpop.f32.mrf.mxu3 }
 0x3b8   : > { %v2248_v31 = vadd.f32 %v2247_v22, %v6245_v51  ;;  %v2706_v36 = vpop.f32.mrf.mxu0  ;;  %v2795_v3 = vpop.f32.mrf.mxu1  ;;  %v6577_v51 = vperm.slane %v2531_v62, 1  ;;  %v4556_v22 = vld [vmem:[#allocation7 + $0xa0] sm:$0xf] }
 0x3b9   : > { %v2707_v29 = vadd.f32 %v2706_v36, %v6558_v38  ;;  %v6567_v63 = vpack.c.bf16 %v2465_v41, %v2463_v6  ;;  %v4493_v41 = vor.u32 %v4714_v8, %v4492_v26  ;;  %v7308_v26 = vld [vmem:[#allocation27_spill] sm:$0xff] }
 0x3ba   : > { %v2337_v4 = vadd.f32 %v2336_v49, %v2248_v31  ;;  %v4730_v49 = vld [vmem:[#allocation7 + $0xa4] sm:$0xf0]  ;;  %v1467_v8 = vadd.f32 %v7308_v26, %v6563_v34 }
 0x3bb   : > { %v2796_v18 = vadd.f32 %v2795_v3, %v2707_v29  ;;  %2745 = vmatmul.bf16.gmra.mxu0 %v6417_v32  ;;  %2834 = vmatmul.bf16.gmra.mxu1 %v6428_v27  ;;  %v4557_v3 = vor.u32 %v4730_v49, %v4556_v22  ;;  %v7303_v29 = vld [vmem:[#allocation22_spill] sm:$0xff] }
 0x3bc   : > { %v2402_v5 = vmul.f32 %v2337_v4, %v1445_v43  ;;  %2923 = vmatmul.bf16.gmra.mxu2 %v6417_v32  ;;  %3012 = vmatmul.bf16.gmra.mxu3 %v6428_v27  ;;  %v4558_v32 = vld [vmem:[#allocation7 + $0xa8] sm:$0xf0]  ;;  %v1548_v1 = vadd.f32 %v7303_v29, %v6579_v45  ;;  %v7304_v4 = vld [vmem:[#allocation23_spill] sm:$0xff]  ;;  %v4486_v29 = vld [vmem:[#allocation7 + $0x18] sm:$0xf0] }
 0x3bd   : > { %v3053_v42 = vmul.f32 %v2796_v18, %v1457_v46  ;;  %v4561_v17 = vor.u32 %v4729_v23, %v4558_v32  ;;  %3416 = vmatpush.bf16.msra.mxu0 %v4493_v41  ;;  %v1462_v25 = vadd.f32 %v7304_v4, %v6563_v34  ;;  %3505 = vmatpush.bf16.msra.mxu1 %v4557_v3  ;;  %v4711_v3 = vld [vmem:[#allocation7 + $0x14] sm:$0xf] }
 0x3be   : > { %v2466_v48 = vmax.f32 %v2402_v5, 0.0 }
 0x3bf   : > { %v2884_v9 = vpop.f32.mrf.mxu2  ;;  %v2973_v30 = vpop.f32.mrf.mxu3  ;;  %3683 = vmatpush.bf16.msra.mxu3 %v4561_v17  ;;  %v3117_v10 = vmax.f32 %v3053_v42, 0.0 }
 0x3c0   : > { %v2885_v56 = vadd.f32 %v2884_v9, %v6577_v51  ;;  %v2708_v16 = vpop.f32.mrf.mxu0  ;;  %v2797_v21 = vpop.f32.mrf.mxu1  ;;  %v6582_v13 = vpack.c.bf16 %v2466_v48, %v2464_v12 }
 0x3c1   : > { %v2709_v27 = vadd.f32 %v2708_v16, %v6558_v38 }
 0x3c2   : > { %v2974_v58 = vadd.f32 %v2973_v30, %v2885_v56 }
 0x3c3   : > { %v2798_v35 = vadd.f32 %v2797_v21, %v2709_v27  ;;  %v7305_v21 = vld [vmem:[#allocation24_spill] sm:$0xff] }
 0x3c4   : > { %v3054_v28 = vmul.f32 %v2974_v58, %v1546_v61  ;;  %v1551_v2 = vadd.f32 %v7305_v21, %v6579_v45 }
 0x3c5   : > { %v3055_v14 = vmul.f32 %v2798_v35, %v1459_v47 }
 0x3c6   : > { %v3118_v42 = vmax.f32 %v3054_v28, 0.0 }
 0x3c7   : > { %v3119_v62 = vmax.f32 %v3055_v14, 0.0  ;;  %v2886_v60 = vpop.f32.mrf.mxu2  ;;  %v2975_v40 = vpop.f32.mrf.mxu3 }
 0x3c8   : > { %v2887_v20 = vadd.f32 %v2886_v60, %v6577_v51  ;;  %v2711_v7 = vpop.f32.mrf.mxu0  ;;  %v2800_v6 = vpop.f32.mrf.mxu1 }
 0x3c9   : > { %v6590_v31 = vpack.c.bf16 %v3119_v62, %v3117_v10  ;;  %v2712_v36 = vadd.f32 %v2711_v7, %v6558_v38  ;;  %v7307_v62 = vld [vmem:[#allocation26_spill] sm:$0xff] }
 0x3ca   : > { %v2976_v43 = vadd.f32 %v2975_v40, %v2887_v20  ;;  %v1553_v60 = vadd.f32 %v7307_v62, %v6579_v45 }
 0x3cb   : > { %v2801_v46 = vadd.f32 %v2800_v6, %v2712_v36  ;;  %2750 = vmatmul.bf16.gmra.mxu0 %v6437_v54  ;;  %2839 = vmatmul.bf16.gmra.mxu1 %v6448_v57 }
 0x3cc   : > { %v3056_v18 = vmul.f32 %v2976_v43, %v1548_v1  ;;  %2928 = vmatmul.bf16.gmra.mxu2 %v6437_v54  ;;  %3017 = vmatmul.bf16.gmra.mxu3 %v6448_v57  ;;  %v7306_v57 = vld [vmem:[#allocation25_spill] sm:$0xff] }
 0x3cd   : > { %v3057_v5 = vmul.f32 %v2801_v46, %v1462_v25  ;;  %v1464_v23 = vadd.f32 %v7306_v57, %v6563_v34  ;;  %v4489_v25 = vor.u32 %v4711_v3, %v4486_v29  ;;  %v4727_v46 = vld [vmem:[#allocation7 + $0x94] sm:$0xf] }
 0x3ce   : > { %v3120_v12 = vmax.f32 %v3056_v18, 0.0  ;;  %v4550_v18 = vld [vmem:[#allocation7 + $0x98] sm:$0xf0] }
 0x3cf   : > { %v2889_v48 = vpop.f32.mrf.mxu2  ;;  %v2978_v9 = vpop.f32.mrf.mxu3  ;;  %v3121_v39 = vmax.f32 %v3057_v5, 0.0  ;;  %3595 = vmatpush.bf16.msra.mxu2 %v4489_v25 }
 0x3d0   : > { %v6601_v30 = vpack.c.bf16 %v3120_v12, %v3118_v42  ;;  %v2890_v59 = vadd.f32 %v2889_v48, %v6577_v51  ;;  %v2713_v0 = vpop.f32.mrf.mxu0  ;;  %v2802_v56 = vpop.f32.mrf.mxu1  ;;  %v4553_v42 = vor.u32 %v4727_v46, %v4550_v18 }
 0x3d1   : > { %v2714_v16 = vadd.f32 %v2713_v0, %v6558_v38 }
 0x3d2   : > { %v2979_v54 = vadd.f32 %v2978_v9, %v2890_v59  ;;  %v7310_v9 = vld [vmem:[#allocation29_spill] sm:$0xff]  ;;  %3684 = vmatpush.bf16.msra.mxu3 %v4553_v42 }
 0x3d3   : > { %v2803_v32 = vadd.f32 %v2802_v56, %v2714_v16  ;;  %v1469_v59 = vadd.f32 %v7310_v9, %v6563_v34 }
 0x3d4   : > { %v3058_v27 = vmul.f32 %v2979_v54, %v1551_v2 }
 0x3d5   : > { %v3059_v17 = vmul.f32 %v2803_v32, %v1464_v23  ;;  %v4484_v23 = vld [vmem:[#allocation7 + $0x10] sm:$0xf]  ;;  %v4712_v32 = vld [vmem:[#allocation7 + $0x14] sm:$0xf0] }
 0x3d6   : > { %v3122_v41 = vmax.f32 %v3058_v27, 0.0 }
 0x3d7   : > { %v3123_v61 = vmax.f32 %v3059_v17, 0.0  ;;  %v2891_v58 = vpop.f32.mrf.mxu2  ;;  %v2980_v33 = vpop.f32.mrf.mxu3 }
 0x3d8   : > { %v2892_v47 = vadd.f32 %v2891_v58, %v6577_v51  ;;  %v2716_v35 = vpop.f32.mrf.mxu0  ;;  %v2805_v28 = vpop.f32.mrf.mxu1  ;;  %v4548_v58 = vld [vmem:[#allocation7 + $0x90] sm:$0xf] }
 0x3d9   : > { %v2717_v14 = vadd.f32 %v2716_v35, %v6558_v38  ;;  %v6611_v10 = vpack.c.bf16 %v3123_v61, %v3121_v39  ;;  %v4485_v61 = vor.u32 %v4712_v32, %v4484_v23  ;;  %v7316_v23 = vld [vmem:[#allocation35_spill] sm:$0xff] }
 0x3da   : > { %v2981_v40 = vadd.f32 %v2980_v33, %v2892_v47  ;;  %v4728_v33 = vld [vmem:[#allocation7 + $0x94] sm:$0xf0]  ;;  %v1477_v32 = vadd.f32 %v7316_v23, %v6563_v34 }
 0x3db   : > { %v2806_v20 = vadd.f32 %v2805_v28, %v2717_v14  ;;  %2755 = vmatmul.bf16.gmra.mxu0 %v6457_v24  ;;  %2844 = vmatmul.bf16.gmra.mxu1 %v6468_v55  ;;  %v4549_v35 = vor.u32 %v4728_v33, %v4548_v58  ;;  %v7311_v14 = vld [vmem:[#allocation30_spill] sm:$0xff] }
 0x3dc   : > { %v3060_v7 = vmul.f32 %v2981_v40, %v1553_v60  ;;  %2933 = vmatmul.bf16.gmra.mxu2 %v6457_v24  ;;  %3022 = vmatmul.bf16.gmra.mxu3 %v6468_v55  ;;  %v7309_v55 = vld [vmem:[#allocation28_spill] sm:$0xff]  ;;  %v1558_v62 = vadd.f32 %v7311_v14, %v6579_v45  ;;  %v7312_v40 = vld [vmem:[#allocation31_spill] sm:$0xff]  ;;  %v4478_v14 = vld [vmem:[#allocation7 + $0x8] sm:$0xf0] }
 0x3dd   : > { %v3061_v6 = vmul.f32 %v2806_v20, %v1467_v8  ;;  %v1556_v12 = vadd.f32 %v7309_v55, %v6579_v45  ;;  %3417 = vmatpush.bf16.msra.mxu0 %v4485_v61  ;;  %v1472_v26 = vadd.f32 %v7312_v40, %v6563_v34  ;;  %3506 = vmatpush.bf16.msra.mxu1 %v4549_v35  ;;  %v4709_v35 = vld [vmem:[#allocation7 + $0x4] sm:$0xf] }
 0x3de   : > { %v3124_v22 = vmax.f32 %v3060_v7, 0.0 }
 0x3df   : > { %v2894_v49 = vpop.f32.mrf.mxu2  ;;  %v2983_v36 = vpop.f32.mrf.mxu3  ;;  %v3125_v21 = vmax.f32 %v3061_v6, 0.0 }
 0x3e0   : > { %v2895_v1 = vadd.f32 %v2894_v49, %v6577_v51  ;;  %v2718_v43 = vpop.f32.mrf.mxu0  ;;  %v2807_v4 = vpop.f32.mrf.mxu1  ;;  %v6622_v5 = vpack.c.bf16 %v3124_v22, %v3122_v41 }
 0x3e1   : > { %v2719_v24 = vadd.f32 %v2718_v43, %v6558_v38 }
 0x3e2   : > { %v2984_v48 = vadd.f32 %v2983_v36, %v2895_v1 }
 0x3e3   : > { %v2808_v0 = vadd.f32 %v2807_v4, %v2719_v24  ;;  %v7313_v4 = vld [vmem:[#allocation32_spill] sm:$0xff] }
 0x3e4   : > { %v3062_v56 = vmul.f32 %v2984_v48, %v1556_v12  ;;  %v1561_v25 = vadd.f32 %v7313_v4, %v6579_v45 }
 0x3e5   : > { %v3063_v16 = vmul.f32 %v2808_v0, %v1469_v59 }
 0x3e6   : > { %v3126_v6 = vmax.f32 %v3062_v56, 0.0 }
 0x3e7   : > { %v3127_v2 = vmax.f32 %v3063_v16, 0.0  ;;  %v2896_v54 = vpop.f32.mrf.mxu2  ;;  %v2985_v57 = vpop.f32.mrf.mxu3 }
 0x3e8   : > { %v2897_v27 = vadd.f32 %v2896_v54, %v6577_v51  ;;  %v2721_v17 = vpop.f32.mrf.mxu0  ;;  %v2810_v39 = vpop.f32.mrf.mxu1 }
 0x3e9   : > { %v2722_v47 = vadd.f32 %v2721_v17, %v6558_v38  ;;  %v6631_v28 = vpack.c.bf16 %v3127_v2, %v3125_v21  ;;  %v7315_v2 = vld [vmem:[#allocation34_spill] sm:$0xff] }
 0x3ea   : > { %v2986_v60 = vadd.f32 %v2985_v57, %v2897_v27  ;;  %v1563_v54 = vadd.f32 %v7315_v2, %v6579_v45 }
 0x3eb   : > { %v2811_v8 = vadd.f32 %v2810_v39, %v2722_v47  ;;  %2760 = vmatmul.bf16.gmra.mxu0 %v6477_v52  ;;  %2849 = vmatmul.bf16.gmra.mxu1 %v6488_v15 }
 0x3ec   : > { %v3064_v20 = vmul.f32 %v2986_v60, %v1558_v62  ;;  %2938 = vmatmul.bf16.gmra.mxu2 %v6477_v52  ;;  %3027 = vmatmul.bf16.gmra.mxu3 %v6488_v15  ;;  %v7314_v15 = vld [vmem:[#allocation33_spill] sm:$0xff] }
 0x3ed   : > { %v3065_v7 = vmul.f32 %v2811_v8, %v1472_v26  ;;  %v1474_v46 = vadd.f32 %v7314_v15, %v6563_v34  ;;  %v4481_v26 = vor.u32 %v4709_v35, %v4478_v14  ;;  %v4725_v8 = vld [vmem:[#allocation7 + $0x84] sm:$0xf] }
 0x3ee   : > { %v3128_v41 = vmax.f32 %v3064_v20, 0.0  ;;  %v4542_v20 = vld [vmem:[#allocation7 + $0x88] sm:$0xf0] }
 0x3ef   : > { %v2899_v22 = vpop.f32.mrf.mxu2  ;;  %v2988_v49 = vpop.f32.mrf.mxu3  ;;  %v3129_v55 = vmax.f32 %v3065_v7, 0.0  ;;  %3596 = vmatpush.bf16.msra.mxu2 %v4481_v26 }
 0x3f0   : > { %v2900_v36 = vadd.f32 %v2899_v22, %v6577_v51  ;;  %v2723_v3 = vpop.f32.mrf.mxu0  ;;  %v2812_v29 = vpop.f32.mrf.mxu1  ;;  %v6642_v1 = vpack.c.bf16 %v3128_v41, %v3126_v6  ;;  %v4545_v6 = vor.u32 %v4725_v8, %v4542_v20 }
 0x3f1   : > { %v2724_v43 = vadd.f32 %v2723_v3, %v6558_v38 }
 0x3f2   : > { %v2989_v52 = vadd.f32 %v2988_v49, %v2900_v36  ;;  %v7318_v49 = vld [vmem:[#allocation37_spill] sm:$0xff]  ;;  %3685 = vmatpush.bf16.msra.mxu3 %v4545_v6 }
 0x3f3   : > { %v2813_v18 = vadd.f32 %v2812_v29, %v2724_v43  ;;  %v1479_v36 = vadd.f32 %v7318_v49, %v6563_v34 }
 0x3f4   : > { %v3066_v24 = vmul.f32 %v2989_v52, %v1561_v25 }
 0x3f5   : > { %v3067_v42 = vmul.f32 %v2813_v18, %v1474_v46  ;;  %v4476_v46 = vld [vmem:[#allocation7] sm:$0xf]  ;;  %v4710_v18 = vld [vmem:[#allocation7 + $0x4] sm:$0xf0] }
 0x3f6   : > { %v3130_v61 = vmax.f32 %v3066_v24, 0.0 }
 0x3f7   : > { %v3131_v12 = vmax.f32 %v3067_v42, 0.0  ;;  %v2901_v48 = vpop.f32.mrf.mxu2  ;;  %v2990_v9 = vpop.f32.mrf.mxu3 }
 0x3f8   : > { %v2902_v59 = vadd.f32 %v2901_v48, %v6577_v51  ;;  %v2726_v0 = vpop.f32.mrf.mxu0  ;;  %v2815_v56 = vpop.f32.mrf.mxu1  ;;  %v4540_v48 = vld [vmem:[#allocation7 + $0x80] sm:$0xf] }
 0x3f9   : > { %v2727_v16 = vadd.f32 %v2726_v0, %v6558_v38  ;;  %v6651_v21 = vpack.c.bf16 %v3131_v12, %v3129_v55  ;;  %v4477_v12 = vor.u32 %v4710_v18, %v4476_v46  ;;  %v7324_v46 = vld [vmem:[#allocation48_spill] sm:$0xff] }
 0x3fa   : > { %v2991_v57 = vadd.f32 %v2990_v9, %v2902_v59  ;;  %v4726_v9 = vld [vmem:[#allocation7 + $0x84] sm:$0xf0]  ;;  %v1487_v18 = vadd.f32 %v7324_v46, %v6563_v34 }
 0x3fb   : > { %v2816_v27 = vadd.f32 %v2815_v56, %v2727_v16  ;;  %2765 = vmatmul.bf16.gmra.mxu0 %v6497_v19  ;;  %2854 = vmatmul.bf16.gmra.mxu1 %v6508_v50  ;;  %v4541_v0 = vor.u32 %v4726_v9, %v4540_v48  ;;  %v7319_v16 = vld [vmem:[#allocation38_spill] sm:$0xff] }
 0x3fc   : > { %v3068_v17 = vmul.f32 %v2991_v57, %v1563_v54  ;;  %2943 = vmatmul.bf16.gmra.mxu2 %v6497_v19  ;;  %3032 = vmatmul.bf16.gmra.mxu3 %v6508_v50  ;;  %v7317_v50 = vld [vmem:[#allocation36_spill] sm:$0xff]  ;;  %v1568_v2 = vadd.f32 %v7319_v16, %v6579_v45 }
 0x3fd   : > { %v3069_v39 = vmul.f32 %v2816_v27, %v1477_v32  ;;  %v1566_v41 = vadd.f32 %v7317_v50, %v6579_v45  ;;  %3418 = vmatpush.bf16.msra.mxu0 %v4477_v12  ;;  %v7320_v57 = vld [vmem:[#allocation40_spill] sm:$0xff]  ;;  %3507 = vmatpush.bf16.msra.mxu1 %v4541_v0 }
 0x3fe   : > { %v3132_v58 = vmax.f32 %v3068_v17, 0.0  ;;  %v1482_v23 = vadd.f32 %v7320_v57, %v6563_v34 }
 0x3ff   : > { %v2904_v33 = vpop.f32.mrf.mxu2  ;;  %v2993_v47 = vpop.f32.mrf.mxu3  ;;  %v3133_v4 = vmax.f32 %v3069_v39, 0.0 }
 0x400   : > { %v2905_v62 = vadd.f32 %v2904_v33, %v6577_v51  ;;  %v2728_v60 = vpop.f32.mrf.mxu0  ;;  %v2817_v40 = vpop.f32.mrf.mxu1  ;;  %v6662_v7 = vpack.c.bf16 %v3132_v58, %v3130_v61 }
 0x401   : > { %v2729_v19 = vadd.f32 %v2728_v60, %v6558_v38 }
 0x402   : > { %v2994_v22 = vadd.f32 %v2993_v47, %v2905_v62 }
 0x403   : > { %v2818_v3 = vadd.f32 %v2817_v40, %v2729_v19  ;;  %v7321_v40 = vld [vmem:[#allocation41_spill] sm:$0xff] }
 0x404   : > { %v3070_v29 = vmul.f32 %v2994_v22, %v1566_v41  ;;  %v1571_v26 = vadd.f32 %v7321_v40, %v6579_v45 }
 0x405   : > { %v3071_v43 = vmul.f32 %v2818_v3, %v1479_v36 }
 0x406   : > { %v3134_v39 = vmax.f32 %v3070_v29, 0.0 }
 0x407   : > { %v3135_v25 = vmax.f32 %v3071_v43, 0.0  ;;  %v2906_v52 = vpop.f32.mrf.mxu2  ;;  %v2995_v15 = vpop.f32.mrf.mxu3 }
 0x408   : > { %v2907_v24 = vadd.f32 %v2906_v52, %v6577_v51  ;;  %v2731_v42 = vpop.f32.mrf.mxu0  ;;  %v2820_v55 = vpop.f32.mrf.mxu1 }
 0x409   : > { %v2732_v59 = vadd.f32 %v2731_v42, %v6558_v38  ;;  %v6671_v56 = vpack.c.bf16 %v3135_v25, %v3133_v4  ;;  %v7323_v25 = vld [vmem:[#allocation45_spill] sm:$0xff] }
 0x40a   : > { %v2996_v54 = vadd.f32 %v2995_v15, %v2907_v24  ;;  %v1573_v52 = vadd.f32 %v7323_v25, %v6579_v45 }
 0x40b   : > { %v2821_v32 = vadd.f32 %v2820_v55, %v2732_v59  ;;  %2770 = vmatmul.bf16.gmra.mxu0 %v6517_v11  ;;  %2859 = vmatmul.bf16.gmra.mxu1 %v6528_v37 }
 0x40c   : > { %v3072_v27 = vmul.f32 %v2996_v54, %v1568_v2  ;;  %2948 = vmatmul.bf16.gmra.mxu2 %v6517_v11  ;;  %3037 = vmatmul.bf16.gmra.mxu3 %v6528_v37  ;;  %v7322_v37 = vld [vmem:[#allocation44_spill] sm:$0xff] }
 0x40d   : > { %v3073_v17 = vmul.f32 %v2821_v32, %v1482_v23  ;;  %v1484_v8 = vadd.f32 %v7322_v37, %v6563_v34  ;;  %v7325_v23 = vld [vmem:[#allocation49_spill] sm:$0xff]  ;;  %v7327_v37 = vld [vmem:[#allocation51_spill] sm:$0xff] }
 0x40e   : > { %v3136_v61 = vmax.f32 %v3072_v27, 0.0  ;;  %v1576_v32 = vadd.f32 %v7325_v23, %v6579_v45 }
 0x40f   : > { %v2909_v58 = vpop.f32.mrf.mxu2  ;;  %v2998_v33 = vpop.f32.mrf.mxu3  ;;  %v3137_v50 = vmax.f32 %v3073_v17, 0.0 }
 0x410   : > { %v2910_v47 = vadd.f32 %v2909_v58, %v6577_v51  ;;  %v2733_v35 = vpop.f32.mrf.mxu0  ;;  %v2822_v14 = vpop.f32.mrf.mxu1  ;;  %v6682_v62 = vpack.c.bf16 %v3136_v61, %v3134_v39 }
 0x411   : > { %v2734_v60 = vadd.f32 %v2733_v35, %v6558_v38 }
 0x412   : > { %v2999_v11 = vadd.f32 %v2998_v33, %v2910_v47 }
 0x413   : > { %v2823_v20 = vadd.f32 %v2822_v14, %v2734_v60 }
 0x414   : > { %v3074_v19 = vmul.f32 %v2999_v11, %v1571_v26 }
 0x415   : > { %v3075_v6 = vmul.f32 %v2823_v20, %v1484_v8  ;;  %v1578_v8 = vadd.f32 %v7327_v37, %v6579_v45 }
 0x416   : > { %v3138_v12 = vmax.f32 %v3074_v19, 0.0  ;;  %v7328_v19 = vld [vmem:[#allocation53_spill] sm:$0xff] }
 0x417   : > { %v3139_v41 = vmax.f32 %v3075_v6, 0.0  ;;  %v2911_v22 = vpop.f32.mrf.mxu2  ;;  %v3000_v49 = vpop.f32.mrf.mxu3  ;;  %v1492_v6 = vadd.f32 %v7328_v19, %v6563_v34 }
 0x418   : > { %v2912_v36 = vadd.f32 %v2911_v22, %v6577_v51  ;;  %v2736_v3 = vpop.f32.mrf.mxu0  ;;  %v2825_v29 = vpop.f32.mrf.mxu1 }
 0x419   : > { %v2737_v43 = vadd.f32 %v2736_v3, %v6558_v38  ;;  %v6691_v4 = vpack.c.bf16 %v3139_v41, %v3137_v50 }
 0x41a   : > { %v3001_v15 = vadd.f32 %v3000_v49, %v2912_v36 }
 0x41b   : > { %v2826_v24 = vadd.f32 %v2825_v29, %v2737_v43  ;;  %2775 = vmatmul.bf16.gmra.mxu0 %v6537_v53  ;;  %2864 = vmatmul.bf16.gmra.mxu1 %v6548_v44 }
 0x41c   : > { %v3076_v42 = vmul.f32 %v3001_v15, %v1573_v52  ;;  %2953 = vmatmul.bf16.gmra.mxu2 %v6537_v53  ;;  %3042 = vmatmul.bf16.gmra.mxu3 %v6548_v44  ;;  %v7326_v53 = vld [vmem:[#allocation50_spill] sm:$0xff] }
 0x41d   : > { %v3077_v55 = vmul.f32 %v2826_v24, %v1487_v18  ;;  %v1489_v44 = vadd.f32 %v7326_v53, %v6563_v34  ;;  %v7329_v18 = vld [vmem:[#allocation54_spill] sm:$0xff] }
 0x41e   : > { %v3140_v48 = vmax.f32 %v3076_v42, 0.0  ;;  %v1581_v24 = vadd.f32 %v7329_v18, %v6579_v45  ;;  %v7331_v53 = vld [vmem:[#allocation58_spill] sm:$0xff] }
 0x41f   : > { %v2914_v9 = vpop.f32.mrf.mxu2  ;;  %v3003_v59 = vpop.f32.mrf.mxu3  ;;  %v3141_v58 = vmax.f32 %v3077_v55, 0.0 }
 0x420   : > { %v2915_v0 = vadd.f32 %v2914_v9, %v6577_v51  ;;  %v2738_v16 = vpop.f32.mrf.mxu0  ;;  %v2827_v2 = vpop.f32.mrf.mxu1  ;;  %v6702_v54 = vpack.c.bf16 %v3140_v48, %v3138_v12 }
 0x421   : > { %v2739_v57 = vadd.f32 %v2738_v16, %v6558_v38 }
 0x422   : > { %v3004_v27 = vadd.f32 %v3003_v59, %v2915_v0 }
 0x423   : > { %v2828_v17 = vadd.f32 %v2827_v2, %v2739_v57 }
 0x424   : > { %v3078_v39 = vmul.f32 %v3004_v27, %v1576_v32 }
 0x425   : > { %v3079_v61 = vmul.f32 %v2828_v17, %v1489_v44  ;;  %v1583_v44 = vadd.f32 %v7331_v53, %v6579_v45 }
 0x426   : > { %v3142_v49 = vmax.f32 %v3078_v39, 0.0  ;;  %v7332_v39 = vld [vmem:[#allocation61_spill] sm:$0xff] }
 0x427   : > { %v3143_v33 = vmax.f32 %v3079_v61, 0.0  ;;  %v2916_v47 = vpop.f32.mrf.mxu2  ;;  %v3005_v35 = vpop.f32.mrf.mxu3  ;;  %v1497_v61 = vadd.f32 %v7332_v39, %v6563_v34 }
 0x428   : > { %v2917_v14 = vadd.f32 %v2916_v47, %v6577_v51  ;;  %v2741_v60 = vpop.f32.mrf.mxu0  ;;  %v2830_v40 = vpop.f32.mrf.mxu1 }
 0x429   : > { %v2742_v26 = vadd.f32 %v2741_v60, %v6558_v38  ;;  %v6711_v11 = vpack.c.bf16 %v3143_v33, %v3141_v58 }
 0x42a   : > { %v3006_v20 = vadd.f32 %v3005_v35, %v2917_v14 }
 0x42b   : > { %v2831_v50 = vadd.f32 %v2830_v40, %v2742_v26  ;;  %2780 = vmatmul.bf16.gmra.mxu0 %v6567_v63  ;;  %2869 = vmatmul.bf16.gmra.mxu1 %v6582_v13 }
 0x42c   : > { %v3080_v41 = vmul.f32 %v3006_v20, %v1578_v8  ;;  %2958 = vmatmul.bf16.gmra.mxu2 %v6567_v63  ;;  %3047 = vmatmul.bf16.gmra.mxu3 %v6582_v13  ;;  %v7330_v63 = vld [vmem:[#allocation57_spill] sm:$0xff] }
 0x42d   : > { %v3081_v22 = vmul.f32 %v2831_v50, %v1492_v6  ;;  %v1494_v13 = vadd.f32 %v7330_v63, %v6563_v34  ;;  %v7333_v6 = vld [vmem:[#allocation62_spill] sm:$0xff]  ;;  %v7335_v63 = vld [vmem:[#allocation64_spill] sm:$0xff] }
 0x42e   : > { %v3144_v36 = vmax.f32 %v3080_v41, 0.0  ;;  %v1586_v50 = vadd.f32 %v7333_v6, %v6579_v45 }
 0x42f   : > { %v2919_v3 = vpop.f32.mrf.mxu2  ;;  %v3008_v29 = vpop.f32.mrf.mxu3  ;;  %v3145_v9 = vmax.f32 %v3081_v22, 0.0 }
 0x430   : > { %v2920_v43 = vadd.f32 %v2919_v3, %v6577_v51  ;;  %v2743_v25 = vpop.f32.mrf.mxu0  ;;  %v2832_v52 = vpop.f32.mrf.mxu1  ;;  %v6722_v15 = vpack.c.bf16 %v3144_v36, %v3142_v49 }
 0x431   : > { %v2744_v46 = vadd.f32 %v2743_v25, %v6558_v38 }
 0x432   : > { %v3009_v42 = vadd.f32 %v3008_v29, %v2920_v43 }
 0x433   : > { %v2833_v55 = vadd.f32 %v2832_v52, %v2744_v46 }
 0x434   : > { %v3082_v12 = vmul.f32 %v3009_v42, %v1581_v24 }
 0x435   : > { %v3083_v48 = vmul.f32 %v2833_v55, %v1494_v13  ;;  %v1588_v13 = vadd.f32 %v7335_v63, %v6579_v45 }
 0x436   : > { %v3146_v35 = vmax.f32 %v3082_v12, 0.0  ;;  %v7336_v12 = vld [vmem:[#allocation65_spill] sm:$0xff] }
 0x437   : > { %v3147_v59 = vmax.f32 %v3083_v48, 0.0  ;;  %v2921_v0 = vpop.f32.mrf.mxu2  ;;  %v3010_v16 = vpop.f32.mrf.mxu3  ;;  %v1502_v48 = vadd.f32 %v7336_v12, %v6563_v34 }
 0x438   : > { %v2922_v2 = vadd.f32 %v2921_v0, %v6577_v51  ;;  %v2746_v57 = vpop.f32.mrf.mxu0  ;;  %v2835_v23 = vpop.f32.mrf.mxu1 }
 0x439   : > { %v2747_v32 = vadd.f32 %v2746_v57, %v6558_v38  ;;  %v6731_v27 = vpack.c.bf16 %v3147_v59, %v3145_v9 }
 0x43a   : > { %v3011_v17 = vadd.f32 %v3010_v16, %v2922_v2 }
 0x43b   : > { %v2836_v58 = vadd.f32 %v2835_v23, %v2747_v32  ;;  %3419 = vmatmul.bf16.vlgmr.msra.gmra.mxu0 %v6590_v31  ;;  %3508 = vmatmul.bf16.vlgmr.msra.gmra.mxu1 %v6601_v30 }
 0x43c   : > { %v3084_v33 = vmul.f32 %v3011_v17, %v1583_v44  ;;  %3597 = vmatmul.bf16.vlgmr.msra.gmra.mxu2 %v6590_v31  ;;  %3686 = vmatmul.bf16.vlgmr.msra.gmra.mxu3 %v6601_v30  ;;  %v7334_v31 = vld [vmem:[#allocation63_spill] sm:$0xff] }
 0x43d   : > { %v3085_v47 = vmul.f32 %v2836_v58, %v1497_v61  ;;  %v1499_v30 = vadd.f32 %v7334_v31, %v6563_v34  ;;  %v7337_v61 = vld [vmem:[#allocation66_spill] sm:$0xff] }
 0x43e   : > { %v3148_v14 = vmax.f32 %v3084_v33, 0.0  ;;  %v1591_v58 = vadd.f32 %v7337_v61, %v6579_v45  ;;  %v7339_v31 = vld [vmem:[#allocation70_spill] sm:$0xff] }
 0x43f   : > { %v2924_v60 = vpop.f32.mrf.mxu2  ;;  %v3013_v40 = vpop.f32.mrf.mxu3  ;;  %v3149_v3 = vmax.f32 %v3085_v47, 0.0 }
 0x440   : > { %v2925_v26 = vadd.f32 %v2924_v60, %v6577_v51  ;;  %v2748_v37 = vpop.f32.mrf.mxu0  ;;  %v2837_v8 = vpop.f32.mrf.mxu1  ;;  %v6742_v20 = vpack.c.bf16 %v3148_v14, %v3146_v35 }
 0x441   : > { %v2749_v19 = vadd.f32 %v2748_v37, %v6558_v38 }
 0x442   : > { %v3014_v41 = vadd.f32 %v3013_v40, %v2925_v26 }
 0x443   : > { %v2838_v22 = vadd.f32 %v2837_v8, %v2749_v19 }
 0x444   : > { %v3086_v49 = vmul.f32 %v3014_v41, %v1586_v50 }
 0x445   : > { %v3087_v36 = vmul.f32 %v2838_v22, %v1499_v30  ;;  %v1593_v30 = vadd.f32 %v7339_v31, %v6579_v45 }
 0x446   : > { %v3150_v16 = vmax.f32 %v3086_v49, 0.0  ;;  %v7340_v49 = vld [vmem:[#allocation73_spill] sm:$0xff] }
 0x447   : > { %v3151_v29 = vmax.f32 %v3087_v36, 0.0  ;;  %v2926_v43 = vpop.f32.mrf.mxu2  ;;  %v3015_v25 = vpop.f32.mrf.mxu3  ;;  %v1507_v36 = vadd.f32 %v7340_v49, %v6563_v34 }
 0x448   : > { %v2927_v52 = vadd.f32 %v2926_v43, %v6577_v51  ;;  %v2751_v46 = vpop.f32.mrf.mxu0  ;;  %v2840_v18 = vpop.f32.mrf.mxu1 }
 0x449   : > { %v2752_v24 = vadd.f32 %v2751_v46, %v6558_v38  ;;  %v6751_v42 = vpack.c.bf16 %v3151_v29, %v3149_v3 }
 0x44a   : > { %v3016_v55 = vadd.f32 %v3015_v25, %v2927_v52 }
 0x44b   : > { %v2841_v9 = vadd.f32 %v2840_v18, %v2752_v24  ;;  %3424 = vmatmul.bf16.gmra.mxu0 %v6611_v10  ;;  %3513 = vmatmul.bf16.gmra.mxu1 %v6622_v5 }
 0x44c   : > { %v3088_v59 = vmul.f32 %v3016_v55, %v1588_v13  ;;  %3602 = vmatmul.bf16.gmra.mxu2 %v6611_v10  ;;  %3691 = vmatmul.bf16.gmra.mxu3 %v6622_v5  ;;  %v7338_v10 = vld [vmem:[#allocation69_spill] sm:$0xff] }
 0x44d   : > { %v3089_v0 = vmul.f32 %v2841_v9, %v1502_v48  ;;  %v1504_v5 = vadd.f32 %v7338_v10, %v6563_v34  ;;  %v7341_v48 = vld [vmem:[#allocation74_spill] sm:$0xff]  ;;  %v7343_v10 = vld [vmem:[#allocation76_spill] sm:$0xff] }
 0x44e   : > { %v3152_v2 = vmax.f32 %v3088_v59, 0.0  ;;  %v1596_v9 = vadd.f32 %v7341_v48, %v6579_v45 }
 0x44f   : > { %v2929_v57 = vpop.f32.mrf.mxu2  ;;  %v3018_v23 = vpop.f32.mrf.mxu3  ;;  %v3153_v60 = vmax.f32 %v3089_v0, 0.0 }
 0x450   : > { %v2930_v32 = vadd.f32 %v2929_v57, %v6577_v51  ;;  %v2753_v53 = vpop.f32.mrf.mxu0  ;;  %v2842_v44 = vpop.f32.mrf.mxu1  ;;  %v6762_v17 = vpack.c.bf16 %v3152_v2, %v3150_v16 }
 0x451   : > { %v2754_v39 = vadd.f32 %v2753_v53, %v6558_v38 }
 0x452   : > { %v3019_v33 = vadd.f32 %v3018_v23, %v2930_v32 }
 0x453   : > { %v2843_v47 = vadd.f32 %v2842_v44, %v2754_v39 }
 0x454   : > { %v3090_v35 = vmul.f32 %v3019_v33, %v1591_v58 }
 0x455   : > { %v3091_v14 = vmul.f32 %v2843_v47, %v1504_v5  ;;  %v1598_v5 = vadd.f32 %v7343_v10, %v6579_v45 }
 0x456   : > { %v3154_v25 = vmax.f32 %v3090_v35, 0.0  ;;  %v7344_v35 = vld [vmem:[#allocation78_spill] sm:$0xff] }
 0x457   : > { %v3155_v40 = vmax.f32 %v3091_v14, 0.0  ;;  %v2931_v26 = vpop.f32.mrf.mxu2  ;;  %v3020_v37 = vpop.f32.mrf.mxu3  ;;  %v1512_v14 = vadd.f32 %v7344_v35, %v6563_v34 }
 0x458   : > { %v2932_v8 = vadd.f32 %v2931_v26, %v6577_v51  ;;  %v2756_v19 = vpop.f32.mrf.mxu0  ;;  %v2845_v6 = vpop.f32.mrf.mxu1 }
 0x459   : > { %v2757_v50 = vadd.f32 %v2756_v19, %v6558_v38  ;;  %v6771_v41 = vpack.c.bf16 %v3155_v40, %v3153_v60 }
 0x45a   : > { %v3021_v22 = vadd.f32 %v3020_v37, %v2932_v8 }
 0x45b   : > { %v2846_v3 = vadd.f32 %v2845_v6, %v2757_v50  ;;  %3429 = vmatmul.bf16.gmra.mxu0 %v6631_v28  ;;  %3518 = vmatmul.bf16.gmra.mxu1 %v6642_v1 }
 0x45c   : > { %v3092_v29 = vmul.f32 %v3021_v22, %v1593_v30  ;;  %3607 = vmatmul.bf16.gmra.mxu2 %v6631_v28  ;;  %3696 = vmatmul.bf16.gmra.mxu3 %v6642_v1  ;;  %v7342_v28 = vld [vmem:[#allocation75_spill] sm:$0xff] }
 0x45d   : > { %v3093_v43 = vmul.f32 %v2846_v3, %v1507_v36  ;;  %v1509_v1 = vadd.f32 %v7342_v28, %v6563_v34  ;;  %v7345_v36 = vld [vmem:[#allocation79_spill] sm:$0xff] }
 0x45e   : > { %v3156_v52 = vmax.f32 %v3092_v29, 0.0  ;;  %v1601_v3 = vadd.f32 %v7345_v36, %v6579_v45  ;;  %v7347_v28 = vld [vmem:[#allocation83_spill] sm:$0xff] }
 0x45f   : > { %v2934_v46 = vpop.f32.mrf.mxu2  ;;  %v3023_v18 = vpop.f32.mrf.mxu3  ;;  %v3157_v57 = vmax.f32 %v3093_v43, 0.0 }
 0x460   : > { %v2935_v24 = vadd.f32 %v2934_v46, %v6577_v51  ;;  %v2758_v63 = vpop.f32.mrf.mxu0  ;;  %v2847_v13 = vpop.f32.mrf.mxu1  ;;  %v6782_v55 = vpack.c.bf16 %v3156_v52, %v3154_v25 }
 0x461   : > { %v2759_v12 = vadd.f32 %v2758_v63, %v6558_v38 }
 0x462   : > { %v3024_v59 = vadd.f32 %v3023_v18, %v2935_v24 }
 0x463   : > { %v2848_v0 = vadd.f32 %v2847_v13, %v2759_v12 }
 0x464   : > { %v3094_v16 = vmul.f32 %v3024_v59, %v1596_v9 }
 0x465   : > { %v3095_v2 = vmul.f32 %v2848_v0, %v1509_v1  ;;  %v1603_v1 = vadd.f32 %v7347_v28, %v6579_v45 }
 0x466   : > { %v3158_v37 = vmax.f32 %v3094_v16, 0.0  ;;  %v7348_v16 = vld [vmem:[#allocation86_spill] sm:$0xff] }
 0x467   : > { %v3159_v23 = vmax.f32 %v3095_v2, 0.0  ;;  %v2936_v32 = vpop.f32.mrf.mxu2  ;;  %v3025_v53 = vpop.f32.mrf.mxu3  ;;  %v1517_v2 = vadd.f32 %v7348_v16, %v6563_v34 }
 0x468   : > { %v2937_v44 = vadd.f32 %v2936_v32, %v6577_v51  ;;  %v2761_v39 = vpop.f32.mrf.mxu0  ;;  %v2850_v61 = vpop.f32.mrf.mxu1 }
 0x469   : > { %v2762_v58 = vadd.f32 %v2761_v39, %v6558_v38  ;;  %v6791_v33 = vpack.c.bf16 %v3159_v23, %v3157_v57 }
 0x46a   : > { %v3026_v47 = vadd.f32 %v3025_v53, %v2937_v44 }
 0x46b   : > { %v2851_v60 = vadd.f32 %v2850_v61, %v2762_v58  ;;  %3434 = vmatmul.bf16.gmra.mxu0 %v6651_v21  ;;  %3523 = vmatmul.bf16.gmra.mxu1 %v6662_v7 }
 0x46c   : > { %v3096_v40 = vmul.f32 %v3026_v47, %v1598_v5  ;;  %3612 = vmatmul.bf16.gmra.mxu2 %v6651_v21  ;;  %3701 = vmatmul.bf16.gmra.mxu3 %v6662_v7  ;;  %v7346_v21 = vld [vmem:[#allocation82_spill] sm:$0xff] }
 0x46d   : > { %v3097_v26 = vmul.f32 %v2851_v60, %v1512_v14  ;;  %v1514_v7 = vadd.f32 %v7346_v21, %v6563_v34  ;;  %v7349_v14 = vld [vmem:[#allocation87_spill] sm:$0xff] }
 0x46e   : > { %v3160_v8 = vmax.f32 %v3096_v40, 0.0  ;;  %v1606_v60 = vadd.f32 %v7349_v14, %v6579_v45  ;;  %v7351_v21 = vld [vmem:[#allocation91_spill] sm:$0xff] }
 0x46f   : > { %v2939_v19 = vpop.f32.mrf.mxu2  ;;  %v3028_v6 = vpop.f32.mrf.mxu3  ;;  %v3161_v46 = vmax.f32 %v3097_v26, 0.0 }
 0x470   : > { %v2940_v50 = vadd.f32 %v2939_v19, %v6577_v51  ;;  %v2763_v31 = vpop.f32.mrf.mxu0  ;;  %v2852_v30 = vpop.f32.mrf.mxu1  ;;  %v6802_v22 = vpack.c.bf16 %v3160_v8, %v3158_v37 }
 0x471   : > { %v2764_v49 = vadd.f32 %v2763_v31, %v6558_v38 }
 0x472   : > { %v3029_v29 = vadd.f32 %v3028_v6, %v2940_v50 }
 0x473   : > { %v2853_v43 = vadd.f32 %v2852_v30, %v2764_v49 }
 0x474   : > { %v3098_v25 = vmul.f32 %v3029_v29, %v1601_v3 }
 0x475   : > { %v3099_v52 = vmul.f32 %v2853_v43, %v1514_v7  ;;  %v1608_v7 = vadd.f32 %v7351_v21, %v6579_v45 }
 0x476   : > { %v3162_v53 = vmax.f32 %v3098_v25, 0.0  ;;  %v7352_v25 = vld [vmem:[#allocation94_spill] sm:$0xff] }
 0x477   : > { %v3163_v18 = vmax.f32 %v3099_v52, 0.0  ;;  %v2941_v24 = vpop.f32.mrf.mxu2  ;;  %v3030_v63 = vpop.f32.mrf.mxu3  ;;  %v1522_v52 = vadd.f32 %v7352_v25, %v6563_v34 }
 0x478   : > { %v2942_v13 = vadd.f32 %v2941_v24, %v6577_v51  ;;  %v2766_v12 = vpop.f32.mrf.mxu0  ;;  %v2855_v48 = vpop.f32.mrf.mxu1 }
 0x479   : > { %v2767_v9 = vadd.f32 %v2766_v12, %v6558_v38  ;;  %v6811_v59 = vpack.c.bf16 %v3163_v18, %v3161_v46 }
 0x47a   : > { %v3031_v0 = vadd.f32 %v3030_v63, %v2942_v13 }
 0x47b   : > { %v2856_v57 = vadd.f32 %v2855_v48, %v2767_v9  ;;  %3439 = vmatmul.bf16.gmra.mxu0 %v6671_v56  ;;  %3528 = vmatmul.bf16.gmra.mxu1 %v6682_v62 }
 0x47c   : > { %v3100_v23 = vmul.f32 %v3031_v0, %v1603_v1  ;;  %3617 = vmatmul.bf16.gmra.mxu2 %v6671_v56  ;;  %3706 = vmatmul.bf16.gmra.mxu3 %v6682_v62  ;;  %v7350_v56 = vld [vmem:[#allocation90_spill] sm:$0xff] }
 0x47d   : > { %v3101_v32 = vmul.f32 %v2856_v57, %v1517_v2  ;;  %v1519_v62 = vadd.f32 %v7350_v56, %v6563_v34  ;;  %v7353_v2 = vld [vmem:[#allocation95_spill] sm:$0xff] }
 0x47e   : > { %v3164_v44 = vmax.f32 %v3100_v23, 0.0  ;;  %v1611_v57 = vadd.f32 %v7353_v2, %v6579_v45  ;;  %v7355_v56 = vld [vmem:[#allocation99_spill] sm:$0xff] }
 0x47f   : > { %v2944_v39 = vpop.f32.mrf.mxu2  ;;  %v3033_v61 = vpop.f32.mrf.mxu3  ;;  %v3165_v19 = vmax.f32 %v3101_v32, 0.0 }
 0x480   : > { %v2945_v58 = vadd.f32 %v2944_v39, %v6577_v51  ;;  %v2768_v10 = vpop.f32.mrf.mxu0  ;;  %v2857_v5 = vpop.f32.mrf.mxu1  ;;  %v6822_v47 = vpack.c.bf16 %v3164_v44, %v3162_v53 }
 0x481   : > { %v2769_v35 = vadd.f32 %v2768_v10, %v6558_v38 }
 0x482   : > { %v3034_v40 = vadd.f32 %v3033_v61, %v2945_v58 }
 0x483   : > { %v2858_v26 = vadd.f32 %v2857_v5, %v2769_v35 }
 0x484   : > { %v3102_v37 = vmul.f32 %v3034_v40, %v1606_v60 }
 0x485   : > { %v3103_v8 = vmul.f32 %v2858_v26, %v1519_v62  ;;  %v1613_v62 = vadd.f32 %v7355_v56, %v6579_v45 }
 0x486   : > { %v3166_v63 = vmax.f32 %v3102_v37, 0.0  ;;  %v7356_v37 = vld [vmem:[#allocation102_spill] sm:$0xff] }
 0x487   : > { %v3167_v6 = vmax.f32 %v3103_v8, 0.0  ;;  %v2946_v50 = vpop.f32.mrf.mxu2  ;;  %v3035_v31 = vpop.f32.mrf.mxu3  ;;  %v1527_v8 = vadd.f32 %v7356_v37, %v6563_v34 }
 0x488   : > { %v2947_v30 = vadd.f32 %v2946_v50, %v6577_v51  ;;  %v2771_v49 = vpop.f32.mrf.mxu0  ;;  %v2860_v36 = vpop.f32.mrf.mxu1 }
 0x489   : > { %v2772_v3 = vadd.f32 %v2771_v49, %v6558_v38  ;;  %v6831_v29 = vpack.c.bf16 %v3167_v6, %v3165_v19 }
 0x48a   : > { %v3036_v43 = vadd.f32 %v3035_v31, %v2947_v30 }
 0x48b   : > { %v2861_v46 = vadd.f32 %v2860_v36, %v2772_v3  ;;  %3444 = vmatmul.bf16.gmra.mxu0 %v6691_v4  ;;  %3533 = vmatmul.bf16.gmra.mxu1 %v6702_v54 }
 0x48c   : > { %v3104_v18 = vmul.f32 %v3036_v43, %v1608_v7  ;;  %3622 = vmatmul.bf16.gmra.mxu2 %v6691_v4  ;;  %3711 = vmatmul.bf16.gmra.mxu3 %v6702_v54  ;;  %v7354_v4 = vld [vmem:[#allocation98_spill] sm:$0xff] }
 0x48d   : > { %v3105_v24 = vmul.f32 %v2861_v46, %v1522_v52  ;;  %v1524_v54 = vadd.f32 %v7354_v4, %v6563_v34  ;;  %v7357_v52 = vld [vmem:[#allocation103_spill] sm:$0xff] }
 0x48e   : > { %v3168_v13 = vmax.f32 %v3104_v18, 0.0  ;;  %v1616_v46 = vadd.f32 %v7357_v52, %v6579_v45  ;;  %v7359_v4 = vld [vmem:[#allocation107_spill] sm:$0xff] }
 0x48f   : > { %v2949_v12 = vpop.f32.mrf.mxu2  ;;  %v3038_v48 = vpop.f32.mrf.mxu3  ;;  %v3169_v39 = vmax.f32 %v3105_v24, 0.0 }
 0x490   : > { %v2950_v9 = vadd.f32 %v2949_v12, %v6577_v51  ;;  %v2773_v28 = vpop.f32.mrf.mxu0  ;;  %v2862_v1 = vpop.f32.mrf.mxu1  ;;  %v6842_v0 = vpack.c.bf16 %v3168_v13, %v3166_v63 }
 0x491   : > { %v2774_v16 = vadd.f32 %v2773_v28, %v6558_v38 }
 0x492   : > { %v3039_v23 = vadd.f32 %v3038_v48, %v2950_v9 }
 0x493   : > { %v2863_v32 = vadd.f32 %v2862_v1, %v2774_v16 }
 0x494   : > { %v3106_v53 = vmul.f32 %v3039_v23, %v1611_v57 }
 0x495   : > { %v3107_v44 = vmul.f32 %v2863_v32, %v1524_v54  ;;  %v1618_v54 = vadd.f32 %v7359_v4, %v6579_v45 }
 0x496   : > { %v3170_v31 = vmax.f32 %v3106_v53, 0.0  ;;  %v7360_v53 = vld [vmem:[#allocation110_spill] sm:$0xff] }
 0x497   : > { %v3171_v61 = vmax.f32 %v3107_v44, 0.0  ;;  %v2951_v58 = vpop.f32.mrf.mxu2  ;;  %v3040_v10 = vpop.f32.mrf.mxu3  ;;  %v1532_v44 = vadd.f32 %v7360_v53, %v6563_v34 }
 0x498   : > { %v2952_v5 = vadd.f32 %v2951_v58, %v6577_v51  ;;  %v2776_v35 = vpop.f32.mrf.mxu0  ;;  %v2865_v14 = vpop.f32.mrf.mxu1 }
 0x499   : > { %v2777_v60 = vadd.f32 %v2776_v35, %v6558_v38  ;;  %v6851_v40 = vpack.c.bf16 %v3171_v61, %v3169_v39 }
 0x49a   : > { %v3041_v26 = vadd.f32 %v3040_v10, %v2952_v5 }
 0x49b   : > { %v2866_v19 = vadd.f32 %v2865_v14, %v2777_v60  ;;  %3449 = vmatmul.bf16.gmra.mxu0 %v6711_v11  ;;  %3538 = vmatmul.bf16.gmra.mxu1 %v6722_v15 }
 0x49c   : > { %v3108_v6 = vmul.f32 %v3041_v26, %v1613_v62  ;;  %3627 = vmatmul.bf16.gmra.mxu2 %v6711_v11  ;;  %3716 = vmatmul.bf16.gmra.mxu3 %v6722_v15  ;;  %v7358_v11 = vld [vmem:[#allocation106_spill] sm:$0xff] }
 0x49d   : > { %v3109_v50 = vmul.f32 %v2866_v19, %v1527_v8  ;;  %v1529_v15 = vadd.f32 %v7358_v11, %v6563_v34  ;;  %v7361_v8 = vld [vmem:[#allocation111_spill] sm:$0xff] }
 0x49e   : > { %v3172_v30 = vmax.f32 %v3108_v6, 0.0  ;;  %v7362_v6 = vld [vmem:[#allocation114_spill] sm:$0xff] }
 0x49f   : > { %v2954_v49 = vpop.f32.mrf.mxu2  ;;  %v3043_v36 = vpop.f32.mrf.mxu3  ;;  %v3173_v12 = vmax.f32 %v3109_v50, 0.0  ;;  %v1534_v50 = vadd.f32 %v7362_v6, %v6563_v34  ;;  %v7363_v34 = vld [vmem:[#allocation115_spill] sm:$0xff] }
 0x4a0   : > { %v2955_v3 = vadd.f32 %v2954_v49, %v6577_v51  ;;  %v2778_v21 = vpop.f32.mrf.mxu0  ;;  %v2867_v7 = vpop.f32.mrf.mxu1  ;;  %v6862_v43 = vpack.c.bf16 %v3172_v30, %v3170_v31 }
 0x4a1   : > { %v2779_v25 = vadd.f32 %v2778_v21, %v6558_v38 }
 0x4a2   : > { %v3044_v18 = vadd.f32 %v3043_v36, %v2955_v3 }
 0x4a3   : > { %v2868_v24 = vadd.f32 %v2867_v7, %v2779_v25 }
 0x4a4   : > { %v3110_v63 = vmul.f32 %v3044_v18, %v1616_v46 }
 0x4a5   : > { %v3111_v13 = vmul.f32 %v2868_v24, %v1529_v15  ;;  %v1623_v15 = vadd.f32 %v7363_v34, %v6579_v45 }
 0x4a6   : > { %v3174_v10 = vmax.f32 %v3110_v63, 0.0 }
 0x4a7   : > { %v3175_v48 = vmax.f32 %v3111_v13, 0.0  ;;  %v2956_v9 = vpop.f32.mrf.mxu2  ;;  %v3045_v28 = vpop.f32.mrf.mxu3 }
 0x4a8   : > { %v2957_v1 = vadd.f32 %v2956_v9, %v6577_v51  ;;  %v2781_v16 = vpop.f32.mrf.mxu0  ;;  %v2870_v2 = vpop.f32.mrf.mxu1 }
 0x4a9   : > { %v2782_v57 = vadd.f32 %v2781_v16, %v6558_v38  ;;  %v6871_v23 = vpack.c.bf16 %v3175_v48, %v3173_v12 }
 0x4aa   : > { %v3046_v32 = vadd.f32 %v3045_v28, %v2957_v1 }
 0x4ab   : > { %v2871_v39 = vadd.f32 %v2870_v2, %v2782_v57  ;;  %3454 = vmatmul.bf16.gmra.mxu0 %v6731_v27  ;;  %3543 = vmatmul.bf16.gmra.mxu1 %v6742_v20 }
 0x4ac   : > { %v3112_v61 = vmul.f32 %v3046_v32, %v1618_v54  ;;  %3632 = vmatmul.bf16.gmra.mxu2 %v6731_v27  ;;  %3721 = vmatmul.bf16.gmra.mxu3 %v6742_v20  ;;  %v1621_v27 = vadd.f32 %v7361_v8, %v6579_v45  ;;  %v3245_v20 = vld [vmem:[%s7139_s8] sm:$0x3] }
 0x4ad   : > { %v3113_v58 = vmul.f32 %v2871_v39, %v1532_v44  ;;  %v6893_v36 = vperm.slane %v3245_v20, 0 }
 0x4ae   : > { %v3176_v5 = vmax.f32 %v3112_v61, 0.0 }
 0x4af   : > { %v2959_v35 = vpop.f32.mrf.mxu2  ;;  %v3048_v14 = vpop.f32.mrf.mxu3  ;;  %v3177_v3 = vmax.f32 %v3113_v58, 0.0 }
 0x4b0   : > { %v2960_v60 = vadd.f32 %v2959_v35, %v6577_v51  ;;  %v2783_v56 = vpop.f32.mrf.mxu0  ;;  %v2872_v62 = vpop.f32.mrf.mxu1  ;;  %v6882_v26 = vpack.c.bf16 %v3176_v5, %v3174_v10 }
 0x4b1   : > { %v2784_v37 = vadd.f32 %v2783_v56, %v6558_v38 }
 0x4b2   : > { %v3049_v19 = vadd.f32 %v3048_v14, %v2960_v60 }
 0x4b3   : > { %v2873_v31 = vadd.f32 %v2872_v62, %v2784_v37 }
 0x4b4   : > { %v3114_v30 = vmul.f32 %v3049_v19, %v1621_v27 }
 0x4b5   : > { %v3115_v49 = vmul.f32 %v2873_v31, %v1534_v50 }
 0x4b6   : > { %v3178_v45 = vmax.f32 %v3114_v30, 0.0 }
 0x4b7   : > { %v3179_v21 = vmax.f32 %v3115_v49, 0.0  ;;  %v2961_v38 = vpop.f32.mrf.mxu2  ;;  %v3050_v7 = vpop.f32.mrf.mxu3 }
 0x4b8   : > { %v2962_v25 = vadd.f32 %v2961_v38, %v6577_v51  ;;  %v3420_v52 = vpop.f32.mrf.mxu0  ;;  %v3509_v46 = vpop.f32.mrf.mxu1  ;;  %v6907_v51 = vperm.slane %v3245_v20, 1 }
 0x4b9   : > { %v3421_v18 = vadd.f32 %v3420_v52, %v6893_v36  ;;  %v6899_v11 = vpack.c.bf16 %v3179_v21, %v3177_v3 }
 0x4ba   : > { %v3051_v24 = vadd.f32 %v3050_v7, %v2962_v25 }
 0x4bb   : > { %v3510_v63 = vadd.f32 %v3509_v46, %v3421_v18  ;;  %3459 = vmatmul.bf16.gmra.mxu0 %v6751_v42  ;;  %3548 = vmatmul.bf16.gmra.mxu1 %v6762_v17 }
 0x4bc   : > { %v3116_v13 = vmul.f32 %v3051_v24, %v1623_v15  ;;  %3637 = vmatmul.bf16.gmra.mxu2 %v6751_v42  ;;  %3726 = vmatmul.bf16.gmra.mxu3 %v6762_v17 }
 0x4bd   : > { %3767 = vst [vmem:[%s6909_s14] sm:$0xff] %v3510_v63 }
 0x4be   : > { %v3180_v12 = vmax.f32 %v3116_v13, 0.0 }
 0x4bf   : > { %v3598_v48 = vpop.f32.mrf.mxu2  ;;  %v3687_v9 = vpop.f32.mrf.mxu3 }
 0x4c0   : > { %v3599_v28 = vadd.f32 %v3598_v48, %v6907_v51  ;;  %v3422_v1 = vpop.f32.mrf.mxu0  ;;  %v3511_v16 = vpop.f32.mrf.mxu1  ;;  %v6913_v2 = vpack.c.bf16 %v3180_v12, %v3178_v45 }
 0x4c1   : > { %v3423_v42 = vadd.f32 %v3422_v1, %v6893_v36 }
 0x4c2   : > { %v3688_v17 = vadd.f32 %v3687_v9, %v3599_v28 }
 0x4c3   : > { %v3512_v57 = vadd.f32 %v3511_v16, %v3423_v42 }
 0x4c4   : > { %3768 = vst [vmem:[%s6909_s14 + $0x8] sm:$0xff] %v3688_v17 }
 0x4c5   : > { %3769 = vst [vmem:[%s6909_s14 + $0x10] sm:$0xff] %v3512_v57 }
 0x4c7   : > { %v3600_v4 = vpop.f32.mrf.mxu2  ;;  %v3689_v54 = vpop.f32.mrf.mxu3 }
 0x4c8   : > { %v3601_v32 = vadd.f32 %v3600_v4, %v6907_v51  ;;  %v3425_v53 = vpop.f32.mrf.mxu0  ;;  %v3514_v44 = vpop.f32.mrf.mxu1 }
 0x4c9   : > { %v3426_v39 = vadd.f32 %v3425_v53, %v6893_v36 }
 0x4ca   : > { %v3690_v61 = vadd.f32 %v3689_v54, %v3601_v32 }
 0x4cb   : > { %v3515_v58 = vadd.f32 %v3514_v44, %v3426_v39  ;;  %3464 = vmatmul.bf16.gmra.mxu0 %v6771_v41  ;;  %3553 = vmatmul.bf16.gmra.mxu1 %v6782_v55 }
 0x4cc   : > { %3770 = vst [vmem:[%s6909_s14 + $0x18] sm:$0xff] %v3690_v61  ;;  %3642 = vmatmul.bf16.gmra.mxu2 %v6771_v41  ;;  %3731 = vmatmul.bf16.gmra.mxu3 %v6782_v55 }
 0x4cd   : > { %3771 = vst [vmem:[%s6909_s14 + $0x20] sm:$0xff] %v3515_v58 }
 0x4cf   : > { %v3603_v10 = vpop.f32.mrf.mxu2  ;;  %v3692_v5 = vpop.f32.mrf.mxu3 }
 0x4d0   : > { %v3604_v35 = vadd.f32 %v3603_v10, %v6907_v51  ;;  %v3427_v14 = vpop.f32.mrf.mxu0  ;;  %v3516_v60 = vpop.f32.mrf.mxu1 }
 0x4d1   : > { %v3428_v56 = vadd.f32 %v3427_v14, %v6893_v36 }
 0x4d2   : > { %v3693_v62 = vadd.f32 %v3692_v5, %v3604_v35 }
 0x4d3   : > { %v3517_v37 = vadd.f32 %v3516_v60, %v3428_v56 }
 0x4d4   : > { %3772 = vst [vmem:[%s6909_s14 + $0x28] sm:$0xff] %v3693_v62 }
 0x4d5   : > { %3773 = vst [vmem:[%s6909_s14 + $0x30] sm:$0xff] %v3517_v37 }
 0x4d7   : > { %v3605_v8 = vpop.f32.mrf.mxu2  ;;  %v3694_v27 = vpop.f32.mrf.mxu3 }
 0x4d8   : > { %v3606_v41 = vadd.f32 %v3605_v8, %v6907_v51  ;;  %v3430_v55 = vpop.f32.mrf.mxu0  ;;  %v3519_v19 = vpop.f32.mrf.mxu1 }
 0x4d9   : > { %v3431_v20 = vadd.f32 %v3430_v55, %v6893_v36 }
 0x4da   : > { %v3695_v6 = vadd.f32 %v3694_v27, %v3606_v41 }
 0x4db   : > { %v3520_v50 = vadd.f32 %v3519_v19, %v3431_v20  ;;  %3469 = vmatmul.bf16.gmra.mxu0 %v6791_v33  ;;  %3558 = vmatmul.bf16.gmra.mxu1 %v6802_v22 }
 0x4dc   : > { %3774 = vst [vmem:[%s6909_s14 + $0x38] sm:$0xff] %v3695_v6  ;;  %3647 = vmatmul.bf16.gmra.mxu2 %v6791_v33  ;;  %3736 = vmatmul.bf16.gmra.mxu3 %v6802_v22 }
 0x4dd   : > { %3775 = vst [vmem:[%s6909_s14 + $0x40] sm:$0xff] %v3520_v50 }
 0x4df   : > { %v3608_v31 = vpop.f32.mrf.mxu2  ;;  %v3697_v30 = vpop.f32.mrf.mxu3 }
 0x4e0   : > { %v3609_v49 = vadd.f32 %v3608_v31, %v6907_v51  ;;  %v3432_v3 = vpop.f32.mrf.mxu0  ;;  %v3521_v21 = vpop.f32.mrf.mxu1 }
 0x4e1   : > { %v3433_v38 = vadd.f32 %v3432_v3, %v6893_v36 }
 0x4e2   : > { %v3698_v7 = vadd.f32 %v3697_v30, %v3609_v49 }
 0x4e3   : > { %v3522_v25 = vadd.f32 %v3521_v21, %v3433_v38 }
 0x4e4   : > { %3776 = vst [vmem:[%s6909_s14 + $0x48] sm:$0xff] %v3698_v7 }
 0x4e5   : > { %3777 = vst [vmem:[%s6909_s14 + $0x50] sm:$0xff] %v3522_v25 }
 0x4e7   : > { %v3610_v52 = vpop.f32.mrf.mxu2  ;;  %v3699_v46 = vpop.f32.mrf.mxu3 }
 0x4e8   : > { %v3611_v33 = vadd.f32 %v3610_v52, %v6907_v51  ;;  %v3435_v22 = vpop.f32.mrf.mxu0  ;;  %v3524_v18 = vpop.f32.mrf.mxu1 }
 0x4e9   : > { %v3436_v34 = vadd.f32 %v3435_v22, %v6893_v36 }
 0x4ea   : > { %v3700_v15 = vadd.f32 %v3699_v46, %v3611_v33 }
 0x4eb   : > { %v3525_v24 = vadd.f32 %v3524_v18, %v3436_v34  ;;  %3474 = vmatmul.bf16.gmra.mxu0 %v6811_v59  ;;  %3563 = vmatmul.bf16.gmra.mxu1 %v6822_v47 }
 0x4ec   : > { %3778 = vst [vmem:[%s6909_s14 + $0x58] sm:$0xff] %v3700_v15  ;;  %3652 = vmatmul.bf16.gmra.mxu2 %v6811_v59  ;;  %3741 = vmatmul.bf16.gmra.mxu3 %v6822_v47 }
 0x4ed   : > { %3779 = vst [vmem:[%s6909_s14 + $0x60] sm:$0xff] %v3525_v24 }
 0x4ef   : > { %v3613_v63 = vpop.f32.mrf.mxu2  ;;  %v3702_v13 = vpop.f32.mrf.mxu3 }
 0x4f0   : > { %v3614_v45 = vadd.f32 %v3613_v63, %v6907_v51  ;;  %v3437_v12 = vpop.f32.mrf.mxu0  ;;  %v3526_v48 = vpop.f32.mrf.mxu1 }
 0x4f1   : > { %v3438_v9 = vadd.f32 %v3437_v12, %v6893_v36 }
 0x4f2   : > { %v3703_v28 = vadd.f32 %v3702_v13, %v3614_v45 }
 0x4f3   : > { %v3527_v1 = vadd.f32 %v3526_v48, %v3438_v9 }
 0x4f4   : > { %3780 = vst [vmem:[%s6909_s14 + $0x68] sm:$0xff] %v3703_v28 }
 0x4f5   : > { %3781 = vst [vmem:[%s6909_s14 + $0x70] sm:$0xff] %v3527_v1 }
 0x4f7   : > { %v3615_v16 = vpop.f32.mrf.mxu2  ;;  %v3704_v42 = vpop.f32.mrf.mxu3 }
 0x4f8   : > { %v3616_v59 = vadd.f32 %v3615_v16, %v6907_v51  ;;  %v3440_v47 = vpop.f32.mrf.mxu0  ;;  %v3529_v17 = vpop.f32.mrf.mxu1 }
 0x4f9   : > { %v3441_v57 = vadd.f32 %v3440_v47, %v6893_v36 }
 0x4fa   : > { %v3705_v4 = vadd.f32 %v3704_v42, %v3616_v59 }
 0x4fb   : > { %v3530_v54 = vadd.f32 %v3529_v17, %v3441_v57  ;;  %3479 = vmatmul.bf16.gmra.mxu0 %v6831_v29  ;;  %3568 = vmatmul.bf16.gmra.mxu1 %v6842_v0 }
 0x4fc   : > { %3782 = vst [vmem:[%s6909_s14 + $0x78] sm:$0xff] %v3705_v4  ;;  %3657 = vmatmul.bf16.gmra.mxu2 %v6831_v29  ;;  %3746 = vmatmul.bf16.gmra.mxu3 %v6842_v0 }
 0x4fd   : > { %3783 = vst [vmem:[%s6909_s14 + $0x80] sm:$0xff] %v3530_v54 }
 0x4ff   : > { %v3618_v32 = vpop.f32.mrf.mxu2  ;;  %v3707_v53 = vpop.f32.mrf.mxu3 }
 0x500   : > { %v3619_v44 = vadd.f32 %v3618_v32, %v6907_v51  ;;  %v3442_v39 = vpop.f32.mrf.mxu0  ;;  %v3531_v61 = vpop.f32.mrf.mxu1 }
 0x501   : > { %v3443_v58 = vadd.f32 %v3442_v39, %v6893_v36 }
 0x502   : > { %v3708_v10 = vadd.f32 %v3707_v53, %v3619_v44 }
 0x503   : > { %v3532_v5 = vadd.f32 %v3531_v61, %v3443_v58 }
 0x504   : > { %3784 = vst [vmem:[%s6909_s14 + $0x88] sm:$0xff] %v3708_v10 }
 0x505   : > { %3785 = vst [vmem:[%s6909_s14 + $0x90] sm:$0xff] %v3532_v5 }
 0x507   : > { %v3620_v35 = vpop.f32.mrf.mxu2  ;;  %v3709_v14 = vpop.f32.mrf.mxu3 }
 0x508   : > { %v3621_v29 = vadd.f32 %v3620_v35, %v6907_v51  ;;  %v3445_v0 = vpop.f32.mrf.mxu0  ;;  %v3534_v60 = vpop.f32.mrf.mxu1 }
 0x509   : > { %v3446_v56 = vadd.f32 %v3445_v0, %v6893_v36 }
 0x50a   : > { %v3710_v62 = vadd.f32 %v3709_v14, %v3621_v29 }
 0x50b   : > { %v3535_v37 = vadd.f32 %v3534_v60, %v3446_v56  ;;  %3484 = vmatmul.bf16.gmra.mxu0 %v6851_v40  ;;  %3573 = vmatmul.bf16.gmra.mxu1 %v6862_v43 }
 0x50c   : > { %3786 = vst [vmem:[%s6909_s14 + $0x98] sm:$0xff] %v3710_v62  ;;  %3662 = vmatmul.bf16.gmra.mxu2 %v6851_v40  ;;  %3751 = vmatmul.bf16.gmra.mxu3 %v6862_v43 }
 0x50d   : > { %3787 = vst [vmem:[%s6909_s14 + $0xa0] sm:$0xff] %v3535_v37 }
 0x50f   : > { %v3623_v8 = vpop.f32.mrf.mxu2  ;;  %v3712_v27 = vpop.f32.mrf.mxu3 }
 0x510   : > { %v3624_v41 = vadd.f32 %v3623_v8, %v6907_v51  ;;  %v3447_v55 = vpop.f32.mrf.mxu0  ;;  %v3536_v19 = vpop.f32.mrf.mxu1 }
 0x511   : > { %v3448_v20 = vadd.f32 %v3447_v55, %v6893_v36 }
 0x512   : > { %v3713_v6 = vadd.f32 %v3712_v27, %v3624_v41 }
 0x513   : > { %v3537_v50 = vadd.f32 %v3536_v19, %v3448_v20 }
 0x514   : > { %3788 = vst [vmem:[%s6909_s14 + $0xa8] sm:$0xff] %v3713_v6 }
 0x515   : > { %3789 = vst [vmem:[%s6909_s14 + $0xb0] sm:$0xff] %v3537_v50 }
 0x517   : > { %v3625_v31 = vpop.f32.mrf.mxu2  ;;  %v3714_v30 = vpop.f32.mrf.mxu3 }
 0x518   : > { %v3626_v40 = vadd.f32 %v3625_v31, %v6907_v51  ;;  %v3450_v43 = vpop.f32.mrf.mxu0  ;;  %v3539_v49 = vpop.f32.mrf.mxu1 }
 0x519   : > { %v3451_v3 = vadd.f32 %v3450_v43, %v6893_v36 }
 0x51a   : > { %v3715_v21 = vadd.f32 %v3714_v30, %v3626_v40 }
 0x51b   : > { %v3540_v38 = vadd.f32 %v3539_v49, %v3451_v3  ;;  %3489 = vmatmul.bf16.gmra.mxu0 %v6871_v23  ;;  %3578 = vmatmul.bf16.gmra.mxu1 %v6882_v26 }
 0x51c   : > { %3790 = vst [vmem:[%s6909_s14 + $0xb8] sm:$0xff] %v3715_v21  ;;  %3667 = vmatmul.bf16.gmra.mxu2 %v6871_v23  ;;  %3756 = vmatmul.bf16.gmra.mxu3 %v6882_v26 }
 0x51d   : > { %3791 = vst [vmem:[%s6909_s14 + $0xc0] sm:$0xff] %v3540_v38 }
 0x51f   : > { %v3628_v7 = vpop.f32.mrf.mxu2  ;;  %v3717_v25 = vpop.f32.mrf.mxu3 }
 0x520   : > { %v3629_v52 = vadd.f32 %v3628_v7, %v6907_v51  ;;  %v3452_v46 = vpop.f32.mrf.mxu0  ;;  %v3541_v33 = vpop.f32.mrf.mxu1 }
 0x521   : > { %v3453_v22 = vadd.f32 %v3452_v46, %v6893_v36 }
 0x522   : > { %v3718_v18 = vadd.f32 %v3717_v25, %v3629_v52 }
 0x523   : > { %v3542_v34 = vadd.f32 %v3541_v33, %v3453_v22 }
 0x524   : > { %3792 = vst [vmem:[%s6909_s14 + $0xc8] sm:$0xff] %v3718_v18 }
 0x525   : > { %3793 = vst [vmem:[%s6909_s14 + $0xd0] sm:$0xff] %v3542_v34 }
 0x527   : > { %v3630_v15 = vpop.f32.mrf.mxu2  ;;  %v3719_v24 = vpop.f32.mrf.mxu3 }
 0x528   : > { %v3631_v23 = vadd.f32 %v3630_v15, %v6907_v51  ;;  %v3455_v26 = vpop.f32.mrf.mxu0  ;;  %v3544_v63 = vpop.f32.mrf.mxu1 }
 0x529   : > { %v3456_v13 = vadd.f32 %v3455_v26, %v6893_v36 }
 0x52a   : > { %v3720_v45 = vadd.f32 %v3719_v24, %v3631_v23 }
 0x52b   : > { %v3545_v12 = vadd.f32 %v3544_v63, %v3456_v13  ;;  %3494 = vmatmul.bf16.gmra.mxu0 %v6899_v11  ;;  %3583 = vmatmul.bf16.gmra.mxu1 %v6913_v2 }
 0x52c   : > { %3794 = vst [vmem:[%s6909_s14 + $0xd8] sm:$0xff] %v3720_v45  ;;  %3672 = vmatmul.bf16.gmra.mxu2 %v6899_v11  ;;  %3761 = vmatmul.bf16.gmra.mxu3 %v6913_v2 }
 0x52d   : > { %3795 = vst [vmem:[%s6909_s14 + $0xe0] sm:$0xff] %v3545_v12 }
 0x52f   : > { %v3633_v48 = vpop.f32.mrf.mxu2  ;;  %v3722_v9 = vpop.f32.mrf.mxu3 }
 0x530   : > { %v3634_v28 = vadd.f32 %v3633_v48, %v6907_v51  ;;  %v3457_v1 = vpop.f32.mrf.mxu0  ;;  %v3546_v16 = vpop.f32.mrf.mxu1 }
 0x531   : > { %v3458_v42 = vadd.f32 %v3457_v1, %v6893_v36 }
 0x532   : > { %v3723_v59 = vadd.f32 %v3722_v9, %v3634_v28 }
 0x533   : > { %v3547_v47 = vadd.f32 %v3546_v16, %v3458_v42 }
 0x534   : > { %3796 = vst [vmem:[%s6909_s14 + $0xe8] sm:$0xff] %v3723_v59 }
 0x535   : > { %3797 = vst [vmem:[%s6909_s14 + $0xf0] sm:$0xff] %v3547_v47 }
 0x537   : > { %v3635_v17 = vpop.f32.mrf.mxu2  ;;  %v3724_v57 = vpop.f32.mrf.mxu3 }
 0x538   : > { %v3636_v11 = vadd.f32 %v3635_v17, %v6907_v51  ;;  %v3460_v2 = vpop.f32.mrf.mxu0  ;;  %v3549_v4 = vpop.f32.mrf.mxu1 }
 0x539   : > { %v3461_v54 = vadd.f32 %v3460_v2, %v6893_v36 }
 0x53a   : > { %v3725_v32 = vadd.f32 %v3724_v57, %v3636_v11 }
 0x53b   : > { %v3550_v53 = vadd.f32 %v3549_v4, %v3461_v54 }
 0x53c   : > { %3798 = vst [vmem:[%s6909_s14 + $0xf8] sm:$0xff] %v3725_v32 }
 0x53d   : > { %3799 = vst [vmem:[%s6909_s14 + $0x100] sm:$0xff] %v3550_v53 }
 0x53f   : > { %v3638_v44 = vpop.f32.mrf.mxu2  ;;  %v3727_v39 = vpop.f32.mrf.mxu3 }
 0x540   : > { %v3639_v61 = vadd.f32 %v3638_v44, %v6907_v51  ;;  %v3462_v58 = vpop.f32.mrf.mxu0  ;;  %v3551_v10 = vpop.f32.mrf.mxu1 }
 0x541   : > { %v3463_v5 = vadd.f32 %v3462_v58, %v6893_v36 }
 0x542   : > { %v3728_v35 = vadd.f32 %v3727_v39, %v3639_v61 }
 0x543   : > { %v3552_v14 = vadd.f32 %v3551_v10, %v3463_v5 }
 0x544   : > { %3800 = vst [vmem:[%s6909_s14 + $0x108] sm:$0xff] %v3728_v35 }
 0x545   : > { %3801 = vst [vmem:[%s6909_s14 + $0x110] sm:$0xff] %v3552_v14 }
 0x547   : > { %v3640_v29 = vpop.f32.mrf.mxu2  ;;  %v3729_v0 = vpop.f32.mrf.mxu3 }
 0x548   : > { %v3641_v60 = vadd.f32 %v3640_v29, %v6907_v51  ;;  %v3465_v56 = vpop.f32.mrf.mxu0  ;;  %v3554_v62 = vpop.f32.mrf.mxu1 }
 0x549   : > { %v3466_v37 = vadd.f32 %v3465_v56, %v6893_v36 }
 0x54a   : > { %v3730_v8 = vadd.f32 %v3729_v0, %v3641_v60 }
 0x54b   : > { %v3555_v27 = vadd.f32 %v3554_v62, %v3466_v37 }
 0x54c   : > { %3802 = vst [vmem:[%s6909_s14 + $0x118] sm:$0xff] %v3730_v8 }
 0x54d   : > { %3803 = vst [vmem:[%s6909_s14 + $0x120] sm:$0xff] %v3555_v27 }
 0x54f   : > { %v3643_v41 = vpop.f32.mrf.mxu2  ;;  %v3732_v55 = vpop.f32.mrf.mxu3 }
 0x550   : > { %v3644_v19 = vadd.f32 %v3643_v41, %v6907_v51  ;;  %v3467_v20 = vpop.f32.mrf.mxu0  ;;  %v3556_v6 = vpop.f32.mrf.mxu1 }
 0x551   : > { %v3468_v50 = vadd.f32 %v3467_v20, %v6893_v36 }
 0x552   : > { %v3733_v31 = vadd.f32 %v3732_v55, %v3644_v19 }
 0x553   : > { %v3557_v30 = vadd.f32 %v3556_v6, %v3468_v50 }
 0x554   : > { %3804 = vst [vmem:[%s6909_s14 + $0x128] sm:$0xff] %v3733_v31 }
 0x555   : > { %3805 = vst [vmem:[%s6909_s14 + $0x130] sm:$0xff] %v3557_v30 }
 0x557   : > { %v3645_v40 = vpop.f32.mrf.mxu2  ;;  %v3734_v43 = vpop.f32.mrf.mxu3 }
 0x558   : > { %v3646_v49 = vadd.f32 %v3645_v40, %v6907_v51  ;;  %v3470_v3 = vpop.f32.mrf.mxu0  ;;  %v3559_v21 = vpop.f32.mrf.mxu1 }
 0x559   : > { %v3471_v38 = vadd.f32 %v3470_v3, %v6893_v36 }
 0x55a   : > { %v3735_v7 = vadd.f32 %v3734_v43, %v3646_v49 }
 0x55b   : > { %v3560_v25 = vadd.f32 %v3559_v21, %v3471_v38 }
 0x55c   : > { %3806 = vst [vmem:[%s6909_s14 + $0x138] sm:$0xff] %v3735_v7 }
 0x55d   : > { %3807 = vst [vmem:[%s6909_s14 + $0x140] sm:$0xff] %v3560_v25 }
 0x55f   : > { %v3648_v52 = vpop.f32.mrf.mxu2  ;;  %v3737_v46 = vpop.f32.mrf.mxu3 }
 0x560   : > { %v3649_v33 = vadd.f32 %v3648_v52, %v6907_v51  ;;  %v3472_v22 = vpop.f32.mrf.mxu0  ;;  %v3561_v18 = vpop.f32.mrf.mxu1 }
 0x561   : > { %v3473_v34 = vadd.f32 %v3472_v22, %v6893_v36 }
 0x562   : > { %v3738_v15 = vadd.f32 %v3737_v46, %v3649_v33 }
 0x563   : > { %v3562_v24 = vadd.f32 %v3561_v18, %v3473_v34 }
 0x564   : > { %3808 = vst [vmem:[%s6909_s14 + $0x148] sm:$0xff] %v3738_v15 }
 0x565   : > { %3809 = vst [vmem:[%s6909_s14 + $0x150] sm:$0xff] %v3562_v24 }
 0x567   : > { %v3650_v23 = vpop.f32.mrf.mxu2  ;;  %v3739_v26 = vpop.f32.mrf.mxu3 }
 0x568   : > { %v3651_v63 = vadd.f32 %v3650_v23, %v6907_v51  ;;  %v3475_v13 = vpop.f32.mrf.mxu0  ;;  %v3564_v45 = vpop.f32.mrf.mxu1 }
 0x569   : > { %v3476_v12 = vadd.f32 %v3475_v13, %v6893_v36 }
 0x56a   : > { %v3740_v48 = vadd.f32 %v3739_v26, %v3651_v63 }
 0x56b   : > { %v3565_v9 = vadd.f32 %v3564_v45, %v3476_v12 }
 0x56c   : > { %3810 = vst [vmem:[%s6909_s14 + $0x158] sm:$0xff] %v3740_v48 }
 0x56d   : > { %3811 = vst [vmem:[%s6909_s14 + $0x160] sm:$0xff] %v3565_v9 }
 0x56f   : > { %v3653_v28 = vpop.f32.mrf.mxu2  ;;  %v3742_v1 = vpop.f32.mrf.mxu3 }
 0x570   : > { %v3654_v16 = vadd.f32 %v3653_v28, %v6907_v51  ;;  %v3477_v42 = vpop.f32.mrf.mxu0  ;;  %v3566_v59 = vpop.f32.mrf.mxu1 }
 0x571   : > { %v3478_v47 = vadd.f32 %v3477_v42, %v6893_v36 }
 0x572   : > { %v3743_v17 = vadd.f32 %v3742_v1, %v3654_v16 }
 0x573   : > { %v3567_v57 = vadd.f32 %v3566_v59, %v3478_v47 }
 0x574   : > { %3812 = vst [vmem:[%s6909_s14 + $0x168] sm:$0xff] %v3743_v17 }
 0x575   : > { %3813 = vst [vmem:[%s6909_s14 + $0x170] sm:$0xff] %v3567_v57 }
 0x577   : > { %v3655_v11 = vpop.f32.mrf.mxu2  ;;  %v3744_v2 = vpop.f32.mrf.mxu3 }
 0x578   : > { %v3656_v4 = vadd.f32 %v3655_v11, %v6907_v51  ;;  %v3480_v54 = vpop.f32.mrf.mxu0  ;;  %v3569_v32 = vpop.f32.mrf.mxu1 }
 0x579   : > { %v3481_v53 = vadd.f32 %v3480_v54, %v6893_v36 }
 0x57a   : > { %v3745_v44 = vadd.f32 %v3744_v2, %v3656_v4 }
 0x57b   : > { %v3570_v39 = vadd.f32 %v3569_v32, %v3481_v53 }
 0x57c   : > { %3814 = vst [vmem:[%s6909_s14 + $0x178] sm:$0xff] %v3745_v44 }
 0x57d   : > { %3815 = vst [vmem:[%s6909_s14 + $0x180] sm:$0xff] %v3570_v39 }
 0x57f   : > { %v3658_v61 = vpop.f32.mrf.mxu2  ;;  %v3747_v58 = vpop.f32.mrf.mxu3 }
 0x580   : > { %v3659_v10 = vadd.f32 %v3658_v61, %v6907_v51  ;;  %v3482_v5 = vpop.f32.mrf.mxu0  ;;  %v3571_v35 = vpop.f32.mrf.mxu1 }
 0x581   : > { %v3483_v14 = vadd.f32 %v3482_v5, %v6893_v36 }
 0x582   : > { %v3748_v29 = vadd.f32 %v3747_v58, %v3659_v10 }
 0x583   : > { %v3572_v0 = vadd.f32 %v3571_v35, %v3483_v14 }
 0x584   : > { %3816 = vst [vmem:[%s6909_s14 + $0x188] sm:$0xff] %v3748_v29 }
 0x585   : > { %3817 = vst [vmem:[%s6909_s14 + $0x190] sm:$0xff] %v3572_v0 }
 0x587   : > { %v3660_v60 = vpop.f32.mrf.mxu2  ;;  %v3749_v56 = vpop.f32.mrf.mxu3 }
 0x588   : > { %v3661_v62 = vadd.f32 %v3660_v60, %v6907_v51  ;;  %v3485_v37 = vpop.f32.mrf.mxu0  ;;  %v3574_v8 = vpop.f32.mrf.mxu1 }
 0x589   : > { %v3486_v27 = vadd.f32 %v3485_v37, %v6893_v36 }
 0x58a   : > { %v3750_v41 = vadd.f32 %v3749_v56, %v3661_v62 }
 0x58b   : > { %v3575_v55 = vadd.f32 %v3574_v8, %v3486_v27 }
 0x58c   : > { %3818 = vst [vmem:[%s6909_s14 + $0x198] sm:$0xff] %v3750_v41 }
 0x58d   : > { %3819 = vst [vmem:[%s6909_s14 + $0x1a0] sm:$0xff] %v3575_v55 }
 0x58f   : > { %v3663_v19 = vpop.f32.mrf.mxu2  ;;  %v3752_v20 = vpop.f32.mrf.mxu3 }
 0x590   : > { %v3664_v6 = vadd.f32 %v3663_v19, %v6907_v51  ;;  %v3487_v50 = vpop.f32.mrf.mxu0  ;;  %v3576_v31 = vpop.f32.mrf.mxu1 }
 0x591   : > { %v3488_v30 = vadd.f32 %v3487_v50, %v6893_v36 }
 0x592   : > { %v3753_v40 = vadd.f32 %v3752_v20, %v3664_v6 }
 0x593   : > { %v3577_v43 = vadd.f32 %v3576_v31, %v3488_v30 }
 0x594   : > { %3820 = vst [vmem:[%s6909_s14 + $0x1a8] sm:$0xff] %v3753_v40 }
 0x595   : > { %3821 = vst [vmem:[%s6909_s14 + $0x1b0] sm:$0xff] %v3577_v43 }
 0x597   : > { %v3665_v49 = vpop.f32.mrf.mxu2  ;;  %v3754_v3 = vpop.f32.mrf.mxu3 }
 0x598   : > { %v3666_v21 = vadd.f32 %v3665_v49, %v6907_v51  ;;  %v3490_v38 = vpop.f32.mrf.mxu0  ;;  %v3579_v7 = vpop.f32.mrf.mxu1 }
 0x599   : > { %v3491_v25 = vadd.f32 %v3490_v38, %v6893_v36 }
 0x59a   : > { %v3755_v52 = vadd.f32 %v3754_v3, %v3666_v21 }
 0x59b   : > { %v3580_v46 = vadd.f32 %v3579_v7, %v3491_v25 }
 0x59c   : > { %3822 = vst [vmem:[%s6909_s14 + $0x1b8] sm:$0xff] %v3755_v52 }
 0x59d   : > { %3823 = vst [vmem:[%s6909_s14 + $0x1c0] sm:$0xff] %v3580_v46 }
 0x59f   : > { %v3668_v33 = vpop.f32.mrf.mxu2  ;;  %v3757_v22 = vpop.f32.mrf.mxu3 }
 0x5a0   : > { %v3669_v18 = vadd.f32 %v3668_v33, %v6907_v51  ;;  %v3492_v34 = vpop.f32.mrf.mxu0  ;;  %v3581_v15 = vpop.f32.mrf.mxu1 }
 0x5a1   : > { %v3493_v24 = vadd.f32 %v3492_v34, %v6893_v36 }
 0x5a2   : > { %v3758_v23 = vadd.f32 %v3757_v22, %v3669_v18 }
 0x5a3   : > { %v3582_v26 = vadd.f32 %v3581_v15, %v3493_v24 }
 0x5a4   : > { %3824 = vst [vmem:[%s6909_s14 + $0x1c8] sm:$0xff] %v3758_v23 }
 0x5a5   : > { %3825 = vst [vmem:[%s6909_s14 + $0x1d0] sm:$0xff] %v3582_v26 }
 0x5a7   : > { %v3670_v63 = vpop.f32.mrf.mxu2  ;;  %v3759_v13 = vpop.f32.mrf.mxu3 }
 0x5a8   : > { %v3671_v45 = vadd.f32 %v3670_v63, %v6907_v51  ;;  %v3495_v12 = vpop.f32.mrf.mxu0  ;;  %v3584_v48 = vpop.f32.mrf.mxu1 }
 0x5a9   : > { %v3496_v9 = vadd.f32 %v3495_v12, %v6893_v36 }
 0x5aa   : > { %v3760_v28 = vadd.f32 %v3759_v13, %v3671_v45 }
 0x5ab   : > { %v3585_v1 = vadd.f32 %v3584_v48, %v3496_v9 }
 0x5ac   : > { %3826 = vst [vmem:[%s6909_s14 + $0x1d8] sm:$0xff] %v3760_v28 }
 0x5ad   : > { %3827 = vst [vmem:[%s6909_s14 + $0x1e0] sm:$0xff] %v3585_v1 }
 0x5af   : > { %v3673_v16 = vpop.f32.mrf.mxu2  ;;  %v3762_v42 = vpop.f32.mrf.mxu3 }
 0x5b0   : > { %v3674_v59 = vadd.f32 %v3673_v16, %v6907_v51  ;;  %v3497_v47 = vpop.f32.mrf.mxu0  ;;  %v3586_v11 = vpop.f32.mrf.mxu1 }
 0x5b1   : > { %v3498_v17 = vadd.f32 %v3497_v47, %v6893_v36 }
 0x5b2   : > { %v3763_v57 = vadd.f32 %v3762_v42, %v3674_v59 }
 0x5b3   : > { %v3587_v2 = vadd.f32 %v3586_v11, %v3498_v17 }
 0x5b4   : > { %3828 = vst [vmem:[%s6909_s14 + $0x1e8] sm:$0xff] %v3763_v57 }
 0x5b5   : > { %3829 = vst [vmem:[%s6909_s14 + $0x1f0] sm:$0xff] %v3587_v2 }
 0x5b7   : > { %v3675_v4 = vpop.f32.mrf.mxu2  ;;  %v3764_v32 = vpop.f32.mrf.mxu3 }
 0x5b8   : > { %v3676_v54 = vadd.f32 %v3675_v4, %v6907_v51  ;;  %3838 = sbr.rel (!%p5088_p5) target bundleno = 1500 (0x5dc), region = 72 }
 0x5ba   : > { %v3765_v53 = vadd.f32 %v3764_v32, %v3676_v54 }
 0x5bc   : > { %3830 = vst [vmem:[%s6909_s14 + $0x1f8] sm:$0xff] %v3765_v53 }
 0x5bd   : > { %s7371_s27 = smov (!%p3841_p0, %s3840_s27), 32 }
 0x5be   : > { %s4741_s3 = sshll.u32 %s7371_s27, 4 }
 0x5bf   : > { %s3845_s17 = ssub.s32 512, %s4741_s3 }
 0x5c0   : > { %s3846_s18 = sshll.u32 %s3845_s17, 4 }
 0x5c1   : > { %3847 = vsyncadd %s7070_s16, %s3846_s18  ;;  %p7079_p1 = scmp.ne.s32.totalorder %s4741_s3, 0  ;;  %s4743_s19 = sshll.u32 %s5071_s13, 9 }
 0x5c2   : > { %s3851_s25 = scalar_lea.hbm %s7140_s9, %s4743_s19  ;;  %s3853_s26 = sshll.u32 %s6909_s14, 4  ;;  %s7088_s26 = int_to_ptr.vmem [resolvable:$true] %s3853_s26 }
 0x5c3   : > { %s3855_s21 = sshll.u32 %s3851_s25, 4  ;;  %s4610_s24 = sshll.u32 %s7371_s27, 8  ;;  %s7090_s21 = int_to_ptr.hbm [resolvable:$true] %s3855_s21 }
 0x5c4   : > { %s4909_s28 = sshra.s32 %s7088_s26, 4  ;;  %s4911_s29 = sshrl.u32 %s4610_s24, 4  ;;  %s4910_s28 = int_to_ptr.vmem [resolvable:$true] %s4909_s28 }
 0x5c5   : > { %s4916_s3 = scalar_lea.vmem %s4910_s28, %s4911_s29  ;;  %s4997_s13 = smov [#allocation8]  }
 0x5c6   : > { %p4917_p2 = scmp.ne.s32.totalorder %s4910_s28, %s4916_s3  ;;  %s4920_s17 = scalar_lea.vmem %s4997_s13, 1024 }
 0x5c7   : > { %p4922_p5 = scmp.lt.s32.totalorder %s4920_s17, %s4916_s3 }
 0x5c8   : > { %p4918_p3 = pnand %p4917_p2, %p7079_p1 }
 0x5ca   : > { %p4919_p4 = pneg %p4918_p3 }
 0x5cc   : > { %p4924_p7 = pnand %p4922_p5, %p4919_p4 }
 0x5ce   : > { %4927 = shalt.err (!%p4924_p7)
}
 0x5cf   : > { %s4928_s14 = sshra.s32 %s7090_s21, 4  ;;  %s4939_s5 = scalar_lea.hbm %s7140_s9, 768  ;;  %s4929_s14 = int_to_ptr.hbm [resolvable:$true] %s4928_s14 }
 0x5d0   : > { %s4935_s18 = scalar_lea.hbm %s4929_s14, %s4911_s29  ;;  %p4940_p11 = scmp.lt.s32.totalorder %s4929_s14, %s7140_s9 }
 0x5d1   : > { %p4936_p8 = scmp.ne.s32.totalorder %s4929_s14, %s4935_s18  ;;  %p4941_p12 = scmp.lt.s32.totalorder %s4939_s5, %s4935_s18 }
 0x5d3   : > { %p4937_p9 = pnand %p4936_p8, %p7079_p1  ;;  %p4942_p13 = por %p4941_p12, %p4940_p11 }
 0x5d5   : > { %p4938_p10 = pneg %p4937_p9 }
 0x5d7   : > { %p4943_p0 = pnand %p4942_p13, %p4938_p10 }
 0x5d9   : > { %4946 = shalt.err (!%p4943_p0)
}
 0x5da   : > { %s4998_s3 = smov 256   ;;  %s4999_s29 = smov 16  }
 0x5db   : > { %3861 = dma.vmem_to_hbm [thread:$0]  (%p7079_p1), %s7088_s26, %s4610_s24, %s7090_s21, %s7070_s16, %s4998_s3, %s4998_s3, %s4999_s29  }
 0x5dc PF: > { %p4777_p2 = scmp.ge.s32.totalorder %s4990_s12, 2  ;;  %s3870_s13 = sand.u32 1, %s4978_s30  }
 0x5dd   : > { %s3871_s17 = scalar_lea.sflag [#allocation4], %s3870_s13 }
 0x5de   : > { %p4768_p3 = pnand %p4777_p2, %p5092_p6 }
 0x5e0   : > { %p4769_p4 = pneg %p4768_p3 }
 0x5e2   : > { %4973 = dma.done.wait (%p4769_p4), %s3871_s17, 8192  }
 0x5e3   : > { %4975 = vsyncadd (%p4769_p4), %s3871_s17, 4294959104  ;;  %s7365_s14 = sld [smem:[#allocation12_spill]]  ;;  %p21_p5 = scmp.ge.s32.totalorder %s5075_s15, 4  }
 0x5e4   : > { %s7366_s30 = smov %s4982_s10  ;;  %s7367_s10 = smov %s4986_s11 }
 0x5e5   : > { %s7369_s12 = smov %s5075_s15  ;;  %23 = sbr.rel (!%p21_p5) target bundleno = 8 (0x8), region = 104 }
 0x5e9   : > { %s7368_s11 = smov %s7365_s14 }
 0x5ea   :  { %3877 = vsyncpa [#allocation3], 1 }
 0x5eb   :  { %3879 = vsyncpa [#allocation3 + $0x1], 1 }
 0x5ec   :  { %3880 = vsyncpa [#allocation6], 1 }
 0x5ed   :  { %3881 = vsyncpa [#allocation4], 1 }
 0x5ee   :  { %3883 = vsyncpa [#allocation4 + $0x1], 1 }

</bundles_post_ra>
